<compile_context>
chip_gen: v6e
topology: v6e:2x2x1
jax: 0.10.0
libtpu: 0.0.40
codegen_flags: <defaults>
</compile_context>

<pallas_src>
import numpy as np

import jax
import jax.numpy as jnp
from jax import lax
from jax.experimental import pallas as pl
from jax.experimental.pallas import tpu as pltpu

_BN_EPS = 1e-5


# ---------------------------------------------------------------------------
# Constant Haar DWT / IWT band matrices (host side, passed as kernel inputs).
# ---------------------------------------------------------------------------
def _dwt_matrices(H, W):
    """D[s] of shape (H/2*W/2, H*W): band_s_flat = D[s] @ x_flat (LL,HL,LH,HH)."""
    H2, W2 = H // 2, W // 2
    D = np.zeros((4, H2 * W2, H * W), np.float32)
    signs = np.array([[1, 1, 1, 1],      # LL
                      [-1, -1, 1, 1],    # HL
                      [-1, 1, -1, 1],    # LH
                      [1, -1, -1, 1]],   # HH
                     np.float32) * 0.5
    for i in range(H2):
        for j in range(W2):
            q = i * W2 + j
            src = [(2 * i) * W + (2 * j),
                   (2 * i + 1) * W + (2 * j),
                   (2 * i) * W + (2 * j + 1),
                   (2 * i + 1) * W + (2 * j + 1)]
            for s in range(4):
                for k in range(4):
                    D[s, q, src[k]] += signs[s, k]
    return jnp.asarray(D)


def _iwt_matrices(H, W):
    """U[s] of shape (4*H*W, H*W): y_flat = sum_s U[s] @ band_s_flat."""
    Wo = 2 * W
    U = np.zeros((4, 4 * H * W, H * W), np.float32)
    coeff = {(0, 0): (1, -1, -1, 1),
             (1, 0): (1, -1, 1, -1),
             (0, 1): (1, 1, -1, -1),
             (1, 1): (1, 1, 1, 1)}
    for i in range(H):
        for j in range(W):
            p = i * W + j
            for (r, c), cs in coeff.items():
                q = (2 * i + r) * Wo + (2 * j + c)
                for s in range(4):
                    U[s, q, p] += 0.5 * cs[s]
    return jnp.asarray(U)


# ---------------------------------------------------------------------------
# In-kernel helpers (flat zero-guarded image buffers in VMEM scratch).
# ---------------------------------------------------------------------------
def _round8(n):
    return ((n + 7) // 8) * 8


def _pad_before(wl):
    return _round8(wl + 1)


def _buf_rows(hl, wl):
    return _pad_before(wl) + hl * wl + _round8(wl + 1)


def _fill_buf(buf_ref, hl, wl, interior):
    """Zero only the head/tail guard rows; one coalesced store of the interior."""
    P = hl * wl
    pad = _pad_before(wl)
    rows, C = buf_ref.shape
    buf_ref[0:pad, :] = jnp.zeros((pad, C), jnp.float32)
    buf_ref[pad + P:rows, :] = jnp.zeros((rows - pad - P, C), jnp.float32)
    buf_ref[pad:pad + P, :] = interior


def _conv3x3_im2col(buf_ref, w_ref, b_ref, hl, wl, relu):
    """3x3 SAME conv over a zero-guarded flattened image: one im2col MXU dot.

    buf_ref : (_buf_rows, Cin) scratch, rows [pad, pad+hl*wl) hold the image.
    w_ref   : (9*Cin, Cout) weights, tap-major (dy, dx, cin) ordering
              (BN scale pre-folded).
    b_ref   : (1, Cout) bias (conv bias * scale + BN shift).
    """
    P = hl * wl
    pad = _pad_before(wl)
    # Column index of each output pixel (wl is a power of two at every level).
    col_idx = lax.broadcasted_iota(jnp.int32, (P, 1), 0) & (wl - 1)
    mask_l = jnp.where(col_idx >= 1, 1.0, 0.0)        # reading col w-1 is valid
    mask_r = jnp.where(col_idx <= wl - 2, 1.0, 0.0)   # reading col w+1 is valid

    taps = []
    for dy in range(3):
        for dx in range(3):
            start = pad + (dy - 1) * wl + (dx - 1)
            t = buf_ref[start:start + P, :]
            if dx == 0:
                t = t * mask_l
            elif dx == 2:
                t = t * mask_r
            taps.append(t)
    col = jnp.concatenate(taps, axis=1)                             # (P, 9*Cin)
    out = jnp.dot(col, w_ref[...], preferred_element_type=jnp.float32)
    out = out + b_ref[...]
    if relu:
        out = jnp.maximum(out, 0.0)
    return out


def _wcnn(a_prev, d_ref, buf_ref, w_ref, b_ref, hl, wl):
    """WCNN: Haar DWT (band matmuls) -> 3x3 conv (im2col) -> fused BN -> ReLU."""
    bands = [jnp.dot(d_ref[s, :, :], a_prev, preferred_element_type=jnp.float32)
             for s in range(4)]                       # LL, HL, LH, HH
    _fill_buf(buf_ref, hl, wl, jnp.concatenate(bands, axis=1))
    return _conv3x3_im2col(buf_ref, w_ref, b_ref, hl, wl, relu=True)


def _iwcnn(pieces, us_ref, buf_ref, w_ref, b_ref, hl, wl):
    """IWCNN: (skip concat) -> conv3x3 -> BN -> ReLU -> inverse Haar (one dot)."""
    interior = pieces[0] if len(pieces) == 1 else jnp.concatenate(pieces, axis=1)
    _fill_buf(buf_ref, hl, wl, interior)
    z = _conv3x3_im2col(buf_ref, w_ref, b_ref, hl, wl, relu=True)   # (P, 4c)
    c = z.shape[-1] // 4
    zcat = jnp.concatenate([z[:, s * c:(s + 1) * c] for s in range(4)], axis=0)
    return jnp.dot(us_ref[...], zcat, preferred_element_type=jnp.float32)


def _tail(z, mf_ref, bf_ref, cin, p0):
    """Folded (level-1 inverse Haar + final 3x3 conv): VPU only, lane-major out.

    z      : (H1*W1, 4*cin) post-ReLU icnn_1 conv output.
    mf_ref : (4*cin*cin, H1*W1, H*W) folded constants.
    Returns the lane-major output (cin, H*W).
    """
    p1 = z.shape[0]
    rows = []
    for co in range(cin):
        acc = jnp.zeros((p1, p0), jnp.float32)
        for s in range(4):
            for ci in range(cin):
                k = s * cin + ci
                acc = acc + z[:, k:k + 1] * mf_ref[k * cin + co, :, :]
        rows.append(jnp.sum(acc, axis=0, keepdims=True) + bf_ref[:, co:co + 1])
    return rows[0] if cin == 1 else jnp.concatenate(rows, axis=0)


def _build_kernel(H, W, in_ch):
    H1, W1 = H // 2, W // 2
    H2, W2 = H1 // 2, W1 // 2
    H3, W3 = H2 // 2, W2 // 2
    P0 = H * W

    def kernel(x_ref, d1, d2, d3, u3s, u2s, mf,
               w1, w2, w3, w4, w5, w6,
               b1, b2, b3, b4, b5, b6, bf,
               o_ref,
               buf1, buf2, buf3, buf4, buf5, buf6):
        a0 = x_ref[0, :, :]                               # (H*W, in_ch)
        x1 = _wcnn(a0, d1, buf1, w1, b1, H1, W1)          # (H1*W1, c1)
        x2 = _wcnn(x1, d2, buf2, w2, b2, H2, W2)          # (H2*W2, c2)
        x3 = _wcnn(x2, d3, buf3, w3, b3, H3, W3)          # (H3*W3, c2)
        y1 = _iwcnn([x3], u3s, buf4, w4, b4, H3, W3)      # (H2*W2, c2)
        y2 = _iwcnn([y1, x2], u2s, buf5, w5, b5, H2, W2)  # (H1*W1, c1)
        # icnn_1: skip concat -> conv/BN/ReLU.  Its inverse Haar and the final
        # 3x3 conv are both linear, so they are folded into the `mf` constants.
        _fill_buf(buf6, H1, W1, jnp.concatenate([y2, x1], axis=1))
        z = _conv3x3_im2col(buf6, w6, b6, H1, W1, relu=True)   # (H1*W1, 4*in_ch)
        out = _tail(z, mf, bf, in_ch, P0)                      # (in_ch, H*W)
        o_ref[...] = out.reshape(o_ref.shape)

    return kernel


# ---------------------------------------------------------------------------
# Parameters (deterministic init, PyTorch-like Conv2d uniform bounds)
# ---------------------------------------------------------------------------
def init_params(key, in_ch=1, channel_1=16, channel_2=32):
    specs = [
        ("cnn_1", 4 * in_ch, channel_1, True),
        ("cnn_2", 4 * channel_1, channel_2, True),
        ("cnn_3", 4 * channel_2, channel_2, True),
        ("icnn_3", channel_2, 4 * channel_2, True),
        ("icnn_2", 2 * channel_2, 4 * channel_1, True),
        ("icnn_1", 2 * channel_1, 4 * in_ch, True),
        ("final", in_ch, in_ch, False),
    ]
    params = {}
    for name, cin, cout, has_bn in specs:
        key, k1, k2, k3, k4 = jax.random.split(key, 5)
        bound = float(1.0 / np.sqrt(cin * 9))
        w = jax.random.uniform(k1, (3, 3, cin, cout), jnp.float32, -bound, bound)
        b = jax.random.uniform(k2, (cout,), jnp.float32, -bound, bound)
        if has_bn:
            gamma = 1.0 + 0.1 * jax.random.normal(k3, (cout,), jnp.float32)
            beta = 0.1 * jax.random.normal(k4, (cout,), jnp.float32)
        else:
            gamma, beta = None, None
        params[name] = dict(w=w, b=b, gamma=gamma, beta=beta)
    return params


def _effective_wb(p):
    """Fold eval-mode BatchNorm (mean=0, var=1) scale into W; return (W_eff, b_eff)."""
    w, b = p["w"], p["b"]
    if p["gamma"] is not None:
        scale = p["gamma"] / jnp.sqrt(1.0 + _BN_EPS)
        w = w * scale
        b = b * scale + p["beta"]
    return w.astype(jnp.float32), b.reshape(1, -1).astype(jnp.float32)


# ---------------------------------------------------------------------------
# Fused MW_Unet forward (one pallas_call)
# ---------------------------------------------------------------------------
def mw_unet_forward(params, x_nchw):
    N, Cin, H, W = x_nchw.shape
    H1, W1 = H // 2, W // 2
    H2, W2 = H1 // 2, W1 // 2
    H3, W3 = H2 // 2, W2 // 2
    assert H % 8 == 0 and W % 8 == 0, "need three DWT levels"
    for wl in (W, W1, W2, W3):
        assert wl & (wl - 1) == 0, "width must be a power of two at every level"

    x_flat = jnp.transpose(x_nchw, (0, 2, 3, 1)).reshape(N, H * W, Cin)
    x_flat = x_flat.astype(jnp.float32)

    # Constant spatial operators (dense is fine at 16x16).
    D1, D2, D3 = _dwt_matrices(H, W), _dwt_matrices(H1, W1), _dwt_matrices(H2, W2)
    U3, U2, U1 = _iwt_matrices(H3, W3), _iwt_matrices(H2, W2), _iwt_matrices(H1, W1)
    U3s = jnp.concatenate([U3[s] for s in range(4)], axis=1)   # (H2*W2, 4*H3*W3)
    U2s = jnp.concatenate([U2[s] for s in range(4)], axis=1)   # (H1*W1, 4*H2*W2)

    # Effective (eval-mode-BN-folded) conv weights, reshaped for im2col.
    names = ("cnn_1", "cnn_2", "cnn_3", "icnn_3", "icnn_2", "icnn_1")
    ws, bs = [], []
    for name in names:
        w_eff, b_eff = _effective_wb(params[name])
        cin_l, cout_l = int(w_eff.shape[2]), int(w_eff.shape[3])
        ws.append(w_eff.reshape(9 * cin_l, cout_l))
        bs.append(b_eff)
    wf, bf = _effective_wb(params["final"])     # (3,3,Cin,Cin), (1,Cin)

    # Fold (level-1 inverse Haar) followed by (final 3x3 conv) into constants
    # Mfold[(s*Cin+ci)*Cin+co] of shape (H1*W1, H*W):
    #   out[:, co].T = bf[co] + sum_{s,ci} z[:, s*Cin+ci].T @ Mfold[...]
    P1, P0 = H1 * W1, H * W
    mfold = []
    for s in range(4):
        cols_img = U1[s].T.reshape(P1, H, W, 1)   # each U1 column as an image
        for ci in range(Cin):
            for co in range(Cin):
                m = lax.conv_general_dilated(
                    cols_img, wf[:, :, ci:ci + 1, co:co + 1],
                    window_strides=(1, 1), padding="SAME",
                    dimension_numbers=("NHWC", "HWIO", "NHWC"),
                    precision=lax.Precision.HIGHEST,
                    preferred_element_type=jnp.float32)
                mfold.append(m.reshape(P1, P0))
    Mfold = jnp.stack(mfold, axis=0)              # (4*Cin*Cin, H1*W1, H*W)

    # One zero-guarded flat scratch buffer per conv layer.
    res = [(H1, W1), (H2, W2), (H3, W3), (H3, W3), (H2, W2), (H1, W1)]
    scratch_shapes = [
        pltpu.VMEM((_buf_rows(hl, wl), int(wm.shape[0]) // 9), jnp.float32)
        for (hl, wl), wm in zip(res, ws)
    ]

    consts = [D1, D2, D3, U3s, U2s, Mfold] + ws + bs + [bf]
    in_specs = [pl.BlockSpec((1, H * W, Cin), lambda n: (n, 0, 0))]
    for a in consts:
        in_specs.append(pl.BlockSpec(a.shape, lambda n, _nd=a.ndim: (0,) * _nd))

    out_flat = pl.pallas_call(
        _build_kernel(H, W, Cin),
        out_shape=jax.ShapeDtypeStruct((N, Cin, H * W), jnp.float32),
        grid=(N,),
        in_specs=in_specs,
        out_specs=pl.BlockSpec((1, Cin, H * W), lambda n: (n, 0, 0)),
        scratch_shapes=scratch_shapes,
        compiler_params=pltpu.CompilerParams(dimension_semantics=("parallel",)),
    )(x_flat, *consts)

    return out_flat.reshape(N, Cin, H, W)


# ---------------------------------------------------------------------------
# Pure-JAX reference (lax.conv + slicing DWT/IWT) for the correctness check
# ---------------------------------------------------------------------------
def _dwt_ref(x):  # (N,H,W,C) -> (N,H/2,W/2,4C), channels [LL,HL,LH,HH]
    x01 = x[:, 0::2, :, :] / 2.0
    x02 = x[:, 1::2, :, :] / 2.0
    x1 = x01[:, :, 0::2, :]
    x2 = x02[:, :, 0::2, :]
    x3 = x01[:, :, 1::2, :]
    x4 = x02[:, :, 1::2, :]
    ll = x1 + x2 + x3 + x4
    hl = -x1 - x2 + x3 + x4
    lh = -x1 + x2 - x3 + x4
    hh = x1 - x2 - x3 + x4
    return jnp.concatenate([ll, hl, lh, hh], axis=-1)


def _iwt_ref(x):  # (N,H,W,4C) -> (N,2H,2W,C)
    N, H, W, C4 = x.shape
    C = C4 // 4
    x1 = x[..., 0:C] / 2.0
    x2 = x[..., C:2 * C] / 2.0
    x3 = x[..., 2 * C:3 * C] / 2.0
    x4 = x[..., 3 * C:4 * C] / 2.0
    h = jnp.zeros((N, 2 * H, 2 * W, C), x.dtype)
    h = h.at[:, 0::2, 0::2, :].set(x1 - x2 - x3 + x4)
    h = h.at[:, 1::2, 0::2, :].set(x1 - x2 + x3 - x4)
    h = h.at[:, 0::2, 1::2, :].set(x1 + x2 - x3 - x4)
    h = h.at[:, 1::2, 1::2, :].set(x1 + x2 + x3 + x4)
    return h


def _conv_ref(x, w, b, relu):
    out = lax.conv_general_dilated(
        x, w, window_strides=(1, 1), padding="SAME",
        dimension_numbers=("NHWC", "HWIO", "NHWC"),
        precision=lax.Precision.HIGHEST,
        preferred_element_type=jnp.float32) + b.reshape(1, 1, 1, -1)
    return jnp.maximum(out, 0.0) if relu else out


def mw_unet_reference(params, x_nchw):
    x = jnp.transpose(x_nchw, (0, 2, 3, 1)).astype(jnp.float32)

    def cbr(name, h, relu=True):
        w, b = _effective_wb(params[name])
        return _conv_ref(h, w, b, relu)

    x1 = cbr("cnn_1", _dwt_ref(x))
    x2 = cbr("cnn_2", _dwt_ref(x1))
    x3 = cbr("cnn_3", _dwt_ref(x2))
    y1 = _iwt_ref(cbr("icnn_3", x3))
    y2 = _iwt_ref(cbr("icnn_2", jnp.concatenate([y1, x2], axis=-1)))
    y3 = _iwt_ref(cbr("icnn_1", jnp.concatenate([y2, x1], axis=-1)))
    out = cbr("final", y3, relu=False)
    return jnp.transpose(out, (0, 3, 1, 2))


if __name__ == "__main__":
    key = jax.random.PRNGKey(0)
    k_param, k_x = jax.random.split(key)

    in_ch, channel_1, channel_2 = 1, 16, 32     # module defaults
    N, H, W = 2, 16, 16                         # H, W divisible by 8 (3 DWT levels)

    params = init_params(k_param, in_ch=in_ch, channel_1=channel_1,
                         channel_2=channel_2)
    x = jax.random.normal(k_x, (N, in_ch, H, W), jnp.float32)

    out = jax.block_until_ready(jax.jit(mw_unet_forward)(params, x))
    ref = jax.block_until_ready(mw_unet_reference(params, x))

    assert out.shape == (N, in_ch, H, W), out.shape
    err = float(jnp.max(jnp.abs(out - ref)))
    assert err < 2e-4, err
    print("KERNEL_OK")
</pallas_src>

<mosaic_0001>
module attributes {stable_mosaic.version = 11 : i64} {
  func.func @kernel(%arg0: i32, %arg1: memref<1x256x1xf32, #tpu.memory_space<vmem>>, %arg2: memref<4x64x256xf32, #tpu.memory_space<vmem>>, %arg3: memref<4x16x64xf32, #tpu.memory_space<vmem>>, %arg4: memref<4x4x16xf32, #tpu.memory_space<vmem>>, %arg5: memref<16x16xf32, #tpu.memory_space<vmem>>, %arg6: memref<64x64xf32, #tpu.memory_space<vmem>>, %arg7: memref<4x64x256xf32, #tpu.memory_space<vmem>>, %arg8: memref<36x16xf32, #tpu.memory_space<vmem>>, %arg9: memref<576x32xf32, #tpu.memory_space<vmem>>, %arg10: memref<1152x32xf32, #tpu.memory_space<vmem>>, %arg11: memref<288x128xf32, #tpu.memory_space<vmem>>, %arg12: memref<576x64xf32, #tpu.memory_space<vmem>>, %arg13: memref<288x4xf32, #tpu.memory_space<vmem>>, %arg14: memref<1x16xf32, #tpu.memory_space<vmem>>, %arg15: memref<1x32xf32, #tpu.memory_space<vmem>>, %arg16: memref<1x32xf32, #tpu.memory_space<vmem>>, %arg17: memref<1x128xf32, #tpu.memory_space<vmem>>, %arg18: memref<1x64xf32, #tpu.memory_space<vmem>>, %arg19: memref<1x4xf32, #tpu.memory_space<vmem>>, %arg20: memref<1x1xf32, #tpu.memory_space<vmem>>, %arg21: memref<1x1x256xf32, #tpu.memory_space<vmem>>, %arg22: memref<96x4xf32, #tpu.memory_space<vmem>>, %arg23: memref<32x64xf32, #tpu.memory_space<vmem>>, %arg24: memref<20x128xf32, #tpu.memory_space<vmem>>, %arg25: memref<20x32xf32, #tpu.memory_space<vmem>>, %arg26: memref<32x64xf32, #tpu.memory_space<vmem>>, %arg27: memref<96x32xf32, #tpu.memory_space<vmem>>) attributes {dimension_semantics = [#tpu.dimension_semantics<parallel>], iteration_bounds = array<i64: 2>, scalar_prefetch = 0 : i64, scratch_operands = 6 : i64, tpu.core_type = #tpu.core_type<tc>, window_params = [{transform_indices = @transform_0, window_bounds = array<i64: 1, 256, 1>}, {pipeline_mode = #tpu.pipeline_mode<synchronous>, transform_indices = @transform_1, window_bounds = array<i64: 4, 64, 256>}, {pipeline_mode = #tpu.pipeline_mode<synchronous>, transform_indices = @transform_2, window_bounds = array<i64: 4, 16, 64>}, {pipeline_mode = #tpu.pipeline_mode<synchronous>, transform_indices = @transform_3, window_bounds = array<i64: 4, 4, 16>}, {pipeline_mode = #tpu.pipeline_mode<synchronous>, transform_indices = @transform_4, window_bounds = array<i64: 16, 16>}, {pipeline_mode = #tpu.pipeline_mode<synchronous>, transform_indices = @transform_5, window_bounds = array<i64: 64, 64>}, {pipeline_mode = #tpu.pipeline_mode<synchronous>, transform_indices = @transform_6, window_bounds = array<i64: 4, 64, 256>}, {pipeline_mode = #tpu.pipeline_mode<synchronous>, transform_indices = @transform_7, window_bounds = array<i64: 36, 16>}, {pipeline_mode = #tpu.pipeline_mode<synchronous>, transform_indices = @transform_8, window_bounds = array<i64: 576, 32>}, {pipeline_mode = #tpu.pipeline_mode<synchronous>, transform_indices = @transform_9, window_bounds = array<i64: 1152, 32>}, {pipeline_mode = #tpu.pipeline_mode<synchronous>, transform_indices = @transform_10, window_bounds = array<i64: 288, 128>}, {pipeline_mode = #tpu.pipeline_mode<synchronous>, transform_indices = @transform_11, window_bounds = array<i64: 576, 64>}, {pipeline_mode = #tpu.pipeline_mode<synchronous>, transform_indices = @transform_12, window_bounds = array<i64: 288, 4>}, {pipeline_mode = #tpu.pipeline_mode<synchronous>, transform_indices = @transform_13, window_bounds = array<i64: 1, 16>}, {pipeline_mode = #tpu.pipeline_mode<synchronous>, transform_indices = @transform_14, window_bounds = array<i64: 1, 32>}, {pipeline_mode = #tpu.pipeline_mode<synchronous>, transform_indices = @transform_15, window_bounds = array<i64: 1, 32>}, {pipeline_mode = #tpu.pipeline_mode<synchronous>, transform_indices = @transform_16, window_bounds = array<i64: 1, 128>}, {pipeline_mode = #tpu.pipeline_mode<synchronous>, transform_indices = @transform_17, window_bounds = array<i64: 1, 64>}, {pipeline_mode = #tpu.pipeline_mode<synchronous>, transform_indices = @transform_18, window_bounds = array<i64: 1, 4>}, {pipeline_mode = #tpu.pipeline_mode<synchronous>, transform_indices = @transform_19, window_bounds = array<i64: 1, 1>}, {transform_indices = @transform_20, window_bounds = array<i64: 1, 1, 256>}]} {
    %c0 = arith.constant 0 : index
    %c0_0 = arith.constant 0 : index
    %c0_1 = arith.constant 0 : index
    %0 = vector.load %arg1[%c0, %c0_0, %c0_1] : memref<1x256x1xf32, #tpu.memory_space<vmem>>, vector<1x256x1xf32>
    %1 = vector.shape_cast %0 : vector<1x256x1xf32> to vector<256x1xf32>
    %c0_2 = arith.constant 0 : index
    %c0_3 = arith.constant 0 : index
    %c0_4 = arith.constant 0 : index
    %2 = vector.load %arg2[%c0_2, %c0_3, %c0_4] : memref<4x64x256xf32, #tpu.memory_space<vmem>>, vector<1x64x256xf32>
    %3 = vector.shape_cast %2 : vector<1x64x256xf32> to vector<64x256xf32>
    %cst = arith.constant dense<0.000000e+00> : vector<64x1xf32>
    %4 = tpu.matmul %3, %1, %cst {dimension_numbers = #tpu.dot_dimension_numbers<[1], [0], [0], [1], [0, 0, 1, 1], [], []>} : vector<64x256xf32>, vector<256x1xf32>, vector<64x1xf32> -> vector<64x1xf32>
    %c1 = arith.constant 1 : index
    %c0_5 = arith.constant 0 : index
    %c0_6 = arith.constant 0 : index
    %5 = vector.load %arg2[%c1, %c0_5, %c0_6] : memref<4x64x256xf32, #tpu.memory_space<vmem>>, vector<1x64x256xf32>
    %6 = vector.shape_cast %5 : vector<1x64x256xf32> to vector<64x256xf32>
    %cst_7 = arith.constant dense<0.000000e+00> : vector<64x1xf32>
    %7 = tpu.matmul %6, %1, %cst_7 {dimension_numbers = #tpu.dot_dimension_numbers<[1], [0], [0], [1], [0, 0, 1, 1], [], []>} : vector<64x256xf32>, vector<256x1xf32>, vector<64x1xf32> -> vector<64x1xf32>
    %c2 = arith.constant 2 : index
    %c0_8 = arith.constant 0 : index
    %c0_9 = arith.constant 0 : index
    %8 = vector.load %arg2[%c2, %c0_8, %c0_9] : memref<4x64x256xf32, #tpu.memory_space<vmem>>, vector<1x64x256xf32>
    %9 = vector.shape_cast %8 : vector<1x64x256xf32> to vector<64x256xf32>
    %cst_10 = arith.constant dense<0.000000e+00> : vector<64x1xf32>
    %10 = tpu.matmul %9, %1, %cst_10 {dimension_numbers = #tpu.dot_dimension_numbers<[1], [0], [0], [1], [0, 0, 1, 1], [], []>} : vector<64x256xf32>, vector<256x1xf32>, vector<64x1xf32> -> vector<64x1xf32>
    %c3 = arith.constant 3 : index
    %c0_11 = arith.constant 0 : index
    %c0_12 = arith.constant 0 : index
    %11 = vector.load %arg2[%c3, %c0_11, %c0_12] : memref<4x64x256xf32, #tpu.memory_space<vmem>>, vector<1x64x256xf32>
    %12 = vector.shape_cast %11 : vector<1x64x256xf32> to vector<64x256xf32>
    %cst_13 = arith.constant dense<0.000000e+00> : vector<64x1xf32>
    %13 = tpu.matmul %12, %1, %cst_13 {dimension_numbers = #tpu.dot_dimension_numbers<[1], [0], [0], [1], [0, 0, 1, 1], [], []>} : vector<64x256xf32>, vector<256x1xf32>, vector<64x1xf32> -> vector<64x1xf32>
    %14 = tpu.concatenate %4, %7, %10, %13 in 1 : vector<64x1xf32>, vector<64x1xf32>, vector<64x1xf32>, vector<64x1xf32> -> vector<64x4xf32>
    %cst_14 = arith.constant 0.000000e+00 : f32
    %15 = vector.broadcast %cst_14 : f32 to vector<16x4xf32>
    %c0_15 = arith.constant 0 : index
    %c0_16 = arith.constant 0 : index
    %16 = vector.load %arg22[%c0_15, %c0_16] : memref<96x4xf32, #tpu.memory_space<vmem>>, vector<16x4xf32>
    tpu.vector_store %arg22[%c0_15, %c0_16], %15 {strides = array<i32>} : memref<96x4xf32, #tpu.memory_space<vmem>>, vector<16x4xf32>,
    %cst_17 = arith.constant 0.000000e+00 : f32
    %17 = vector.broadcast %cst_17 : f32 to vector<16x4xf32>
    %c80 = arith.constant 80 : index
    %c0_18 = arith.constant 0 : index
    %18 = vector.load %arg22[%c80, %c0_18] : memref<96x4xf32, #tpu.memory_space<vmem>>, vector<16x4xf32>
    tpu.vector_store %arg22[%c80, %c0_18], %17 {strides = array<i32>} : memref<96x4xf32, #tpu.memory_space<vmem>>, vector<16x4xf32>,
    %c16 = arith.constant 16 : index
    %c0_19 = arith.constant 0 : index
    %19 = vector.load %arg22[%c16, %c0_19] : memref<96x4xf32, #tpu.memory_space<vmem>>, vector<64x4xf32>
    tpu.vector_store %arg22[%c16, %c0_19], %14 {strides = array<i32>} : memref<96x4xf32, #tpu.memory_space<vmem>>, vector<64x4xf32>,
    %20 = tpu.iota {dimensions = array<i32: 0>} : vector<64x1xi32>
    %c7_i32 = arith.constant 7 : i32
    %21 = vector.broadcast %c7_i32 : i32 to vector<64x1xi32>
    %22 = arith.andi %20, %21 : vector<64x1xi32>
    %c1_i32 = arith.constant 1 : i32
    %23 = vector.broadcast %c1_i32 : i32 to vector<64x1xi32>
    %24 = arith.cmpi sge, %22, %23 : vector<64x1xi32>
    %cst_20 = arith.constant 1.000000e+00 : f32
    %cst_21 = arith.constant 0.000000e+00 : f32
    %25 = vector.broadcast %cst_20 : f32 to vector<64x1xf32>
    %26 = vector.broadcast %cst_21 : f32 to vector<64x1xf32>
    %27 = arith.select %24, %25, %26 : vector<64x1xi1>, vector<64x1xf32>
    %c6_i32 = arith.constant 6 : i32
    %28 = vector.broadcast %c6_i32 : i32 to vector<64x1xi32>
    %29 = arith.cmpi sle, %22, %28 : vector<64x1xi32>
    %cst_22 = arith.constant 1.000000e+00 : f32
    %cst_23 = arith.constant 0.000000e+00 : f32
    %30 = vector.broadcast %cst_22 : f32 to vector<64x1xf32>
    %31 = vector.broadcast %cst_23 : f32 to vector<64x1xf32>
    %32 = arith.select %29, %30, %31 : vector<64x1xi1>, vector<64x1xf32>
    %c7 = arith.constant 7 : index
    %c0_24 = arith.constant 0 : index
    %33 = vector.load %arg22[%c7, %c0_24] : memref<96x4xf32, #tpu.memory_space<vmem>>, vector<64x4xf32>
    %34 = vector.broadcast %27 : vector<64x1xf32> to vector<64x4xf32>
    %35 = arith.mulf %33, %34 : vector<64x4xf32>
    %c8 = arith.constant 8 : index
    %c0_25 = arith.constant 0 : index
    %36 = vector.load %arg22[%c8, %c0_25] : memref<96x4xf32, #tpu.memory_space<vmem>>, vector<64x4xf32>
    %c9 = arith.constant 9 : index
    %c0_26 = arith.constant 0 : index
    %37 = vector.load %arg22[%c9, %c0_26] : memref<96x4xf32, #tpu.memory_space<vmem>>, vector<64x4xf32>
    %38 = vector.broadcast %32 : vector<64x1xf32> to vector<64x4xf32>
    %39 = arith.mulf %37, %38 : vector<64x4xf32>
    %c15 = arith.constant 15 : index
    %c0_27 = arith.constant 0 : index
    %40 = vector.load %arg22[%c15, %c0_27] : memref<96x4xf32, #tpu.memory_space<vmem>>, vector<64x4xf32>
    %41 = vector.broadcast %27 : vector<64x1xf32> to vector<64x4xf32>
    %42 = arith.mulf %40, %41 : vector<64x4xf32>
    %c16_28 = arith.constant 16 : index
    %c0_29 = arith.constant 0 : index
    %43 = vector.load %arg22[%c16_28, %c0_29] : memref<96x4xf32, #tpu.memory_space<vmem>>, vector<64x4xf32>
    %c17 = arith.constant 17 : index
    %c0_30 = arith.constant 0 : index
    %44 = vector.load %arg22[%c17, %c0_30] : memref<96x4xf32, #tpu.memory_space<vmem>>, vector<64x4xf32>
    %45 = vector.broadcast %32 : vector<64x1xf32> to vector<64x4xf32>
    %46 = arith.mulf %44, %45 : vector<64x4xf32>
    %c23 = arith.constant 23 : index
    %c0_31 = arith.constant 0 : index
    %47 = vector.load %arg22[%c23, %c0_31] : memref<96x4xf32, #tpu.memory_space<vmem>>, vector<64x4xf32>
    %48 = vector.broadcast %27 : vector<64x1xf32> to vector<64x4xf32>
    %49 = arith.mulf %47, %48 : vector<64x4xf32>
    %c24 = arith.constant 24 : index
    %c0_32 = arith.constant 0 : index
    %50 = vector.load %arg22[%c24, %c0_32] : memref<96x4xf32, #tpu.memory_space<vmem>>, vector<64x4xf32>
    %c25 = arith.constant 25 : index
    %c0_33 = arith.constant 0 : index
    %51 = vector.load %arg22[%c25, %c0_33] : memref<96x4xf32, #tpu.memory_space<vmem>>, vector<64x4xf32>
    %52 = vector.broadcast %32 : vector<64x1xf32> to vector<64x4xf32>
    %53 = arith.mulf %51, %52 : vector<64x4xf32>
    %54 = tpu.concatenate %35, %36, %39, %42, %43, %46, %49, %50, %53 in 1 : vector<64x4xf32>, vector<64x4xf32>, vector<64x4xf32>, vector<64x4xf32>, vector<64x4xf32>, vector<64x4xf32>, vector<64x4xf32>, vector<64x4xf32>, vector<64x4xf32> -> vector<64x36xf32>
    %c0_34 = arith.constant 0 : index
    %c0_35 = arith.constant 0 : index
    %55 = vector.load %arg8[%c0_34, %c0_35] : memref<36x16xf32, #tpu.memory_space<vmem>>, vector<36x16xf32>
    %cst_36 = arith.constant dense<0.000000e+00> : vector<64x16xf32>
    %56 = tpu.matmul %54, %55, %cst_36 {dimension_numbers = #tpu.dot_dimension_numbers<[1], [0], [0], [1], [0, 0, 1, 1], [], []>} : vector<64x36xf32>, vector<36x16xf32>, vector<64x16xf32> -> vector<64x16xf32>
    %c0_37 = arith.constant 0 : index
    %c0_38 = arith.constant 0 : index
    %57 = vector.load %arg14[%c0_37, %c0_38] : memref<1x16xf32, #tpu.memory_space<vmem>>, vector<1x16xf32>
    %58 = vector.broadcast %57 : vector<1x16xf32> to vector<64x16xf32>
    %59 = arith.addf %56, %58 : vector<64x16xf32>
    %cst_39 = arith.constant 0.000000e+00 : f32
    %60 = vector.broadcast %cst_39 : f32 to vector<64x16xf32>
    %61 = arith.maximumf %59, %60 : vector<64x16xf32>
    %c0_40 = arith.constant 0 : index
    %c0_41 = arith.constant 0 : index
    %c0_42 = arith.constant 0 : index
    %62 = vector.load %arg3[%c0_40, %c0_41, %c0_42] : memref<4x16x64xf32, #tpu.memory_space<vmem>>, vector<1x16x64xf32>
    %63 = vector.shape_cast %62 : vector<1x16x64xf32> to vector<16x64xf32>
    %cst_43 = arith.constant dense<0.000000e+00> : vector<16x16xf32>
    %64 = tpu.matmul %63, %61, %cst_43 {dimension_numbers = #tpu.dot_dimension_numbers<[1], [0], [0], [1], [0, 0, 1, 1], [], []>} : vector<16x64xf32>, vector<64x16xf32>, vector<16x16xf32> -> vector<16x16xf32>
    %c1_44 = arith.constant 1 : index
    %c0_45 = arith.constant 0 : index
    %c0_46 = arith.constant 0 : index
    %65 = vector.load %arg3[%c1_44, %c0_45, %c0_46] : memref<4x16x64xf32, #tpu.memory_space<vmem>>, vector<1x16x64xf32>
    %66 = vector.shape_cast %65 : vector<1x16x64xf32> to vector<16x64xf32>
    %cst_47 = arith.constant dense<0.000000e+00> : vector<16x16xf32>
    %67 = tpu.matmul %66, %61, %cst_47 {dimension_numbers = #tpu.dot_dimension_numbers<[1], [0], [0], [1], [0, 0, 1, 1], [], []>} : vector<16x64xf32>, vector<64x16xf32>, vector<16x16xf32> -> vector<16x16xf32>
    %c2_48 = arith.constant 2 : index
    %c0_49 = arith.constant 0 : index
    %c0_50 = arith.constant 0 : index
    %68 = vector.load %arg3[%c2_48, %c0_49, %c0_50] : memref<4x16x64xf32, #tpu.memory_space<vmem>>, vector<1x16x64xf32>
    %69 = vector.shape_cast %68 : vector<1x16x64xf32> to vector<16x64xf32>
    %cst_51 = arith.constant dense<0.000000e+00> : vector<16x16xf32>
    %70 = tpu.matmul %69, %61, %cst_51 {dimension_numbers = #tpu.dot_dimension_numbers<[1], [0], [0], [1], [0, 0, 1, 1], [], []>} : vector<16x64xf32>, vector<64x16xf32>, vector<16x16xf32> -> vector<16x16xf32>
    %c3_52 = arith.constant 3 : index
    %c0_53 = arith.constant 0 : index
    %c0_54 = arith.constant 0 : index
    %71 = vector.load %arg3[%c3_52, %c0_53, %c0_54] : memref<4x16x64xf32, #tpu.memory_space<vmem>>, vector<1x16x64xf32>
    %72 = vector.shape_cast %71 : vector<1x16x64xf32> to vector<16x64xf32>
    %cst_55 = arith.constant dense<0.000000e+00> : vector<16x16xf32>
    %73 = tpu.matmul %72, %61, %cst_55 {dimension_numbers = #tpu.dot_dimension_numbers<[1], [0], [0], [1], [0, 0, 1, 1], [], []>} : vector<16x64xf32>, vector<64x16xf32>, vector<16x16xf32> -> vector<16x16xf32>
    %74 = tpu.concatenate %64, %67, %70, %73 in 1 : vector<16x16xf32>, vector<16x16xf32>, vector<16x16xf32>, vector<16x16xf32> -> vector<16x64xf32>
    %cst_56 = arith.constant 0.000000e+00 : f32
    %75 = vector.broadcast %cst_56 : f32 to vector<8x64xf32>
    %c0_57 = arith.constant 0 : index
    %c0_58 = arith.constant 0 : index
    %76 = vector.load %arg23[%c0_57, %c0_58] : memref<32x64xf32, #tpu.memory_space<vmem>>, vector<8x64xf32>
    tpu.vector_store %arg23[%c0_57, %c0_58], %75 {strides = array<i32>} : memref<32x64xf32, #tpu.memory_space<vmem>>, vector<8x64xf32>,
    %cst_59 = arith.constant 0.000000e+00 : f32
    %77 = vector.broadcast %cst_59 : f32 to vector<8x64xf32>
    %c24_60 = arith.constant 24 : index
    %c0_61 = arith.constant 0 : index
    %78 = vector.load %arg23[%c24_60, %c0_61] : memref<32x64xf32, #tpu.memory_space<vmem>>, vector<8x64xf32>
    tpu.vector_store %arg23[%c24_60, %c0_61], %77 {strides = array<i32>} : memref<32x64xf32, #tpu.memory_space<vmem>>, vector<8x64xf32>,
    %c8_62 = arith.constant 8 : index
    %c0_63 = arith.constant 0 : index
    %79 = vector.load %arg23[%c8_62, %c0_63] : memref<32x64xf32, #tpu.memory_space<vmem>>, vector<16x64xf32>
    tpu.vector_store %arg23[%c8_62, %c0_63], %74 {strides = array<i32>} : memref<32x64xf32, #tpu.memory_space<vmem>>, vector<16x64xf32>,
    %80 = tpu.iota {dimensions = array<i32: 0>} : vector<16x1xi32>
    %c3_i32 = arith.constant 3 : i32
    %81 = vector.broadcast %c3_i32 : i32 to vector<16x1xi32>
    %82 = arith.andi %80, %81 : vector<16x1xi32>
    %c1_i32_64 = arith.constant 1 : i32
    %83 = vector.broadcast %c1_i32_64 : i32 to vector<16x1xi32>
    %84 = arith.cmpi sge, %82, %83 : vector<16x1xi32>
    %cst_65 = arith.constant 1.000000e+00 : f32
    %cst_66 = arith.constant 0.000000e+00 : f32
    %85 = vector.broadcast %cst_65 : f32 to vector<16x1xf32>
    %86 = vector.broadcast %cst_66 : f32 to vector<16x1xf32>
    %87 = arith.select %84, %85, %86 : vector<16x1xi1>, vector<16x1xf32>
    %c2_i32 = arith.constant 2 : i32
    %88 = vector.broadcast %c2_i32 : i32 to vector<16x1xi32>
    %89 = arith.cmpi sle, %82, %88 : vector<16x1xi32>
    %cst_67 = arith.constant 1.000000e+00 : f32
    %cst_68 = arith.constant 0.000000e+00 : f32
    %90 = vector.broadcast %cst_67 : f32 to vector<16x1xf32>
    %91 = vector.broadcast %cst_68 : f32 to vector<16x1xf32>
    %92 = arith.select %89, %90, %91 : vector<16x1xi1>, vector<16x1xf32>
    %c3_69 = arith.constant 3 : index
    %c0_70 = arith.constant 0 : index
    %93 = vector.load %arg23[%c3_69, %c0_70] : memref<32x64xf32, #tpu.memory_space<vmem>>, vector<16x64xf32>
    %94 = vector.broadcast %87 : vector<16x1xf32> to vector<16x64xf32>
    %95 = arith.mulf %93, %94 : vector<16x64xf32>
    %c4 = arith.constant 4 : index
    %c0_71 = arith.constant 0 : index
    %96 = vector.load %arg23[%c4, %c0_71] : memref<32x64xf32, #tpu.memory_space<vmem>>, vector<16x64xf32>
    %c5 = arith.constant 5 : index
    %c0_72 = arith.constant 0 : index
    %97 = vector.load %arg23[%c5, %c0_72] : memref<32x64xf32, #tpu.memory_space<vmem>>, vector<16x64xf32>
    %98 = vector.broadcast %92 : vector<16x1xf32> to vector<16x64xf32>
    %99 = arith.mulf %97, %98 : vector<16x64xf32>
    %c7_73 = arith.constant 7 : index
    %c0_74 = arith.constant 0 : index
    %100 = vector.load %arg23[%c7_73, %c0_74] : memref<32x64xf32, #tpu.memory_space<vmem>>, vector<16x64xf32>
    %101 = vector.broadcast %87 : vector<16x1xf32> to vector<16x64xf32>
    %102 = arith.mulf %100, %101 : vector<16x64xf32>
    %c8_75 = arith.constant 8 : index
    %c0_76 = arith.constant 0 : index
    %103 = vector.load %arg23[%c8_75, %c0_76] : memref<32x64xf32, #tpu.memory_space<vmem>>, vector<16x64xf32>
    %c9_77 = arith.constant 9 : index
    %c0_78 = arith.constant 0 : index
    %104 = vector.load %arg23[%c9_77, %c0_78] : memref<32x64xf32, #tpu.memory_space<vmem>>, vector<16x64xf32>
    %105 = vector.broadcast %92 : vector<16x1xf32> to vector<16x64xf32>
    %106 = arith.mulf %104, %105 : vector<16x64xf32>
    %c11 = arith.constant 11 : index
    %c0_79 = arith.constant 0 : index
    %107 = vector.load %arg23[%c11, %c0_79] : memref<32x64xf32, #tpu.memory_space<vmem>>, vector<16x64xf32>
    %108 = vector.broadcast %87 : vector<16x1xf32> to vector<16x64xf32>
    %109 = arith.mulf %107, %108 : vector<16x64xf32>
    %c12 = arith.constant 12 : index
    %c0_80 = arith.constant 0 : index
    %110 = vector.load %arg23[%c12, %c0_80] : memref<32x64xf32, #tpu.memory_space<vmem>>, vector<16x64xf32>
    %c13 = arith.constant 13 : index
    %c0_81 = arith.constant 0 : index
    %111 = vector.load %arg23[%c13, %c0_81] : memref<32x64xf32, #tpu.memory_space<vmem>>, vector<16x64xf32>
    %112 = vector.broadcast %92 : vector<16x1xf32> to vector<16x64xf32>
    %113 = arith.mulf %111, %112 : vector<16x64xf32>
    %114 = tpu.concatenate %95, %96, %99, %102, %103, %106, %109, %110, %113 in 1 : vector<16x64xf32>, vector<16x64xf32>, vector<16x64xf32>, vector<16x64xf32>, vector<16x64xf32>, vector<16x64xf32>, vector<16x64xf32>, vector<16x64xf32>, vector<16x64xf32> -> vector<16x576xf32>
    %c0_82 = arith.constant 0 : index
    %c0_83 = arith.constant 0 : index
    %115 = vector.load %arg9[%c0_82, %c0_83] : memref<576x32xf32, #tpu.memory_space<vmem>>, vector<576x32xf32>
    %cst_84 = arith.constant dense<0.000000e+00> : vector<16x32xf32>
    %116 = tpu.matmul %114, %115, %cst_84 {dimension_numbers = #tpu.dot_dimension_numbers<[1], [0], [0], [1], [0, 0, 1, 1], [], []>} : vector<16x576xf32>, vector<576x32xf32>, vector<16x32xf32> -> vector<16x32xf32>
    %c0_85 = arith.constant 0 : index
    %c0_86 = arith.constant 0 : index
    %117 = vector.load %arg15[%c0_85, %c0_86] : memref<1x32xf32, #tpu.memory_space<vmem>>, vector<1x32xf32>
    %118 = vector.broadcast %117 : vector<1x32xf32> to vector<16x32xf32>
    %119 = arith.addf %116, %118 : vector<16x32xf32>
    %cst_87 = arith.constant 0.000000e+00 : f32
    %120 = vector.broadcast %cst_87 : f32 to vector<16x32xf32>
    %121 = arith.maximumf %119, %120 : vector<16x32xf32>
    %c0_88 = arith.constant 0 : index
    %c0_89 = arith.constant 0 : index
    %c0_90 = arith.constant 0 : index
    %122 = vector.load %arg4[%c0_88, %c0_89, %c0_90] : memref<4x4x16xf32, #tpu.memory_space<vmem>>, vector<1x4x16xf32>
    %123 = vector.shape_cast %122 : vector<1x4x16xf32> to vector<4x16xf32>
    %cst_91 = arith.constant dense<0.000000e+00> : vector<4x32xf32>
    %124 = tpu.matmul %123, %121, %cst_91 {dimension_numbers = #tpu.dot_dimension_numbers<[1], [0], [0], [1], [0, 0, 1, 1], [], []>} : vector<4x16xf32>, vector<16x32xf32>, vector<4x32xf32> -> vector<4x32xf32>
    %c1_92 = arith.constant 1 : index
    %c0_93 = arith.constant 0 : index
    %c0_94 = arith.constant 0 : index
    %125 = vector.load %arg4[%c1_92, %c0_93, %c0_94] : memref<4x4x16xf32, #tpu.memory_space<vmem>>, vector<1x4x16xf32>
    %126 = vector.shape_cast %125 : vector<1x4x16xf32> to vector<4x16xf32>
    %cst_95 = arith.constant dense<0.000000e+00> : vector<4x32xf32>
    %127 = tpu.matmul %126, %121, %cst_95 {dimension_numbers = #tpu.dot_dimension_numbers<[1], [0], [0], [1], [0, 0, 1, 1], [], []>} : vector<4x16xf32>, vector<16x32xf32>, vector<4x32xf32> -> vector<4x32xf32>
    %c2_96 = arith.constant 2 : index
    %c0_97 = arith.constant 0 : index
    %c0_98 = arith.constant 0 : index
    %128 = vector.load %arg4[%c2_96, %c0_97, %c0_98] : memref<4x4x16xf32, #tpu.memory_space<vmem>>, vector<1x4x16xf32>
    %129 = vector.shape_cast %128 : vector<1x4x16xf32> to vector<4x16xf32>
    %cst_99 = arith.constant dense<0.000000e+00> : vector<4x32xf32>
    %130 = tpu.matmul %129, %121, %cst_99 {dimension_numbers = #tpu.dot_dimension_numbers<[1], [0], [0], [1], [0, 0, 1, 1], [], []>} : vector<4x16xf32>, vector<16x32xf32>, vector<4x32xf32> -> vector<4x32xf32>
    %c3_100 = arith.constant 3 : index
    %c0_101 = arith.constant 0 : index
    %c0_102 = arith.constant 0 : index
    %131 = vector.load %arg4[%c3_100, %c0_101, %c0_102] : memref<4x4x16xf32, #tpu.memory_space<vmem>>, vector<1x4x16xf32>
    %132 = vector.shape_cast %131 : vector<1x4x16xf32> to vector<4x16xf32>
    %cst_103 = arith.constant dense<0.000000e+00> : vector<4x32xf32>
    %133 = tpu.matmul %132, %121, %cst_103 {dimension_numbers = #tpu.dot_dimension_numbers<[1], [0], [0], [1], [0, 0, 1, 1], [], []>} : vector<4x16xf32>, vector<16x32xf32>, vector<4x32xf32> -> vector<4x32xf32>
    %134 = tpu.concatenate %124, %127, %130, %133 in 1 : vector<4x32xf32>, vector<4x32xf32>, vector<4x32xf32>, vector<4x32xf32> -> vector<4x128xf32>
    %cst_104 = arith.constant 0.000000e+00 : f32
    %135 = vector.broadcast %cst_104 : f32 to vector<8x128xf32>
    %c0_105 = arith.constant 0 : index
    %c0_106 = arith.constant 0 : index
    %136 = vector.load %arg24[%c0_105, %c0_106] : memref<20x128xf32, #tpu.memory_space<vmem>>, vector<8x128xf32>
    tpu.vector_store %arg24[%c0_105, %c0_106], %135 {strides = array<i32>} : memref<20x128xf32, #tpu.memory_space<vmem>>, vector<8x128xf32>,
    %cst_107 = arith.constant 0.000000e+00 : f32
    %137 = vector.broadcast %cst_107 : f32 to vector<8x128xf32>
    %c12_108 = arith.constant 12 : index
    %c0_109 = arith.constant 0 : index
    %138 = vector.load %arg24[%c12_108, %c0_109] : memref<20x128xf32, #tpu.memory_space<vmem>>, vector<8x128xf32>
    tpu.vector_store %arg24[%c12_108, %c0_109], %137 {strides = array<i32>} : memref<20x128xf32, #tpu.memory_space<vmem>>, vector<8x128xf32>,
    %c8_110 = arith.constant 8 : index
    %c0_111 = arith.constant 0 : index
    %139 = vector.load %arg24[%c8_110, %c0_111] : memref<20x128xf32, #tpu.memory_space<vmem>>, vector<4x128xf32>
    tpu.vector_store %arg24[%c8_110, %c0_111], %134 {strides = array<i32>} : memref<20x128xf32, #tpu.memory_space<vmem>>, vector<4x128xf32>,
    %140 = tpu.iota {dimensions = array<i32: 0>} : vector<4x1xi32>
    %c1_i32_112 = arith.constant 1 : i32
    %141 = vector.broadcast %c1_i32_112 : i32 to vector<4x1xi32>
    %142 = arith.andi %140, %141 : vector<4x1xi32>
    %c1_i32_113 = arith.constant 1 : i32
    %143 = vector.broadcast %c1_i32_113 : i32 to vector<4x1xi32>
    %144 = arith.cmpi sge, %142, %143 : vector<4x1xi32>
    %cst_114 = arith.constant 1.000000e+00 : f32
    %cst_115 = arith.constant 0.000000e+00 : f32
    %145 = vector.broadcast %cst_114 : f32 to vector<4x1xf32>
    %146 = vector.broadcast %cst_115 : f32 to vector<4x1xf32>
    %147 = arith.select %144, %145, %146 : vector<4x1xi1>, vector<4x1xf32>
    %c0_i32 = arith.constant 0 : i32
    %148 = vector.broadcast %c0_i32 : i32 to vector<4x1xi32>
    %149 = arith.cmpi sle, %142, %148 : vector<4x1xi32>
    %cst_116 = arith.constant 1.000000e+00 : f32
    %cst_117 = arith.constant 0.000000e+00 : f32
    %150 = vector.broadcast %cst_116 : f32 to vector<4x1xf32>
    %151 = vector.broadcast %cst_117 : f32 to vector<4x1xf32>
    %152 = arith.select %149, %150, %151 : vector<4x1xi1>, vector<4x1xf32>
    %c5_118 = arith.constant 5 : index
    %c0_119 = arith.constant 0 : index
    %153 = vector.load %arg24[%c5_118, %c0_119] : memref<20x128xf32, #tpu.memory_space<vmem>>, vector<4x128xf32>
    %154 = vector.broadcast %147 : vector<4x1xf32> to vector<4x128xf32>
    %155 = arith.mulf %153, %154 : vector<4x128xf32>
    %c6 = arith.constant 6 : index
    %c0_120 = arith.constant 0 : index
    %156 = vector.load %arg24[%c6, %c0_120] : memref<20x128xf32, #tpu.memory_space<vmem>>, vector<4x128xf32>
    %c7_121 = arith.constant 7 : index
    %c0_122 = arith.constant 0 : index
    %157 = vector.load %arg24[%c7_121, %c0_122] : memref<20x128xf32, #tpu.memory_space<vmem>>, vector<4x128xf32>
    %158 = vector.broadcast %152 : vector<4x1xf32> to vector<4x128xf32>
    %159 = arith.mulf %157, %158 : vector<4x128xf32>
    %c7_123 = arith.constant 7 : index
    %c0_124 = arith.constant 0 : index
    %160 = vector.load %arg24[%c7_123, %c0_124] : memref<20x128xf32, #tpu.memory_space<vmem>>, vector<4x128xf32>
    %161 = vector.broadcast %147 : vector<4x1xf32> to vector<4x128xf32>
    %162 = arith.mulf %160, %161 : vector<4x128xf32>
    %c8_125 = arith.constant 8 : index
    %c0_126 = arith.constant 0 : index
    %163 = vector.load %arg24[%c8_125, %c0_126] : memref<20x128xf32, #tpu.memory_space<vmem>>, vector<4x128xf32>
    %c9_127 = arith.constant 9 : index
    %c0_128 = arith.constant 0 : index
    %164 = vector.load %arg24[%c9_127, %c0_128] : memref<20x128xf32, #tpu.memory_space<vmem>>, vector<4x128xf32>
    %165 = vector.broadcast %152 : vector<4x1xf32> to vector<4x128xf32>
    %166 = arith.mulf %164, %165 : vector<4x128xf32>
    %c9_129 = arith.constant 9 : index
    %c0_130 = arith.constant 0 : index
    %167 = vector.load %arg24[%c9_129, %c0_130] : memref<20x128xf32, #tpu.memory_space<vmem>>, vector<4x128xf32>
    %168 = vector.broadcast %147 : vector<4x1xf32> to vector<4x128xf32>
    %169 = arith.mulf %167, %168 : vector<4x128xf32>
    %c10 = arith.constant 10 : index
    %c0_131 = arith.constant 0 : index
    %170 = vector.load %arg24[%c10, %c0_131] : memref<20x128xf32, #tpu.memory_space<vmem>>, vector<4x128xf32>
    %c11_132 = arith.constant 11 : index
    %c0_133 = arith.constant 0 : index
    %171 = vector.load %arg24[%c11_132, %c0_133] : memref<20x128xf32, #tpu.memory_space<vmem>>, vector<4x128xf32>
    %172 = vector.broadcast %152 : vector<4x1xf32> to vector<4x128xf32>
    %173 = arith.mulf %171, %172 : vector<4x128xf32>
    %174 = tpu.concatenate %155, %156, %159, %162, %163, %166, %169, %170, %173 in 1 : vector<4x128xf32>, vector<4x128xf32>, vector<4x128xf32>, vector<4x128xf32>, vector<4x128xf32>, vector<4x128xf32>, vector<4x128xf32>, vector<4x128xf32>, vector<4x128xf32> -> vector<4x1152xf32>
    %c0_134 = arith.constant 0 : index
    %c0_135 = arith.constant 0 : index
    %175 = vector.load %arg10[%c0_134, %c0_135] : memref<1152x32xf32, #tpu.memory_space<vmem>>, vector<1152x32xf32>
    %cst_136 = arith.constant dense<0.000000e+00> : vector<4x32xf32>
    %176 = tpu.matmul %174, %175, %cst_136 {dimension_numbers = #tpu.dot_dimension_numbers<[1], [0], [0], [1], [0, 0, 1, 1], [], []>} : vector<4x1152xf32>, vector<1152x32xf32>, vector<4x32xf32> -> vector<4x32xf32>
    %c0_137 = arith.constant 0 : index
    %c0_138 = arith.constant 0 : index
    %177 = vector.load %arg16[%c0_137, %c0_138] : memref<1x32xf32, #tpu.memory_space<vmem>>, vector<1x32xf32>
    %178 = vector.broadcast %177 : vector<1x32xf32> to vector<4x32xf32>
    %179 = arith.addf %176, %178 : vector<4x32xf32>
    %cst_139 = arith.constant 0.000000e+00 : f32
    %180 = vector.broadcast %cst_139 : f32 to vector<4x32xf32>
    %181 = arith.maximumf %179, %180 : vector<4x32xf32>
    %cst_140 = arith.constant 0.000000e+00 : f32
    %182 = vector.broadcast %cst_140 : f32 to vector<8x32xf32>
    %c0_141 = arith.constant 0 : index
    %c0_142 = arith.constant 0 : index
    %183 = vector.load %arg25[%c0_141, %c0_142] : memref<20x32xf32, #tpu.memory_space<vmem>>, vector<8x32xf32>
    tpu.vector_store %arg25[%c0_141, %c0_142], %182 {strides = array<i32>} : memref<20x32xf32, #tpu.memory_space<vmem>>, vector<8x32xf32>,
    %cst_143 = arith.constant 0.000000e+00 : f32
    %184 = vector.broadcast %cst_143 : f32 to vector<8x32xf32>
    %c12_144 = arith.constant 12 : index
    %c0_145 = arith.constant 0 : index
    %185 = vector.load %arg25[%c12_144, %c0_145] : memref<20x32xf32, #tpu.memory_space<vmem>>, vector<8x32xf32>
    tpu.vector_store %arg25[%c12_144, %c0_145], %184 {strides = array<i32>} : memref<20x32xf32, #tpu.memory_space<vmem>>, vector<8x32xf32>,
    %c8_146 = arith.constant 8 : index
    %c0_147 = arith.constant 0 : index
    %186 = vector.load %arg25[%c8_146, %c0_147] : memref<20x32xf32, #tpu.memory_space<vmem>>, vector<4x32xf32>
    tpu.vector_store %arg25[%c8_146, %c0_147], %181 {strides = array<i32>} : memref<20x32xf32, #tpu.memory_space<vmem>>, vector<4x32xf32>,
    %187 = tpu.iota {dimensions = array<i32: 0>} : vector<4x1xi32>
    %c1_i32_148 = arith.constant 1 : i32
    %188 = vector.broadcast %c1_i32_148 : i32 to vector<4x1xi32>
    %189 = arith.andi %187, %188 : vector<4x1xi32>
    %c1_i32_149 = arith.constant 1 : i32
    %190 = vector.broadcast %c1_i32_149 : i32 to vector<4x1xi32>
    %191 = arith.cmpi sge, %189, %190 : vector<4x1xi32>
    %cst_150 = arith.constant 1.000000e+00 : f32
    %cst_151 = arith.constant 0.000000e+00 : f32
    %192 = vector.broadcast %cst_150 : f32 to vector<4x1xf32>
    %193 = vector.broadcast %cst_151 : f32 to vector<4x1xf32>
    %194 = arith.select %191, %192, %193 : vector<4x1xi1>, vector<4x1xf32>
    %c0_i32_152 = arith.constant 0 : i32
    %195 = vector.broadcast %c0_i32_152 : i32 to vector<4x1xi32>
    %196 = arith.cmpi sle, %189, %195 : vector<4x1xi32>
    %cst_153 = arith.constant 1.000000e+00 : f32
    %cst_154 = arith.constant 0.000000e+00 : f32
    %197 = vector.broadcast %cst_153 : f32 to vector<4x1xf32>
    %198 = vector.broadcast %cst_154 : f32 to vector<4x1xf32>
    %199 = arith.select %196, %197, %198 : vector<4x1xi1>, vector<4x1xf32>
    %c5_155 = arith.constant 5 : index
    %c0_156 = arith.constant 0 : index
    %200 = vector.load %arg25[%c5_155, %c0_156] : memref<20x32xf32, #tpu.memory_space<vmem>>, vector<4x32xf32>
    %201 = vector.broadcast %194 : vector<4x1xf32> to vector<4x32xf32>
    %202 = arith.mulf %200, %201 : vector<4x32xf32>
    %c6_157 = arith.constant 6 : index
    %c0_158 = arith.constant 0 : index
    %203 = vector.load %arg25[%c6_157, %c0_158] : memref<20x32xf32, #tpu.memory_space<vmem>>, vector<4x32xf32>
    %c7_159 = arith.constant 7 : index
    %c0_160 = arith.constant 0 : index
    %204 = vector.load %arg25[%c7_159, %c0_160] : memref<20x32xf32, #tpu.memory_space<vmem>>, vector<4x32xf32>
    %205 = vector.broadcast %199 : vector<4x1xf32> to vector<4x32xf32>
    %206 = arith.mulf %204, %205 : vector<4x32xf32>
    %c7_161 = arith.constant 7 : index
    %c0_162 = arith.constant 0 : index
    %207 = vector.load %arg25[%c7_161, %c0_162] : memref<20x32xf32, #tpu.memory_space<vmem>>, vector<4x32xf32>
    %208 = vector.broadcast %194 : vector<4x1xf32> to vector<4x32xf32>
    %209 = arith.mulf %207, %208 : vector<4x32xf32>
    %c8_163 = arith.constant 8 : index
    %c0_164 = arith.constant 0 : index
    %210 = vector.load %arg25[%c8_163, %c0_164] : memref<20x32xf32, #tpu.memory_space<vmem>>, vector<4x32xf32>
    %c9_165 = arith.constant 9 : index
    %c0_166 = arith.constant 0 : index
    %211 = vector.load %arg25[%c9_165, %c0_166] : memref<20x32xf32, #tpu.memory_space<vmem>>, vector<4x32xf32>
    %212 = vector.broadcast %199 : vector<4x1xf32> to vector<4x32xf32>
    %213 = arith.mulf %211, %212 : vector<4x32xf32>
    %c9_167 = arith.constant 9 : index
    %c0_168 = arith.constant 0 : index
    %214 = vector.load %arg25[%c9_167, %c0_168] : memref<20x32xf32, #tpu.memory_space<vmem>>, vector<4x32xf32>
    %215 = vector.broadcast %194 : vector<4x1xf32> to vector<4x32xf32>
    %216 = arith.mulf %214, %215 : vector<4x32xf32>
    %c10_169 = arith.constant 10 : index
    %c0_170 = arith.constant 0 : index
    %217 = vector.load %arg25[%c10_169, %c0_170] : memref<20x32xf32, #tpu.memory_space<vmem>>, vector<4x32xf32>
    %c11_171 = arith.constant 11 : index
    %c0_172 = arith.constant 0 : index
    %218 = vector.load %arg25[%c11_171, %c0_172] : memref<20x32xf32, #tpu.memory_space<vmem>>, vector<4x32xf32>
    %219 = vector.broadcast %199 : vector<4x1xf32> to vector<4x32xf32>
    %220 = arith.mulf %218, %219 : vector<4x32xf32>
    %221 = tpu.concatenate %202, %203, %206, %209, %210, %213, %216, %217, %220 in 1 : vector<4x32xf32>, vector<4x32xf32>, vector<4x32xf32>, vector<4x32xf32>, vector<4x32xf32>, vector<4x32xf32>, vector<4x32xf32>, vector<4x32xf32>, vector<4x32xf32> -> vector<4x288xf32>
    %c0_173 = arith.constant 0 : index
    %c0_174 = arith.constant 0 : index
    %222 = vector.load %arg11[%c0_173, %c0_174] : memref<288x128xf32, #tpu.memory_space<vmem>>, vector<288x128xf32>
    %cst_175 = arith.constant dense<0.000000e+00> : vector<4x128xf32>
    %223 = tpu.matmul %221, %222, %cst_175 {dimension_numbers = #tpu.dot_dimension_numbers<[1], [0], [0], [1], [0, 0, 1, 1], [], []>} : vector<4x288xf32>, vector<288x128xf32>, vector<4x128xf32> -> vector<4x128xf32>
    %c0_176 = arith.constant 0 : index
    %c0_177 = arith.constant 0 : index
    %224 = vector.load %arg17[%c0_176, %c0_177] : memref<1x128xf32, #tpu.memory_space<vmem>>, vector<1x128xf32>
    %225 = vector.broadcast %224 : vector<1x128xf32> to vector<4x128xf32>
    %226 = arith.addf %223, %225 : vector<4x128xf32>
    %cst_178 = arith.constant 0.000000e+00 : f32
    %227 = vector.broadcast %cst_178 : f32 to vector<4x128xf32>
    %228 = arith.maximumf %226, %227 : vector<4x128xf32>
    %229 = vector.extract_strided_slice %228 {offsets = [0, 0], sizes = [4, 32], strides = [1, 1]} : vector<4x128xf32> to vector<4x32xf32>
    %230 = vector.extract_strided_slice %228 {offsets = [0, 32], sizes = [4, 32], strides = [1, 1]} : vector<4x128xf32> to vector<4x32xf32>
    %231 = vector.extract_strided_slice %228 {offsets = [0, 64], sizes = [4, 32], strides = [1, 1]} : vector<4x128xf32> to vector<4x32xf32>
    %232 = vector.extract_strided_slice %228 {offsets = [0, 96], sizes = [4, 32], strides = [1, 1]} : vector<4x128xf32> to vector<4x32xf32>
    %233 = tpu.concatenate %229, %230, %231, %232 in 0 : vector<4x32xf32>, vector<4x32xf32>, vector<4x32xf32>, vector<4x32xf32> -> vector<16x32xf32>
    %c0_179 = arith.constant 0 : index
    %c0_180 = arith.constant 0 : index
    %234 = vector.load %arg5[%c0_179, %c0_180] : memref<16x16xf32, #tpu.memory_space<vmem>>, vector<16x16xf32>
    %cst_181 = arith.constant dense<0.000000e+00> : vector<16x32xf32>
    %235 = tpu.matmul %234, %233, %cst_181 {dimension_numbers = #tpu.dot_dimension_numbers<[1], [0], [0], [1], [0, 0, 1, 1], [], []>} : vector<16x16xf32>, vector<16x32xf32>, vector<16x32xf32> -> vector<16x32xf32>
    %236 = tpu.concatenate %235, %121 in 1 : vector<16x32xf32>, vector<16x32xf32> -> vector<16x64xf32>
    %cst_182 = arith.constant 0.000000e+00 : f32
    %237 = vector.broadcast %cst_182 : f32 to vector<8x64xf32>
    %c0_183 = arith.constant 0 : index
    %c0_184 = arith.constant 0 : index
    %238 = vector.load %arg26[%c0_183, %c0_184] : memref<32x64xf32, #tpu.memory_space<vmem>>, vector<8x64xf32>
    tpu.vector_store %arg26[%c0_183, %c0_184], %237 {strides = array<i32>} : memref<32x64xf32, #tpu.memory_space<vmem>>, vector<8x64xf32>,
    %cst_185 = arith.constant 0.000000e+00 : f32
    %239 = vector.broadcast %cst_185 : f32 to vector<8x64xf32>
    %c24_186 = arith.constant 24 : index
    %c0_187 = arith.constant 0 : index
    %240 = vector.load %arg26[%c24_186, %c0_187] : memref<32x64xf32, #tpu.memory_space<vmem>>, vector<8x64xf32>
    tpu.vector_store %arg26[%c24_186, %c0_187], %239 {strides = array<i32>} : memref<32x64xf32, #tpu.memory_space<vmem>>, vector<8x64xf32>,
    %c8_188 = arith.constant 8 : index
    %c0_189 = arith.constant 0 : index
    %241 = vector.load %arg26[%c8_188, %c0_189] : memref<32x64xf32, #tpu.memory_space<vmem>>, vector<16x64xf32>
    tpu.vector_store %arg26[%c8_188, %c0_189], %236 {strides = array<i32>} : memref<32x64xf32, #tpu.memory_space<vmem>>, vector<16x64xf32>,
    %242 = tpu.iota {dimensions = array<i32: 0>} : vector<16x1xi32>
    %c3_i32_190 = arith.constant 3 : i32
    %243 = vector.broadcast %c3_i32_190 : i32 to vector<16x1xi32>
    %244 = arith.andi %242, %243 : vector<16x1xi32>
    %c1_i32_191 = arith.constant 1 : i32
    %245 = vector.broadcast %c1_i32_191 : i32 to vector<16x1xi32>
    %246 = arith.cmpi sge, %244, %245 : vector<16x1xi32>
    %cst_192 = arith.constant 1.000000e+00 : f32
    %cst_193 = arith.constant 0.000000e+00 : f32
    %247 = vector.broadcast %cst_192 : f32 to vector<16x1xf32>
    %248 = vector.broadcast %cst_193 : f32 to vector<16x1xf32>
    %249 = arith.select %246, %247, %248 : vector<16x1xi1>, vector<16x1xf32>
    %c2_i32_194 = arith.constant 2 : i32
    %250 = vector.broadcast %c2_i32_194 : i32 to vector<16x1xi32>
    %251 = arith.cmpi sle, %244, %250 : vector<16x1xi32>
    %cst_195 = arith.constant 1.000000e+00 : f32
    %cst_196 = arith.constant 0.000000e+00 : f32
    %252 = vector.broadcast %cst_195 : f32 to vector<16x1xf32>
    %253 = vector.broadcast %cst_196 : f32 to vector<16x1xf32>
    %254 = arith.select %251, %252, %253 : vector<16x1xi1>, vector<16x1xf32>
    %c3_197 = arith.constant 3 : index
    %c0_198 = arith.constant 0 : index
    %255 = vector.load %arg26[%c3_197, %c0_198] : memref<32x64xf32, #tpu.memory_space<vmem>>, vector<16x64xf32>
    %256 = vector.broadcast %249 : vector<16x1xf32> to vector<16x64xf32>
    %257 = arith.mulf %255, %256 : vector<16x64xf32>
    %c4_199 = arith.constant 4 : index
    %c0_200 = arith.constant 0 : index
    %258 = vector.load %arg26[%c4_199, %c0_200] : memref<32x64xf32, #tpu.memory_space<vmem>>, vector<16x64xf32>
    %c5_201 = arith.constant 5 : index
    %c0_202 = arith.constant 0 : index
    %259 = vector.load %arg26[%c5_201, %c0_202] : memref<32x64xf32, #tpu.memory_space<vmem>>, vector<16x64xf32>
    %260 = vector.broadcast %254 : vector<16x1xf32> to vector<16x64xf32>
    %261 = arith.mulf %259, %260 : vector<16x64xf32>
    %c7_203 = arith.constant 7 : index
    %c0_204 = arith.constant 0 : index
    %262 = vector.load %arg26[%c7_203, %c0_204] : memref<32x64xf32, #tpu.memory_space<vmem>>, vector<16x64xf32>
    %263 = vector.broadcast %249 : vector<16x1xf32> to vector<16x64xf32>
    %264 = arith.mulf %262, %263 : vector<16x64xf32>
    %c8_205 = arith.constant 8 : index
    %c0_206 = arith.constant 0 : index
    %265 = vector.load %arg26[%c8_205, %c0_206] : memref<32x64xf32, #tpu.memory_space<vmem>>, vector<16x64xf32>
    %c9_207 = arith.constant 9 : index
    %c0_208 = arith.constant 0 : index
    %266 = vector.load %arg26[%c9_207, %c0_208] : memref<32x64xf32, #tpu.memory_space<vmem>>, vector<16x64xf32>
    %267 = vector.broadcast %254 : vector<16x1xf32> to vector<16x64xf32>
    %268 = arith.mulf %266, %267 : vector<16x64xf32>
    %c11_209 = arith.constant 11 : index
    %c0_210 = arith.constant 0 : index
    %269 = vector.load %arg26[%c11_209, %c0_210] : memref<32x64xf32, #tpu.memory_space<vmem>>, vector<16x64xf32>
    %270 = vector.broadcast %249 : vector<16x1xf32> to vector<16x64xf32>
    %271 = arith.mulf %269, %270 : vector<16x64xf32>
    %c12_211 = arith.constant 12 : index
    %c0_212 = arith.constant 0 : index
    %272 = vector.load %arg26[%c12_211, %c0_212] : memref<32x64xf32, #tpu.memory_space<vmem>>, vector<16x64xf32>
    %c13_213 = arith.constant 13 : index
    %c0_214 = arith.constant 0 : index
    %273 = vector.load %arg26[%c13_213, %c0_214] : memref<32x64xf32, #tpu.memory_space<vmem>>, vector<16x64xf32>
    %274 = vector.broadcast %254 : vector<16x1xf32> to vector<16x64xf32>
    %275 = arith.mulf %273, %274 : vector<16x64xf32>
    %276 = tpu.concatenate %257, %258, %261, %264, %265, %268, %271, %272, %275 in 1 : vector<16x64xf32>, vector<16x64xf32>, vector<16x64xf32>, vector<16x64xf32>, vector<16x64xf32>, vector<16x64xf32>, vector<16x64xf32>, vector<16x64xf32>, vector<16x64xf32> -> vector<16x576xf32>
    %c0_215 = arith.constant 0 : index
    %c0_216 = arith.constant 0 : index
    %277 = vector.load %arg12[%c0_215, %c0_216] : memref<576x64xf32, #tpu.memory_space<vmem>>, vector<576x64xf32>
    %cst_217 = arith.constant dense<0.000000e+00> : vector<16x64xf32>
    %278 = tpu.matmul %276, %277, %cst_217 {dimension_numbers = #tpu.dot_dimension_numbers<[1], [0], [0], [1], [0, 0, 1, 1], [], []>} : vector<16x576xf32>, vector<576x64xf32>, vector<16x64xf32> -> vector<16x64xf32>
    %c0_218 = arith.constant 0 : index
    %c0_219 = arith.constant 0 : index
    %279 = vector.load %arg18[%c0_218, %c0_219] : memref<1x64xf32, #tpu.memory_space<vmem>>, vector<1x64xf32>
    %280 = vector.broadcast %279 : vector<1x64xf32> to vector<16x64xf32>
    %281 = arith.addf %278, %280 : vector<16x64xf32>
    %cst_220 = arith.constant 0.000000e+00 : f32
    %282 = vector.broadcast %cst_220 : f32 to vector<16x64xf32>
    %283 = arith.maximumf %281, %282 : vector<16x64xf32>
    %284 = vector.extract_strided_slice %283 {offsets = [0, 0], sizes = [16, 16], strides = [1, 1]} : vector<16x64xf32> to vector<16x16xf32>
    %285 = vector.extract_strided_slice %283 {offsets = [0, 16], sizes = [16, 16], strides = [1, 1]} : vector<16x64xf32> to vector<16x16xf32>
    %286 = vector.extract_strided_slice %283 {offsets = [0, 32], sizes = [16, 16], strides = [1, 1]} : vector<16x64xf32> to vector<16x16xf32>
    %287 = vector.extract_strided_slice %283 {offsets = [0, 48], sizes = [16, 16], strides = [1, 1]} : vector<16x64xf32> to vector<16x16xf32>
    %288 = tpu.concatenate %284, %285, %286, %287 in 0 : vector<16x16xf32>, vector<16x16xf32>, vector<16x16xf32>, vector<16x16xf32> -> vector<64x16xf32>
    %c0_221 = arith.constant 0 : index
    %c0_222 = arith.constant 0 : index
    %289 = vector.load %arg6[%c0_221, %c0_222] : memref<64x64xf32, #tpu.memory_space<vmem>>, vector<64x64xf32>
    %cst_223 = arith.constant dense<0.000000e+00> : vector<64x16xf32>
    %290 = tpu.matmul %289, %288, %cst_223 {dimension_numbers = #tpu.dot_dimension_numbers<[1], [0], [0], [1], [0, 0, 1, 1], [], []>} : vector<64x64xf32>, vector<64x16xf32>, vector<64x16xf32> -> vector<64x16xf32>
    %291 = tpu.concatenate %290, %61 in 1 : vector<64x16xf32>, vector<64x16xf32> -> vector<64x32xf32>
    %cst_224 = arith.constant 0.000000e+00 : f32
    %292 = vector.broadcast %cst_224 : f32 to vector<16x32xf32>
    %c0_225 = arith.constant 0 : index
    %c0_226 = arith.constant 0 : index
    %293 = vector.load %arg27[%c0_225, %c0_226] : memref<96x32xf32, #tpu.memory_space<vmem>>, vector<16x32xf32>
    tpu.vector_store %arg27[%c0_225, %c0_226], %292 {strides = array<i32>} : memref<96x32xf32, #tpu.memory_space<vmem>>, vector<16x32xf32>,
    %cst_227 = arith.constant 0.000000e+00 : f32
    %294 = vector.broadcast %cst_227 : f32 to vector<16x32xf32>
    %c80_228 = arith.constant 80 : index
    %c0_229 = arith.constant 0 : index
    %295 = vector.load %arg27[%c80_228, %c0_229] : memref<96x32xf32, #tpu.memory_space<vmem>>, vector<16x32xf32>
    tpu.vector_store %arg27[%c80_228, %c0_229], %294 {strides = array<i32>} : memref<96x32xf32, #tpu.memory_space<vmem>>, vector<16x32xf32>,
    %c16_230 = arith.constant 16 : index
    %c0_231 = arith.constant 0 : index
    %296 = vector.load %arg27[%c16_230, %c0_231] : memref<96x32xf32, #tpu.memory_space<vmem>>, vector<64x32xf32>
    tpu.vector_store %arg27[%c16_230, %c0_231], %291 {strides = array<i32>} : memref<96x32xf32, #tpu.memory_space<vmem>>, vector<64x32xf32>,
    %297 = tpu.iota {dimensions = array<i32: 0>} : vector<64x1xi32>
    %c7_i32_232 = arith.constant 7 : i32
    %298 = vector.broadcast %c7_i32_232 : i32 to vector<64x1xi32>
    %299 = arith.andi %297, %298 : vector<64x1xi32>
    %c1_i32_233 = arith.constant 1 : i32
    %300 = vector.broadcast %c1_i32_233 : i32 to vector<64x1xi32>
    %301 = arith.cmpi sge, %299, %300 : vector<64x1xi32>
    %cst_234 = arith.constant 1.000000e+00 : f32
    %cst_235 = arith.constant 0.000000e+00 : f32
    %302 = vector.broadcast %cst_234 : f32 to vector<64x1xf32>
    %303 = vector.broadcast %cst_235 : f32 to vector<64x1xf32>
    %304 = arith.select %301, %302, %303 : vector<64x1xi1>, vector<64x1xf32>
    %c6_i32_236 = arith.constant 6 : i32
    %305 = vector.broadcast %c6_i32_236 : i32 to vector<64x1xi32>
    %306 = arith.cmpi sle, %299, %305 : vector<64x1xi32>
    %cst_237 = arith.constant 1.000000e+00 : f32
    %cst_238 = arith.constant 0.000000e+00 : f32
    %307 = vector.broadcast %cst_237 : f32 to vector<64x1xf32>
    %308 = vector.broadcast %cst_238 : f32 to vector<64x1xf32>
    %309 = arith.select %306, %307, %308 : vector<64x1xi1>, vector<64x1xf32>
    %c7_239 = arith.constant 7 : index
    %c0_240 = arith.constant 0 : index
    %310 = vector.load %arg27[%c7_239, %c0_240] : memref<96x32xf32, #tpu.memory_space<vmem>>, vector<64x32xf32>
    %311 = vector.broadcast %304 : vector<64x1xf32> to vector<64x32xf32>
    %312 = arith.mulf %310, %311 : vector<64x32xf32>
    %c8_241 = arith.constant 8 : index
    %c0_242 = arith.constant 0 : index
    %313 = vector.load %arg27[%c8_241, %c0_242] : memref<96x32xf32, #tpu.memory_space<vmem>>, vector<64x32xf32>
    %c9_243 = arith.constant 9 : index
    %c0_244 = arith.constant 0 : index
    %314 = vector.load %arg27[%c9_243, %c0_244] : memref<96x32xf32, #tpu.memory_space<vmem>>, vector<64x32xf32>
    %315 = vector.broadcast %309 : vector<64x1xf32> to vector<64x32xf32>
    %316 = arith.mulf %314, %315 : vector<64x32xf32>
    %c15_245 = arith.constant 15 : index
    %c0_246 = arith.constant 0 : index
    %317 = vector.load %arg27[%c15_245, %c0_246] : memref<96x32xf32, #tpu.memory_space<vmem>>, vector<64x32xf32>
    %318 = vector.broadcast %304 : vector<64x1xf32> to vector<64x32xf32>
    %319 = arith.mulf %317, %318 : vector<64x32xf32>
    %c16_247 = arith.constant 16 : index
    %c0_248 = arith.constant 0 : index
    %320 = vector.load %arg27[%c16_247, %c0_248] : memref<96x32xf32, #tpu.memory_space<vmem>>, vector<64x32xf32>
    %c17_249 = arith.constant 17 : index
    %c0_250 = arith.constant 0 : index
    %321 = vector.load %arg27[%c17_249, %c0_250] : memref<96x32xf32, #tpu.memory_space<vmem>>, vector<64x32xf32>
    %322 = vector.broadcast %309 : vector<64x1xf32> to vector<64x32xf32>
    %323 = arith.mulf %321, %322 : vector<64x32xf32>
    %c23_251 = arith.constant 23 : index
    %c0_252 = arith.constant 0 : index
    %324 = vector.load %arg27[%c23_251, %c0_252] : memref<96x32xf32, #tpu.memory_space<vmem>>, vector<64x32xf32>
    %325 = vector.broadcast %304 : vector<64x1xf32> to vector<64x32xf32>
    %326 = arith.mulf %324, %325 : vector<64x32xf32>
    %c24_253 = arith.constant 24 : index
    %c0_254 = arith.constant 0 : index
    %327 = vector.load %arg27[%c24_253, %c0_254] : memref<96x32xf32, #tpu.memory_space<vmem>>, vector<64x32xf32>
    %c25_255 = arith.constant 25 : index
    %c0_256 = arith.constant 0 : index
    %328 = vector.load %arg27[%c25_255, %c0_256] : memref<96x32xf32, #tpu.memory_space<vmem>>, vector<64x32xf32>
    %329 = vector.broadcast %309 : vector<64x1xf32> to vector<64x32xf32>
    %330 = arith.mulf %328, %329 : vector<64x32xf32>
    %331 = tpu.concatenate %312, %313, %316, %319, %320, %323, %326, %327, %330 in 1 : vector<64x32xf32>, vector<64x32xf32>, vector<64x32xf32>, vector<64x32xf32>, vector<64x32xf32>, vector<64x32xf32>, vector<64x32xf32>, vector<64x32xf32>, vector<64x32xf32> -> vector<64x288xf32>
    %c0_257 = arith.constant 0 : index
    %c0_258 = arith.constant 0 : index
    %332 = vector.load %arg13[%c0_257, %c0_258] : memref<288x4xf32, #tpu.memory_space<vmem>>, vector<288x4xf32>
    %cst_259 = arith.constant dense<0.000000e+00> : vector<64x4xf32>
    %333 = tpu.matmul %331, %332, %cst_259 {dimension_numbers = #tpu.dot_dimension_numbers<[1], [0], [0], [1], [0, 0, 1, 1], [], []>} : vector<64x288xf32>, vector<288x4xf32>, vector<64x4xf32> -> vector<64x4xf32>
    %c0_260 = arith.constant 0 : index
    %c0_261 = arith.constant 0 : index
    %334 = vector.load %arg19[%c0_260, %c0_261] : memref<1x4xf32, #tpu.memory_space<vmem>>, vector<1x4xf32>
    %335 = vector.broadcast %334 : vector<1x4xf32> to vector<64x4xf32>
    %336 = arith.addf %333, %335 : vector<64x4xf32>
    %cst_262 = arith.constant 0.000000e+00 : f32
    %337 = vector.broadcast %cst_262 : f32 to vector<64x4xf32>
    %338 = arith.maximumf %336, %337 : vector<64x4xf32>
    %cst_263 = arith.constant 0.000000e+00 : f32
    %339 = vector.broadcast %cst_263 : f32 to vector<64x256xf32>
    %340 = vector.extract_strided_slice %338 {offsets = [0, 0], sizes = [64, 1], strides = [1, 1]} : vector<64x4xf32> to vector<64x1xf32>
    %c0_264 = arith.constant 0 : index
    %c0_265 = arith.constant 0 : index
    %c0_266 = arith.constant 0 : index
    %341 = vector.load %arg7[%c0_264, %c0_265, %c0_266] : memref<4x64x256xf32, #tpu.memory_space<vmem>>, vector<1x64x256xf32>
    %342 = vector.shape_cast %341 : vector<1x64x256xf32> to vector<64x256xf32>
    %343 = vector.broadcast %340 : vector<64x1xf32> to vector<64x256xf32>
    %344 = arith.mulf %343, %342 : vector<64x256xf32>
    %345 = arith.addf %339, %344 : vector<64x256xf32>
    %346 = vector.extract_strided_slice %338 {offsets = [0, 1], sizes = [64, 1], strides = [1, 1]} : vector<64x4xf32> to vector<64x1xf32>
    %c1_267 = arith.constant 1 : index
    %c0_268 = arith.constant 0 : index
    %c0_269 = arith.constant 0 : index
    %347 = vector.load %arg7[%c1_267, %c0_268, %c0_269] : memref<4x64x256xf32, #tpu.memory_space<vmem>>, vector<1x64x256xf32>
    %348 = vector.shape_cast %347 : vector<1x64x256xf32> to vector<64x256xf32>
    %349 = vector.broadcast %346 : vector<64x1xf32> to vector<64x256xf32>
    %350 = arith.mulf %349, %348 : vector<64x256xf32>
    %351 = arith.addf %345, %350 : vector<64x256xf32>
    %352 = vector.extract_strided_slice %338 {offsets = [0, 2], sizes = [64, 1], strides = [1, 1]} : vector<64x4xf32> to vector<64x1xf32>
    %c2_270 = arith.constant 2 : index
    %c0_271 = arith.constant 0 : index
    %c0_272 = arith.constant 0 : index
    %353 = vector.load %arg7[%c2_270, %c0_271, %c0_272] : memref<4x64x256xf32, #tpu.memory_space<vmem>>, vector<1x64x256xf32>
    %354 = vector.shape_cast %353 : vector<1x64x256xf32> to vector<64x256xf32>
    %355 = vector.broadcast %352 : vector<64x1xf32> to vector<64x256xf32>
    %356 = arith.mulf %355, %354 : vector<64x256xf32>
    %357 = arith.addf %351, %356 : vector<64x256xf32>
    %358 = vector.extract_strided_slice %338 {offsets = [0, 3], sizes = [64, 1], strides = [1, 1]} : vector<64x4xf32> to vector<64x1xf32>
    %c3_273 = arith.constant 3 : index
    %c0_274 = arith.constant 0 : index
    %c0_275 = arith.constant 0 : index
    %359 = vector.load %arg7[%c3_273, %c0_274, %c0_275] : memref<4x64x256xf32, #tpu.memory_space<vmem>>, vector<1x64x256xf32>
    %360 = vector.shape_cast %359 : vector<1x64x256xf32> to vector<64x256xf32>
    %361 = vector.broadcast %358 : vector<64x1xf32> to vector<64x256xf32>
    %362 = arith.mulf %361, %360 : vector<64x256xf32>
    %363 = arith.addf %357, %362 : vector<64x256xf32>
    %cst_276 = arith.constant dense<0.000000e+00> : vector<256xf32>
    %364 = vector.multi_reduction <add>, %363, %cst_276 [0] : vector<64x256xf32> to vector<256xf32>
    %365 = vector.shape_cast %364 : vector<256xf32> to vector<1x256xf32>
    %c0_277 = arith.constant 0 : index
    %c0_278 = arith.constant 0 : index
    %366 = vector.load %arg20[%c0_277, %c0_278] : memref<1x1xf32, #tpu.memory_space<vmem>>, vector<1x1xf32>
    %367 = vector.broadcast %366 : vector<1x1xf32> to vector<1x256xf32>
    %368 = arith.addf %365, %367 : vector<1x256xf32>
    %369 = vector.shape_cast %368 : vector<1x256xf32> to vector<1x1x256xf32>
    %c0_279 = arith.constant 0 : index
    %c0_280 = arith.constant 0 : index
    %c0_281 = arith.constant 0 : index
    %370 = vector.load %arg21[%c0_279, %c0_280, %c0_281] : memref<1x1x256xf32, #tpu.memory_space<vmem>>, vector<1x1x256xf32>
    tpu.vector_store %arg21[%c0_279, %c0_280, %c0_281], %369 {strides = array<i32>} : memref<1x1x256xf32, #tpu.memory_space<vmem>>, vector<1x1x256xf32>,
    return
  }
  func.func @transform_0(%arg0: i32) -> (i32, i32, i32) {
    %c0_i32 = arith.constant 0 : i32
    %c0_i32_0 = arith.constant 0 : i32
    %c0_i32_1 = arith.constant 0 : i32
    return %arg0, %c0_i32, %c0_i32_0 : i32, i32, i32
  }
  func.func @transform_1(%arg0: i32) -> (i32, i32, i32) {
    %c0_i32 = arith.constant 0 : i32
    %c0_i32_0 = arith.constant 0 : i32
    %c0_i32_1 = arith.constant 0 : i32
    %c0_i32_2 = arith.constant 0 : i32
    return %c0_i32, %c0_i32_0, %c0_i32_1 : i32, i32, i32
  }
  func.func @transform_2(%arg0: i32) -> (i32, i32, i32) {
    %c0_i32 = arith.constant 0 : i32
    %c0_i32_0 = arith.constant 0 : i32
    %c0_i32_1 = arith.constant 0 : i32
    %c0_i32_2 = arith.constant 0 : i32
    return %c0_i32, %c0_i32_0, %c0_i32_1 : i32, i32, i32
  }
  func.func @transform_3(%arg0: i32) -> (i32, i32, i32) {
    %c0_i32 = arith.constant 0 : i32
    %c0_i32_0 = arith.constant 0 : i32
    %c0_i32_1 = arith.constant 0 : i32
    %c0_i32_2 = arith.constant 0 : i32
    return %c0_i32, %c0_i32_0, %c0_i32_1 : i32, i32, i32
  }
  func.func @transform_4(%arg0: i32) -> (i32, i32) {
    %c0_i32 = arith.constant 0 : i32
    %c0_i32_0 = arith.constant 0 : i32
    %c0_i32_1 = arith.constant 0 : i32
    return %c0_i32, %c0_i32_0 : i32, i32
  }
  func.func @transform_5(%arg0: i32) -> (i32, i32) {
    %c0_i32 = arith.constant 0 : i32
    %c0_i32_0 = arith.constant 0 : i32
    %c0_i32_1 = arith.constant 0 : i32
    return %c0_i32, %c0_i32_0 : i32, i32
  }
  func.func @transform_6(%arg0: i32) -> (i32, i32, i32) {
    %c0_i32 = arith.constant 0 : i32
    %c0_i32_0 = arith.constant 0 : i32
    %c0_i32_1 = arith.constant 0 : i32
    %c0_i32_2 = arith.constant 0 : i32
    return %c0_i32, %c0_i32_0, %c0_i32_1 : i32, i32, i32
  }
  func.func @transform_7(%arg0: i32) -> (i32, i32) {
    %c0_i32 = arith.constant 0 : i32
    %c0_i32_0 = arith.constant 0 : i32
    %c0_i32_1 = arith.constant 0 : i32
    return %c0_i32, %c0_i32_0 : i32, i32
  }
  func.func @transform_8(%arg0: i32) -> (i32, i32) {
    %c0_i32 = arith.constant 0 : i32
    %c0_i32_0 = arith.constant 0 : i32
    %c0_i32_1 = arith.constant 0 : i32
    return %c0_i32, %c0_i32_0 : i32, i32
  }
  func.func @transform_9(%arg0: i32) -> (i32, i32) {
    %c0_i32 = arith.constant 0 : i32
    %c0_i32_0 = arith.constant 0 : i32
    %c0_i32_1 = arith.constant 0 : i32
    return %c0_i32, %c0_i32_0 : i32, i32
  }
  func.func @transform_10(%arg0: i32) -> (i32, i32) {
    %c0_i32 = arith.constant 0 : i32
    %c0_i32_0 = arith.constant 0 : i32
    %c0_i32_1 = arith.constant 0 : i32
    return %c0_i32, %c0_i32_0 : i32, i32
  }
  func.func @transform_11(%arg0: i32) -> (i32, i32) {
    %c0_i32 = arith.constant 0 : i32
    %c0_i32_0 = arith.constant 0 : i32
    %c0_i32_1 = arith.constant 0 : i32
    return %c0_i32, %c0_i32_0 : i32, i32
  }
  func.func @transform_12(%arg0: i32) -> (i32, i32) {
    %c0_i32 = arith.constant 0 : i32
    %c0_i32_0 = arith.constant 0 : i32
    %c0_i32_1 = arith.constant 0 : i32
    return %c0_i32, %c0_i32_0 : i32, i32
  }
  func.func @transform_13(%arg0: i32) -> (i32, i32) {
    %c0_i32 = arith.constant 0 : i32
    %c0_i32_0 = arith.constant 0 : i32
    %c0_i32_1 = arith.constant 0 : i32
    return %c0_i32, %c0_i32_0 : i32, i32
  }
  func.func @transform_14(%arg0: i32) -> (i32, i32) {
    %c0_i32 = arith.constant 0 : i32
    %c0_i32_0 = arith.constant 0 : i32
    %c0_i32_1 = arith.constant 0 : i32
    return %c0_i32, %c0_i32_0 : i32, i32
  }
  func.func @transform_15(%arg0: i32) -> (i32, i32) {
    %c0_i32 = arith.constant 0 : i32
    %c0_i32_0 = arith.constant 0 : i32
    %c0_i32_1 = arith.constant 0 : i32
    return %c0_i32, %c0_i32_0 : i32, i32
  }
  func.func @transform_16(%arg0: i32) -> (i32, i32) {
    %c0_i32 = arith.constant 0 : i32
    %c0_i32_0 = arith.constant 0 : i32
    %c0_i32_1 = arith.constant 0 : i32
    return %c0_i32, %c0_i32_0 : i32, i32
  }
  func.func @transform_17(%arg0: i32) -> (i32, i32) {
    %c0_i32 = arith.constant 0 : i32
    %c0_i32_0 = arith.constant 0 : i32
    %c0_i32_1 = arith.constant 0 : i32
    return %c0_i32, %c0_i32_0 : i32, i32
  }
  func.func @transform_18(%arg0: i32) -> (i32, i32) {
    %c0_i32 = arith.constant 0 : i32
    %c0_i32_0 = arith.constant 0 : i32
    %c0_i32_1 = arith.constant 0 : i32
    return %c0_i32, %c0_i32_0 : i32, i32
  }
  func.func @transform_19(%arg0: i32) -> (i32, i32) {
    %c0_i32 = arith.constant 0 : i32
    %c0_i32_0 = arith.constant 0 : i32
    %c0_i32_1 = arith.constant 0 : i32
    return %c0_i32, %c0_i32_0 : i32, i32
  }
  func.func @transform_20(%arg0: i32) -> (i32, i32, i32) {
    %c0_i32 = arith.constant 0 : i32
    %c0_i32_0 = arith.constant 0 : i32
    %c0_i32_1 = arith.constant 0 : i32
    return %arg0, %c0_i32, %c0_i32_0 : i32, i32, i32
  }
}

</mosaic_0001>

<bundles_post_ra>
// kernel: mw_unet_forward.1
= control target key start
LH: loop header
LB: loop body
LE: loop exit
PB: predicated region body
PF: predicated region fallthrough
CT: control target
= control target key end

     0   :  { %s6989_s23 = smov 0   ;;  %s9880_s0 = inlined_call_operand.vmem [shape: f32[2,256,1], index: 0, kind: input, shape index: {}]   ;;  %s9881_s1 = inlined_call_operand.vmem [shape: f32[4,64,256], index: 1, kind: input, shape index: {}]   ;;  %s9882_s2 = inlined_call_operand.vmem [shape: f32[4,16,64], index: 2, kind: input, shape index: {}]   ;;  %s9883_s3 = inlined_call_operand.vmem [shape: f32[4,4,16], index: 3, kind: input, shape index: {}]   ;;  %s9884_s4 = inlined_call_operand.vmem [shape: f32[16,16], index: 4, kind: input, shape index: {}]   ;;  %s9885_s5 = inlined_call_operand.vmem [shape: f32[64,64], index: 5, kind: input, shape index: {}]   ;;  %s9886_s6 = inlined_call_operand.vmem [shape: f32[4,64,256], index: 6, kind: input, shape index: {}]   ;;  %s9887_s7 = inlined_call_operand.vmem [shape: f32[36,16], index: 7, kind: input, shape index: {}]   ;;  %s9888_s8 = inlined_call_operand.vmem [shape: f32[576,32], index: 8, kind: input, shape index: {}]   ;;  %s9889_s9 = inlined_call_operand.vmem [shape: f32[1152,32], index: 9, kind: input, shape index: {}]   ;;  %s9890_s10 = inlined_call_operand.vmem [shape: f32[288,128], index: 10, kind: input, shape index: {}]   ;;  %s9891_s11 = inlined_call_operand.vmem [shape: f32[576,64], index: 11, kind: input, shape index: {}]   ;;  %s9892_s12 = inlined_call_operand.vmem [shape: f32[288,4], index: 12, kind: input, shape index: {}]   ;;  %s9893_s13 = inlined_call_operand.vmem [shape: f32[1,16], index: 13, kind: input, shape index: {}]   ;;  %s9894_s14 = inlined_call_operand.vmem [shape: f32[1,32], index: 14, kind: input, shape index: {}]   ;;  %s9895_s15 = inlined_call_operand.vmem [shape: f32[1,32], index: 15, kind: input, shape index: {}]   ;;  %s9896_s16 = inlined_call_operand.vmem [shape: f32[1,128], index: 16, kind: input, shape index: {}]   ;;  %s9897_s17 = inlined_call_operand.vmem [shape: f32[1,64], index: 17, kind: input, shape index: {}]   ;;  %s9898_s18 = inlined_call_operand.vmem [shape: f32[1,4], index: 18, kind: input, shape index: {}]   ;;  %s9899_s19 = inlined_call_operand.<no memory space> [shape: f32[1,1], index: 19, kind: input, shape index: {}]   ;;  %s9900_s20 = inlined_call_operand.vmem [shape: f32[2,1,256], index: 20, kind: output, shape index: {}]  }
   0x1   :  { %9914 = sst [smem:[#allocation9_spill]] %s9880_s0  ;;  %v25_v0 = vstv %s9899_s19 }
   0x2   :  { %9915 = sst [smem:[#allocation10_spill]] %s9881_s1  ;;  %26 = vst [vmem:[#allocation8] sm:$0x1] %v25_v0 }
   0x3   :  { %9916 = sst [smem:[#allocation11_spill]] %s9882_s2 }
   0x4   :  { %9917 = sst [smem:[#allocation12_spill]] %s9883_s3 }
   0x5   :  { %9918 = sst [smem:[#allocation13_spill]] %s9884_s4 }
   0x6   :  { %9919 = sst [smem:[#allocation14_spill]] %s9887_s7 }
   0x7   :  { %9920 = sst [smem:[#allocation15_spill]] %s9888_s8 }
   0x8 LB: > { %s5443_s24 = sadd.s32 4294967295, %s6856_s23   ;;  %p5447_p0 = scmp.ge.s32.totalorder %s6856_s23, 1  ;;  %s6856_s23 = sphi %s6989_s23, %s32_s23  }
   0x9   : > { %p564_p1 = scmp.lt.s32.totalorder %s6856_s23, 3 }
   0xb   : > { %p565_p2 = pnand %p5447_p0, %p564_p1 }
   0xc   : > { %p621_p3 = scmp.lt.s32.totalorder (!%p565_p2), %s5443_s24, 1  ;;  %s9921_s19 = sld [smem:[#allocation10_spill]] (!%p565_p2) }
   0xd   : > { %568 = sbr.rel (%p565_p2) target bundleno = 4058 (0xfda), region = 100  ;;  %s9922_s29 = sld [smem:[#allocation9_spill]] (!%p565_p2) }
   0xe   : > { %s6859_s25 = smov (!%p565_p2), 4   ;;  %s6861_s28 = smov (!%p565_p2), 1  }
   0xf   : > { %s6862_s4 = smov (!%p565_p2), 2   ;;  %s6865_s0 = smov (!%p565_p2), 8  }
  0x10   : > { %s6866_s21 = smov (!%p565_p2), 12   ;;  %s6867_s1 = smov (!%p565_p2), 20  }
  0x11   : > { %s6868_s22 = smov (!%p565_p2), 24   ;;  %s9923_s7 = sld [smem:[#allocation14_spill]] (!%p565_p2) }
  0x12   : > { %v663_v1 = vld [vmem:[%s9921_s19 + $0x8] sm:$0xff]  ;;  %s9933_s24 = smov (!%p621_p3, %s5443_s24), 1  ;;  %v662_v35 = vld [vmem:[%s9921_s19] sm:$0xff]  ;;  %v665_v37 = vld [vmem:[%s9921_s19 + $0x18] sm:$0xff]  ;;  %vm1272_vm0 = vcmask 31744   ;;  %vm1245_vm1 = vcmask 7168  }
  0x13   : > { %v5452_v2 = vld [vmem:[%s9921_s19 + $0x88] sm:$0xff]  ;;  %742 = vmatprep.mubr.f32.mxu0 %v663_v1  ;;  %s5608_s27 = sshll.u32 %s9933_s24, 8  ;;  %v5451_v36 = vld [vmem:[%s9921_s19 + $0x80] sm:$0xff]  ;;  %v5454_v38 = vld [vmem:[%s9921_s19 + $0x98] sm:$0xff]  ;;  %vm1254_vm2 = vcmask 15360   ;;  %vm1263_vm3 = vcmask 23552  }
  0x14   : > { %864 = vmatprep.mubr.f32.mxu1 %v5452_v2  ;;  %s7009_s30 = scalar_lea.vmem %s9922_s29, %s5608_s27  ;;  %v664_v39 = vld [vmem:[%s9921_s19 + $0x10] sm:$0xff]  ;;  %v667_v41 = vld [vmem:[%s9921_s19 + $0x28] sm:$0xff]  ;;  %v666_v43 = vld [vmem:[%s9921_s19 + $0x20] sm:$0xff]  ;;  %s6860_s27 = smov 28   ;;  %vm1716_vm9 = vcmask 261120   ;;  %vm1762_vm12 = vcmask 1043456  }
  0x15   : > { %v7012_v3 = vld [vmem:[%s7009_s30 + $0xf8] sm:$0xff]  ;;  %v7018_v5 = vld [vmem:[%s7009_s30 + $0xf0] sm:$0xff]  ;;  %v7028_v7 = vld [vmem:[%s7009_s30 + $0xe8] sm:$0xff]  ;;  %s6863_s29 = smov 3   ;;  %s6870_s26 = smov 48  }
  0x16   : > { %v7015_v4 = vld [vmem:[%s7009_s30 + $0x78] sm:$0xff]  ;;  %5609 = vmatprep.subr.mxu0 %v7012_v3  ;;  %5665 = vmatprep.subr.mxu1 %v7012_v3  ;;  %v7023_v6 = vld [vmem:[%s7009_s30 + $0x70] sm:$0xff]  ;;  %v7033_v8 = vld [vmem:[%s7009_s30 + $0x68] sm:$0xff]  ;;  %s9925_s8 = sld [smem:[#allocation15_spill]]  ;;  %s9927_s3 = smov 64  }
  0x17   : > { %5610 = vmatpush3.msra.mxu0 %v7015_v4  ;;  %5666 = vmatpush3.msra.mxu1 %v7015_v4  ;;  %v7038_v9 = vld [vmem:[%s7009_s30 + $0xe0] sm:$0xff]  ;;  %v7048_v11 = vld [vmem:[%s7009_s30 + $0xd8] sm:$0xff]  ;;  %v7058_v13 = vld [vmem:[%s7009_s30 + $0xd0] sm:$0xff] }
  0x18   : > { %5611 = vmatprep.subr.mxu0 %v7018_v5  ;;  %5667 = vmatprep.subr.mxu1 %v7018_v5  ;;  %v7043_v10 = vld [vmem:[%s7009_s30 + $0x60] sm:$0xff]  ;;  %v7053_v12 = vld [vmem:[%s7009_s30 + $0x58] sm:$0xff]  ;;  %v7063_v14 = vld [vmem:[%s7009_s30 + $0x50] sm:$0xff] }
  0x19   : > { %5612 = vmatpush3.msra.mxu0 %v7023_v6  ;;  %5668 = vmatpush3.msra.mxu1 %v7023_v6  ;;  %v7068_v15 = vld [vmem:[%s7009_s30 + $0xc8] sm:$0xff]  ;;  %v7078_v17 = vld [vmem:[%s7009_s30 + $0xc0] sm:$0xff]  ;;  %v7088_v19 = vld [vmem:[%s7009_s30 + $0xb8] sm:$0xff] }
  0x1a   : > { %5613 = vmatprep.subr.mxu0 %v7028_v7  ;;  %5669 = vmatprep.subr.mxu1 %v7028_v7  ;;  %v7073_v16 = vld [vmem:[%s7009_s30 + $0x48] sm:$0xff]  ;;  %v7083_v18 = vld [vmem:[%s7009_s30 + $0x40] sm:$0xff]  ;;  %v7093_v20 = vld [vmem:[%s7009_s30 + $0x38] sm:$0xff] }
  0x1b   : > { %5614 = vmatpush3.msra.mxu0 %v7033_v8  ;;  %5670 = vmatpush3.msra.mxu1 %v7033_v8  ;;  %v7098_v21 = vld [vmem:[%s7009_s30 + $0xb0] sm:$0xff]  ;;  %v7108_v23 = vld [vmem:[%s7009_s30 + $0xa8] sm:$0xff]  ;;  %v7118_v25 = vld [vmem:[%s7009_s30 + $0xa0] sm:$0xff] }
  0x1c   : > { %5615 = vmatprep.subr.mxu0 %v7038_v9  ;;  %5671 = vmatprep.subr.mxu1 %v7038_v9  ;;  %v7103_v22 = vld [vmem:[%s7009_s30 + $0x30] sm:$0xff]  ;;  %v7113_v24 = vld [vmem:[%s7009_s30 + $0x28] sm:$0xff]  ;;  %v7123_v26 = vld [vmem:[%s7009_s30 + $0x20] sm:$0xff] }
  0x1d   : > { %5616 = vmatpush3.msra.mxu0 %v7043_v10  ;;  %5672 = vmatpush3.msra.mxu1 %v7043_v10  ;;  %v7128_v27 = vld [vmem:[%s7009_s30 + $0x98] sm:$0xff]  ;;  %v7138_v29 = vld [vmem:[%s7009_s30 + $0x90] sm:$0xff]  ;;  %v7148_v31 = vld [vmem:[%s7009_s30 + $0x88] sm:$0xff] }
  0x1e   : > { %5617 = vmatprep.subr.mxu0 %v7048_v11  ;;  %5673 = vmatprep.subr.mxu1 %v7048_v11  ;;  %v7133_v28 = vld [vmem:[%s7009_s30 + $0x18] sm:$0xff]  ;;  %v7143_v30 = vld [vmem:[%s7009_s30 + $0x10] sm:$0xff]  ;;  %v7153_v32 = vld [vmem:[%s7009_s30 + $0x8] sm:$0xff] }
  0x1f   : > { %5618 = vmatpush3.msra.mxu0 %v7053_v12  ;;  %5674 = vmatpush3.msra.mxu1 %v7053_v12  ;;  %v7158_v33 = vld [vmem:[%s7009_s30 + $0x80] sm:$0xff]  ;;  %v5453_v40 = vld [vmem:[%s9921_s19 + $0x90] sm:$0xff]  ;;  %v5456_v42 = vld [vmem:[%s9921_s19 + $0xa8] sm:$0xff] }
  0x20   : > { %5619 = vmatprep.subr.mxu0 %v7058_v13  ;;  %5675 = vmatprep.subr.mxu1 %v7058_v13  ;;  %v7163_v34 = vld [vmem:[%s7009_s30] sm:$0xff]  ;;  %v669_v45 = vld [vmem:[%s9921_s19 + $0x38] sm:$0xff]  ;;  %v668_v47 = vld [vmem:[%s9921_s19 + $0x30] sm:$0xff]  ;;  %s9905_s30 = smov 16  }
  0x21   : > { %5620 = vmatpush3.msra.mxu0 %v7063_v14  ;;  %5676 = vmatpush3.msra.mxu1 %v7063_v14  ;;  %v5455_v44 = vld [vmem:[%s9921_s19 + $0xa0] sm:$0xff]  ;;  %v5458_v46 = vld [vmem:[%s9921_s19 + $0xb8] sm:$0xff]  ;;  %v5457_v48 = vld [vmem:[%s9921_s19 + $0xb0] sm:$0xff] }
  0x22   : > { %5621 = vmatprep.subr.mxu0 %v7068_v15  ;;  %5677 = vmatprep.subr.mxu1 %v7068_v15  ;;  %v671_v49 = vld [vmem:[%s9921_s19 + $0x48] sm:$0xff]  ;;  %v670_v51 = vld [vmem:[%s9921_s19 + $0x40] sm:$0xff]  ;;  %v673_v53 = vld [vmem:[%s9921_s19 + $0x58] sm:$0xff] }
  0x23   : > { %5622 = vmatpush3.msra.mxu0 %v7073_v16  ;;  %5678 = vmatpush3.msra.mxu1 %v7073_v16  ;;  %v5460_v50 = vld [vmem:[%s9921_s19 + $0xc8] sm:$0xff]  ;;  %v5459_v52 = vld [vmem:[%s9921_s19 + $0xc0] sm:$0xff]  ;;  %v5462_v54 = vld [vmem:[%s9921_s19 + $0xd8] sm:$0xff] }
  0x24   : > { %5623 = vmatprep.subr.mxu0 %v7078_v17  ;;  %5679 = vmatprep.subr.mxu1 %v7078_v17  ;;  %v672_v55 = vld [vmem:[%s9921_s19 + $0x50] sm:$0xff]  ;;  %v675_v57 = vld [vmem:[%s9921_s19 + $0x68] sm:$0xff]  ;;  %v674_v59 = vld [vmem:[%s9921_s19 + $0x60] sm:$0xff] }
  0x25   : > { %5624 = vmatpush3.msra.mxu0 %v7083_v18  ;;  %5680 = vmatpush3.msra.mxu1 %v7083_v18  ;;  %v5461_v56 = vld [vmem:[%s9921_s19 + $0xd0] sm:$0xff]  ;;  %v5464_v58 = vld [vmem:[%s9921_s19 + $0xe8] sm:$0xff]  ;;  %v5463_v60 = vld [vmem:[%s9921_s19 + $0xe0] sm:$0xff] }
  0x26   : > { %5625 = vmatprep.subr.mxu0 %v7088_v19  ;;  %5681 = vmatprep.subr.mxu1 %v7088_v19  ;;  %v677_v61 = vld [vmem:[%s9921_s19 + $0x78] sm:$0xff]  ;;  %v676_v63 = vld [vmem:[%s9921_s19 + $0x70] sm:$0xff]  ;;  %v5468_v1 = vld [vmem:[%s9921_s19 + $0x108] sm:$0xff] }
  0x27   : > { %5626 = vmatpush3.msra.mxu0 %v7093_v20  ;;  %5682 = vmatpush3.msra.mxu1 %v7093_v20  ;;  %v5466_v62 = vld [vmem:[%s9921_s19 + $0xf8] sm:$0xff]  ;;  %v5465_v0 = vld [vmem:[%s9921_s19 + $0xf0] sm:$0xff]  ;;  %v5467_v2 = vld [vmem:[%s9921_s19 + $0x100] sm:$0xff] }
  0x28   : > { %5627 = vmatprep.subr.mxu0 %v7098_v21  ;;  %5683 = vmatprep.subr.mxu1 %v7098_v21 }
  0x29   : > { %5628 = vmatpush3.msra.mxu0 %v7103_v22  ;;  %5684 = vmatpush3.msra.mxu1 %v7103_v22 }
  0x2a   : > { %5629 = vmatprep.subr.mxu0 %v7108_v23  ;;  %5685 = vmatprep.subr.mxu1 %v7108_v23 }
  0x2b   : > { %5630 = vmatpush3.msra.mxu0 %v7113_v24  ;;  %5686 = vmatpush3.msra.mxu1 %v7113_v24 }
  0x2c   : > { %5631 = vmatprep.subr.mxu0 %v7118_v25  ;;  %5687 = vmatprep.subr.mxu1 %v7118_v25 }
  0x2d   : > { %5632 = vmatpush3.msra.mxu0 %v7123_v26  ;;  %5688 = vmatpush3.msra.mxu1 %v7123_v26 }
  0x2e   : > { %5633 = vmatprep.subr.mxu0 %v7128_v27  ;;  %5689 = vmatprep.subr.mxu1 %v7128_v27 }
  0x2f   : > { %5634 = vmatpush3.msra.mxu0 %v7133_v28  ;;  %5690 = vmatpush3.msra.mxu1 %v7133_v28 }
  0x30   : > { %5635 = vmatprep.subr.mxu0 %v7138_v29  ;;  %5691 = vmatprep.subr.mxu1 %v7138_v29 }
  0x31   : > { %5636 = vmatpush3.msra.mxu0 %v7143_v30  ;;  %5692 = vmatpush3.msra.mxu1 %v7143_v30 }
  0x32   : > { %5637 = vmatprep.subr.mxu0 %v7148_v31  ;;  %5693 = vmatprep.subr.mxu1 %v7148_v31 }
  0x33   : > { %5638 = vmatpush3.msra.mxu0 %v7153_v32  ;;  %5694 = vmatpush3.msra.mxu1 %v7153_v32 }
  0x34   : > { %5639 = vmatprep.subr.mxu0 %v7158_v33  ;;  %5695 = vmatprep.subr.mxu1 %v7158_v33 }
  0x35   : > { %5640 = vmatpush3.msra.mxu0 %v7163_v34  ;;  %5696 = vmatpush3.msra.mxu1 %v7163_v34 }
  0x36   : > { %743 = vmatmul.mubr.f32.vlgmr.msra.gmra.mxu0 %v662_v35  ;;  %865 = vmatmul.mubr.f32.vlgmr.msra.gmra.mxu1 %v5451_v36 }
  0x37   : > { %5721 = vmatprep.subr.mxu0 %v7012_v3  ;;  %5777 = vmatprep.subr.mxu1 %v7012_v3  ;;  %v5484_v3 = vld [vmem:[%s9921_s19 + $0x188] sm:$0xff] }
  0x38   : > { %5722 = vmatpush3.msra.mxu0 %v7015_v4  ;;  %5778 = vmatpush3.msra.mxu1 %v7015_v4  ;;  %v5470_v4 = vld [vmem:[%s9921_s19 + $0x118] sm:$0xff] }
  0x39   : > { %5723 = vmatprep.subr.mxu0 %v7018_v5  ;;  %747 = vmatprep.mubr.f32.mxu0 %v665_v37 }
  0x3a   : > { %869 = vmatprep.mubr.f32.mxu1 %v5454_v38  ;;  %5724 = vmatpush3.msra.mxu0 %v7023_v6 }
  0x3b   : > { %5779 = vmatprep.subr.mxu1 %v7018_v5  ;;  %748 = vmatmul.mubr.f32.gmra.mxu0 %v664_v39  ;;  %v5483_v5 = vld [vmem:[%s9921_s19 + $0x180] sm:$0xff] }
  0x3c   : > { %870 = vmatmul.mubr.f32.gmra.mxu1 %v5453_v40  ;;  %5725 = vmatprep.subr.mxu0 %v7028_v7 }
  0x3d   : > { %5780 = vmatpush3.msra.mxu1 %v7023_v6  ;;  %5726 = vmatpush3.msra.mxu0 %v7033_v8  ;;  %v5486_v6 = vld [vmem:[%s9921_s19 + $0x198] sm:$0xff] }
  0x3e   : > { %5781 = vmatprep.subr.mxu1 %v7028_v7  ;;  %5727 = vmatprep.subr.mxu0 %v7038_v9  ;;  %v5469_v7 = vld [vmem:[%s9921_s19 + $0x110] sm:$0xff] }
  0x3f   : > { %5782 = vmatpush3.msra.mxu1 %v7033_v8  ;;  %752 = vmatprep.mubr.f32.mxu0 %v667_v41  ;;  %v5472_v8 = vld [vmem:[%s9921_s19 + $0x128] sm:$0xff] }
  0x40   : > { %874 = vmatprep.mubr.f32.mxu1 %v5456_v42  ;;  %5728 = vmatpush3.msra.mxu0 %v7043_v10 }
  0x41   : > { %5783 = vmatprep.subr.mxu1 %v7038_v9  ;;  %753 = vmatmul.mubr.f32.gmra.mxu0 %v666_v43  ;;  %v5485_v9 = vld [vmem:[%s9921_s19 + $0x190] sm:$0xff] }
  0x42   : > { %875 = vmatmul.mubr.f32.gmra.mxu1 %v5455_v44  ;;  %5729 = vmatprep.subr.mxu0 %v7048_v11 }
  0x43   : > { %5784 = vmatpush3.msra.mxu1 %v7043_v10  ;;  %5730 = vmatpush3.msra.mxu0 %v7053_v12  ;;  %v5488_v10 = vld [vmem:[%s9921_s19 + $0x1a8] sm:$0xff] }
  0x44   : > { %5785 = vmatprep.subr.mxu1 %v7048_v11  ;;  %5731 = vmatprep.subr.mxu0 %v7058_v13  ;;  %v5471_v11 = vld [vmem:[%s9921_s19 + $0x120] sm:$0xff] }
  0x45   : > { %5786 = vmatpush3.msra.mxu1 %v7053_v12  ;;  %757 = vmatprep.mubr.f32.mxu0 %v669_v45  ;;  %v5474_v12 = vld [vmem:[%s9921_s19 + $0x138] sm:$0xff] }
  0x46   : > { %879 = vmatprep.mubr.f32.mxu1 %v5458_v46  ;;  %5732 = vmatpush3.msra.mxu0 %v7063_v14 }
  0x47   : > { %5787 = vmatprep.subr.mxu1 %v7058_v13  ;;  %758 = vmatmul.mubr.f32.gmra.mxu0 %v668_v47  ;;  %v5487_v13 = vld [vmem:[%s9921_s19 + $0x1a0] sm:$0xff] }
  0x48   : > { %880 = vmatmul.mubr.f32.gmra.mxu1 %v5457_v48  ;;  %5733 = vmatprep.subr.mxu0 %v7068_v15 }
  0x49   : > { %5788 = vmatpush3.msra.mxu1 %v7063_v14  ;;  %5734 = vmatpush3.msra.mxu0 %v7073_v16  ;;  %v5490_v14 = vld [vmem:[%s9921_s19 + $0x1b8] sm:$0xff] }
  0x4a   : > { %5789 = vmatprep.subr.mxu1 %v7068_v15  ;;  %5735 = vmatprep.subr.mxu0 %v7078_v17  ;;  %v5473_v15 = vld [vmem:[%s9921_s19 + $0x130] sm:$0xff] }
  0x4b   : > { %5790 = vmatpush3.msra.mxu1 %v7073_v16  ;;  %762 = vmatprep.mubr.f32.mxu0 %v671_v49  ;;  %v5476_v16 = vld [vmem:[%s9921_s19 + $0x148] sm:$0xff] }
  0x4c   : > { %884 = vmatprep.mubr.f32.mxu1 %v5460_v50  ;;  %5736 = vmatpush3.msra.mxu0 %v7083_v18 }
  0x4d   : > { %5791 = vmatprep.subr.mxu1 %v7078_v17  ;;  %763 = vmatmul.mubr.f32.gmra.mxu0 %v670_v51  ;;  %v5489_v17 = vld [vmem:[%s9921_s19 + $0x1b0] sm:$0xff] }
  0x4e   : > { %885 = vmatmul.mubr.f32.gmra.mxu1 %v5459_v52  ;;  %5737 = vmatprep.subr.mxu0 %v7088_v19 }
  0x4f   : > { %5792 = vmatpush3.msra.mxu1 %v7083_v18  ;;  %5738 = vmatpush3.msra.mxu0 %v7093_v20  ;;  %v5492_v18 = vld [vmem:[%s9921_s19 + $0x1c8] sm:$0xff] }
  0x50   : > { %5793 = vmatprep.subr.mxu1 %v7088_v19  ;;  %5739 = vmatprep.subr.mxu0 %v7098_v21  ;;  %v5475_v19 = vld [vmem:[%s9921_s19 + $0x140] sm:$0xff] }
  0x51   : > { %5794 = vmatpush3.msra.mxu1 %v7093_v20  ;;  %767 = vmatprep.mubr.f32.mxu0 %v673_v53  ;;  %v5478_v20 = vld [vmem:[%s9921_s19 + $0x158] sm:$0xff] }
  0x52   : > { %889 = vmatprep.mubr.f32.mxu1 %v5462_v54  ;;  %5740 = vmatpush3.msra.mxu0 %v7103_v22 }
  0x53   : > { %5795 = vmatprep.subr.mxu1 %v7098_v21  ;;  %768 = vmatmul.mubr.f32.gmra.mxu0 %v672_v55  ;;  %v5491_v21 = vld [vmem:[%s9921_s19 + $0x1c0] sm:$0xff] }
  0x54   : > { %890 = vmatmul.mubr.f32.gmra.mxu1 %v5461_v56  ;;  %5741 = vmatprep.subr.mxu0 %v7108_v23 }
  0x55   : > { %5796 = vmatpush3.msra.mxu1 %v7103_v22  ;;  %5742 = vmatpush3.msra.mxu0 %v7113_v24  ;;  %v5494_v22 = vld [vmem:[%s9921_s19 + $0x1d8] sm:$0xff] }
  0x56   : > { %5797 = vmatprep.subr.mxu1 %v7108_v23  ;;  %5743 = vmatprep.subr.mxu0 %v7118_v25  ;;  %v5477_v23 = vld [vmem:[%s9921_s19 + $0x150] sm:$0xff] }
  0x57   : > { %5798 = vmatpush3.msra.mxu1 %v7113_v24  ;;  %772 = vmatprep.mubr.f32.mxu0 %v675_v57  ;;  %v5480_v24 = vld [vmem:[%s9921_s19 + $0x168] sm:$0xff] }
  0x58   : > { %894 = vmatprep.mubr.f32.mxu1 %v5464_v58  ;;  %5744 = vmatpush3.msra.mxu0 %v7123_v26 }
  0x59   : > { %5799 = vmatprep.subr.mxu1 %v7118_v25  ;;  %773 = vmatmul.mubr.f32.gmra.mxu0 %v674_v59  ;;  %v6858_v25 = vmov 0.0  }
  0x5a   : > { %895 = vmatmul.mubr.f32.gmra.mxu1 %v5463_v60  ;;  %5745 = vmatprep.subr.mxu0 %v7128_v27  ;;  %1274 = vst.msk [vmem:[#allocation2 + $0x8] sm:$0xff] %vm1272_vm0, %v6858_v25  ;;  %1273 = vst.msk [vmem:[#allocation2] sm:$0xff] %vm1272_vm0, %v6858_v25 }
  0x5b   : > { %5800 = vmatpush3.msra.mxu1 %v7123_v26  ;;  %5746 = vmatpush3.msra.mxu0 %v7133_v28  ;;  %1275 = vst.msk [vmem:[#allocation2 + $0x50] sm:$0xff] %vm1272_vm0, %v6858_v25  ;;  %1276 = vst.msk [vmem:[#allocation2 + $0x58] sm:$0xff] %vm1272_vm0, %v6858_v25  ;;  %v5493_v26 = vld [vmem:[%s9921_s19 + $0x1d0] sm:$0xff] }
  0x5c   : > { %5801 = vmatprep.subr.mxu1 %v7128_v27  ;;  %5747 = vmatprep.subr.mxu0 %v7138_v29  ;;  %2950 = vst [vmem:[#allocation4] sm:$0xff] %v6858_v25  ;;  %2951 = vst [vmem:[#allocation4 + $0xc] sm:$0xff] %v6858_v25  ;;  %v5496_v27 = vld [vmem:[%s9921_s19 + $0x1e8] sm:$0xff] }
  0x5d   : > { %5802 = vmatpush3.msra.mxu1 %v7133_v28  ;;  %777 = vmatprep.mubr.f32.mxu0 %v677_v61  ;;  %v5479_v28 = vld [vmem:[%s9921_s19 + $0x160] sm:$0xff]  ;;  %3473 = vst.msk [vmem:[#allocation5] sm:$0xff] %vm1716_vm9, %v6858_v25  ;;  %3474 = vst.msk [vmem:[#allocation5 + $0xc] sm:$0xff] %vm1716_vm9, %v6858_v25 }
  0x5e   : > { %899 = vmatprep.mubr.f32.mxu1 %v5466_v62  ;;  %5748 = vmatpush3.msra.mxu0 %v7143_v30  ;;  %4389 = vst.msk [vmem:[#allocation7] sm:$0xff] %vm1716_vm9, %v6858_v25  ;;  %4390 = vst.msk [vmem:[#allocation7 + $0x8] sm:$0xff] %vm1716_vm9, %v6858_v25 }
  0x5f   : > { %5803 = vmatprep.subr.mxu1 %v7138_v29  ;;  %778 = vmatmul.mubr.f32.gmra.mxu0 %v676_v63  ;;  %v5482_v29 = vld [vmem:[%s9921_s19 + $0x178] sm:$0xff]  ;;  %4391 = vst.msk [vmem:[#allocation7 + $0x50] sm:$0xff] %vm1716_vm9, %v6858_v25  ;;  %4392 = vst.msk [vmem:[#allocation7 + $0x58] sm:$0xff] %vm1716_vm9, %v6858_v25 }
  0x60   : > { %900 = vmatmul.mubr.f32.gmra.mxu1 %v5465_v0  ;;  %5749 = vmatprep.subr.mxu0 %v7148_v31 }
  0x61   : > { %5804 = vmatpush3.msra.mxu1 %v7143_v30  ;;  %5750 = vmatpush3.msra.mxu0 %v7153_v32  ;;  %v5495_v30 = vld [vmem:[%s9921_s19 + $0x1e0] sm:$0xff] }
  0x62   : > { %5805 = vmatprep.subr.mxu1 %v7148_v31  ;;  %5751 = vmatprep.subr.mxu0 %v7158_v33  ;;  %v5498_v31 = vld [vmem:[%s9921_s19 + $0x1f8] sm:$0xff]  ;;  %v1402_v35 = vld [vmem:[#allocation2 + $0x50] sm:$0xff] }
  0x63   : > { %5806 = vmatpush3.msra.mxu1 %v7153_v32  ;;  %5752 = vmatpush3.msra.mxu0 %v7163_v34  ;;  %v5481_v32 = vld [vmem:[%s9921_s19 + $0x170] sm:$0xff] }
  0x64   : > { %986 = vmatprep.mubr.f32.mxu0 %v5468_v1  ;;  %5807 = vmatprep.subr.mxu1 %v7158_v33  ;;  %v1350_v33 = vld [vmem:[#allocation2 + $0x8] sm:$0xff] }
  0x65   : > { %987 = vmatmul.mubr.f32.vlgmr.msra.gmra.mxu0 %v5467_v2  ;;  %5808 = vmatpush3.msra.mxu1 %v7163_v34  ;;  %v5497_v34 = vld [vmem:[%s9921_s19 + $0x1f0] sm:$0xff] }
  0x66   : > { %1108 = vmatprep.mubr.f32.mxu1 %v5484_v3  ;;  %991 = vmatprep.mubr.f32.mxu0 %v5470_v4 }
  0x67   : > { %1109 = vmatmul.mubr.f32.vlgmr.msra.gmra.mxu1 %v5483_v5  ;;  %1420 = vrot.lane.b32.xlu0 %v1350_v33, %s6859_s25 }
  0x68   : > { %1113 = vmatprep.mubr.f32.mxu1 %v5486_v6  ;;  %1612 = vrot.lane.b32.xlu1 %v1402_v35, %s6860_s27 }
  0x69   : > { %992 = vmatmul.mubr.f32.gmra.mxu0 %v5469_v7 }
  0x6a   : > { %996 = vmatprep.mubr.f32.mxu0 %v5472_v8 }
  0x6b   : > { %1114 = vmatmul.mubr.f32.gmra.mxu1 %v5485_v9 }
  0x6c   : > { %1118 = vmatprep.mubr.f32.mxu1 %v5488_v10 }
  0x6d   : > { %997 = vmatmul.mubr.f32.gmra.mxu0 %v5471_v11 }
  0x6e   : > { %1001 = vmatprep.mubr.f32.mxu0 %v5474_v12 }
  0x6f   : > { %1119 = vmatmul.mubr.f32.gmra.mxu1 %v5487_v13 }
  0x70   : > { %1123 = vmatprep.mubr.f32.mxu1 %v5490_v14 }
  0x71   : > { %1002 = vmatmul.mubr.f32.gmra.mxu0 %v5473_v15 }
  0x72   : > { %1006 = vmatprep.mubr.f32.mxu0 %v5476_v16 }
  0x73   : > { %1124 = vmatmul.mubr.f32.gmra.mxu1 %v5489_v17 }
  0x74   : > { %1128 = vmatprep.mubr.f32.mxu1 %v5492_v18 }
  0x75   : > { %1007 = vmatmul.mubr.f32.gmra.mxu0 %v5475_v19 }
  0x76   : > { %1011 = vmatprep.mubr.f32.mxu0 %v5478_v20 }
  0x77   : > { %1129 = vmatmul.mubr.f32.gmra.mxu1 %v5491_v21 }
  0x78   : > { %1133 = vmatprep.mubr.f32.mxu1 %v5494_v22 }
  0x79   : > { %1012 = vmatmul.mubr.f32.gmra.mxu0 %v5477_v23 }
  0x7a   : > { %1016 = vmatprep.mubr.f32.mxu0 %v5480_v24 }
  0x7b   : > { %1134 = vmatmul.mubr.f32.gmra.mxu1 %v5493_v26 }
  0x7c   : > { %1138 = vmatprep.mubr.f32.mxu1 %v5496_v27 }
  0x7d   : > { %1017 = vmatmul.mubr.f32.gmra.mxu0 %v5479_v28 }
  0x7e   : > { %1021 = vmatprep.mubr.f32.mxu0 %v5482_v29 }
  0x7f   : > { %1139 = vmatmul.mubr.f32.gmra.mxu1 %v5495_v30 }
  0x80   : > { %1143 = vmatprep.mubr.f32.mxu1 %v5498_v31 }
  0x81   : > { %1022 = vmatmul.mubr.f32.gmra.mxu0 %v5481_v32 }
  0x83   : > { %1144 = vmatmul.mubr.f32.gmra.mxu1 %v5497_v34 }
  0xf6   : > { %v5641_v36 = vpop.f32.mrf.mxu0  ;;  %v5697_v37 = vpop.f32.mrf.mxu1 }
  0xf8   : > { %v5642_v38 = vpop.f32.mrf.mxu0  ;;  %v5698_v39 = vpop.f32.mrf.mxu1 }
  0xf9   : > { %v7433_v40 = vadd.f32 %v5642_v38, %v5641_v36  ;;  %v5699_v41 = vadd.f32 %v5698_v39, %v5697_v37 }
  0xfb   : > { %v5644_v42 = vpop.f32.mrf.mxu0  ;;  %1157 = vrot.lane.b32.xlu0 %v5699_v41, %s6861_s28 }
  0xfc   : > { %v5700_v43 = vpop.f32.mrf.mxu1 }
  0xfd   : > { %v5645_v44 = vpop.f32.mrf.mxu0 }
  0xfe   : > { %v7436_v45 = vadd.f32 %v5645_v44, %v5644_v42  ;;  %v5701_v46 = vpop.f32.mrf.mxu1 }
  0xff   : > { %v5702_v47 = vadd.f32 %v5701_v46, %v5700_v43 }
 0x101   : > { %v5647_v48 = vpop.f32.mrf.mxu0  ;;  %1159 = vrot.lane.b32.xlu0 %v5702_v47, %s6861_s28 }
 0x102   : > { %v5703_v49 = vpop.f32.mrf.mxu1 }
 0x103   : > { %v5648_v50 = vpop.f32.mrf.mxu0 }
 0x104   : > { %v7439_v51 = vadd.f32 %v5648_v50, %v5647_v48  ;;  %v5704_v52 = vpop.f32.mrf.mxu1 }
 0x105   : > { %v5705_v53 = vadd.f32 %v5704_v52, %v5703_v49 }
 0x107   : > { %v5650_v54 = vpop.f32.mrf.mxu0  ;;  %1161 = vrot.lane.b32.xlu0 %v5705_v53, %s6861_s28 }
 0x108   : > { %v5706_v55 = vpop.f32.mrf.mxu1 }
 0x109   : > { %v5651_v56 = vpop.f32.mrf.mxu0 }
 0x10a   : > { %v7442_v57 = vadd.f32 %v5651_v56, %v5650_v54  ;;  %v5707_v58 = vpop.f32.mrf.mxu1 }
 0x10b   : > { %v5708_v59 = vadd.f32 %v5707_v58, %v5706_v55 }
 0x10d   : > { %v5653_v60 = vpop.f32.mrf.mxu0  ;;  %1163 = vrot.lane.b32.xlu1 %v5708_v59, %s6861_s28 }
 0x10e   : > { %v5709_v61 = vpop.f32.mrf.mxu1 }
 0x10f   : > { %v5654_v62 = vpop.f32.mrf.mxu0 }
 0x110   : > { %v7445_v63 = vadd.f32 %v5654_v62, %v5653_v60  ;;  %v5710_v0 = vpop.f32.mrf.mxu1 }
 0x111   : > { %v5711_v1 = vadd.f32 %v5710_v0, %v5709_v61 }
 0x113   : > { %v5656_v2 = vpop.f32.mrf.mxu0  ;;  %1165 = vrot.lane.b32.xlu0 %v5711_v1, %s6861_s28 }
 0x114   : > { %v5712_v3 = vpop.f32.mrf.mxu1 }
 0x115   : > { %v5657_v4 = vpop.f32.mrf.mxu0 }
 0x116   : > { %v7448_v5 = vadd.f32 %v5657_v4, %v5656_v2  ;;  %v5713_v6 = vpop.f32.mrf.mxu1 }
 0x117   : > { %v5714_v7 = vadd.f32 %v5713_v6, %v5712_v3 }
 0x119   : > { %v5659_v8 = vpop.f32.mrf.mxu0  ;;  %1167 = vrot.lane.b32.xlu1 %v5714_v7, %s6861_s28 }
 0x11a   : > { %v5715_v9 = vpop.f32.mrf.mxu1 }
 0x11b   : > { %v5660_v10 = vpop.f32.mrf.mxu0 }
 0x11c   : > { %v7451_v11 = vadd.f32 %v5660_v10, %v5659_v8  ;;  %v5716_v12 = vpop.f32.mrf.mxu1 }
 0x11d   : > { %v5717_v13 = vadd.f32 %v5716_v12, %v5715_v9  ;;  %v7473_v12 = vpop.permute.xlu0 %1420 }
 0x11f   : > { %v5662_v14 = vpop.f32.mrf.mxu0  ;;  %1169 = vrot.lane.b32.xlu0 %v5717_v13, %s6861_s28 }
 0x120   : > { %v5718_v15 = vpop.f32.mrf.mxu1 }
 0x121   : > { %v5663_v16 = vpop.f32.mrf.mxu0 }
 0x122   : > { %v7454_v17 = vadd.f32 %v5663_v16, %v5662_v14  ;;  %v5719_v18 = vpop.f32.mrf.mxu1  ;;  %v7475_v14 = vpop.permute.xlu1 %1612 }
 0x123   : > { %v5720_v19 = vadd.f32 %v5719_v18, %v5718_v15 }
 0x125   : > { %v5753_v20 = vpop.f32.mrf.mxu0  ;;  %1171 = vrot.lane.b32.xlu1 %v5720_v19, %s6861_s28  ;;  %s9907_s28 = smov 64  }
 0x127   : > { %v5809_v21 = vpop.f32.mrf.mxu1  ;;  %v5754_v22 = vpop.f32.mrf.mxu0 }
 0x128   : > { %v5755_v23 = vadd.f32 %v5754_v22, %v5753_v20  ;;  %v1285_v22 = vlaneseq }
 0x129   : > { %v5810_v24 = vpop.f32.mrf.mxu1  ;;  %v5756_v26 = vpop.f32.mrf.mxu0 }
 0x12a   : > { %v5811_v27 = vadd.f32 %v5810_v24, %v5809_v21  ;;  %1189 = vrot.lane.b32.xlu1 %v5755_v23, %s6862_s4 }
 0x12b   : > { %v5812_v28 = vpop.f32.mrf.mxu1  ;;  %v5757_v29 = vpop.f32.mrf.mxu0 }
 0x12c   : > { %1221 = vrot.lane.b32.xlu0 %v5811_v27, %s6863_s29  ;;  %v5758_v30 = vadd.f32 %v5757_v29, %v5756_v26 }
 0x12d   : > { %v5759_v31 = vpop.f32.mrf.mxu0  ;;  %v5813_v32 = vpop.f32.mrf.mxu1 }
 0x12e   : > { %1191 = vrot.lane.b32.xlu1 %v5758_v30, %s6862_s4  ;;  %v5814_v35 = vadd.f32 %v5813_v32, %v5812_v28  ;;  %v7487_v28 = vshrl.u32 %v1285_v22, 7 }
 0x12f   : > { %v5760_v33 = vpop.f32.mrf.mxu0  ;;  %v5815_v34 = vpop.f32.mrf.mxu1 }
 0x130   : > { %v5761_v36 = vadd.f32 %v5760_v33, %v5759_v31  ;;  %v1294_v32 = vand.u32 7, %v7487_v28 }
 0x131   : > { %v5762_v37 = vpop.f32.mrf.mxu0  ;;  %v5816_v38 = vpop.f32.mrf.mxu1 }
 0x132   : > { %1193 = vrot.lane.b32.xlu0 %v5761_v36, %s6862_s4  ;;  %1223 = vrot.lane.b32.xlu1 %v5814_v35, %s6863_s29  ;;  %v5817_v39 = vadd.f32 %v5816_v38, %v5815_v34  ;;  %vm1318_vm4 = vcmp.le.s32.totalorder %v1294_v32, 6  ;;  %vm1302_vm5 = vcmp.ge.s32.totalorder %v1294_v32, 1 }
 0x133   : > { %v5763_v41 = vpop.f32.mrf.mxu0  ;;  %v5818_v42 = vpop.f32.mrf.mxu1 }
 0x134   : > { %v5764_v43 = vadd.f32 %v5763_v41, %v5762_v37 }
 0x135   : > { %v5765_v44 = vpop.f32.mrf.mxu0  ;;  %v5819_v46 = vpop.f32.mrf.mxu1 }
 0x136   : > { %1225 = vrot.lane.b32.xlu0 %v5817_v39, %s6863_s29  ;;  %1195 = vrot.lane.b32.xlu1 %v5764_v43, %s6862_s4  ;;  %v5820_v47 = vadd.f32 %v5819_v46, %v5818_v42  ;;  %v7500_v39 = vsel %vm1318_vm4, 1.0, %v6858_v25 }
 0x137   : > { %v5766_v48 = vpop.f32.mrf.mxu0  ;;  %v5821_v49 = vpop.f32.mrf.mxu1 }
 0x138   : > { %v5767_v50 = vadd.f32 %v5766_v48, %v5765_v44  ;;  %v7506_v44 = vadd.s32 8, %v7487_v28 }
 0x139   : > { %v5768_v52 = vpop.f32.mrf.mxu0  ;;  %v5822_v53 = vpop.f32.mrf.mxu1 }
 0x13a   : > { %1197 = vrot.lane.b32.xlu0 %v5767_v50, %s6862_s4  ;;  %1227 = vrot.lane.b32.xlu1 %v5820_v47, %s6863_s29  ;;  %v5823_v54 = vadd.f32 %v5822_v53, %v5821_v49  ;;  %v1295_v53 = vand.u32 7, %v7506_v44 }
 0x13b   : > { %v5769_v55 = vpop.f32.mrf.mxu0  ;;  %v5824_v56 = vpop.f32.mrf.mxu1 }
 0x13c   : > { %v5770_v58 = vadd.f32 %v5769_v55, %v5768_v52  ;;  %vm1319_vm6 = vcmp.le.s32.totalorder %v1295_v53, 6  ;;  %vm1303_vm7 = vcmp.ge.s32.totalorder %v1295_v53, 1  ;;  %v1725_v53 = vld [vmem:[%s9923_s7] sm:$0xff] }
 0x13d   : > { %v5771_v59 = vpop.f32.mrf.mxu0  ;;  %v5825_v60 = vpop.f32.mrf.mxu1 }
 0x13e   : > { %1229 = vrot.lane.b32.xlu0 %v5823_v54, %s6863_s29  ;;  %1199 = vrot.lane.b32.xlu1 %v5770_v58, %s6862_s4  ;;  %v5826_v61 = vadd.f32 %v5825_v60, %v5824_v56  ;;  %v7519_v54 = vsel %vm1302_vm5, 1.0, %v6858_v25 }
 0x13f   : > { %v5772_v62 = vpop.f32.mrf.mxu0  ;;  %v5827_v0 = vpop.f32.mrf.mxu1 }
 0x140   : > { %v5773_v1 = vadd.f32 %v5772_v62, %v5771_v59 }
 0x141   : > { %v5774_v2 = vpop.f32.mrf.mxu0  ;;  %v5828_v3 = vpop.f32.mrf.mxu1 }
 0x142   : > { %1201 = vrot.lane.b32.xlu0 %v5773_v1, %s6862_s4  ;;  %1231 = vrot.lane.b32.xlu1 %v5826_v61, %s6863_s29  ;;  %v5829_v4 = vadd.f32 %v5828_v3, %v5827_v0  ;;  %v7532_v0 = vsel %vm1319_vm6, 1.0, %v6858_v25 }
 0x143   : > { %v5775_v6 = vpop.f32.mrf.mxu0  ;;  %v5830_v7 = vpop.f32.mrf.mxu1 }
 0x144   : > { %v5776_v8 = vadd.f32 %v5775_v6, %v5774_v2 }
 0x145   : > { %v5831_v9 = vpop.f32.mrf.mxu1 }
 0x146   : > { %1233 = vrot.lane.b32.xlu0 %v5829_v4, %s6863_s29  ;;  %1203 = vrot.lane.b32.xlu1 %v5776_v8, %s6862_s4  ;;  %v5832_v10 = vadd.f32 %v5831_v9, %v5830_v7  ;;  %v7551_v9 = vsel %vm1303_vm7, 1.0, %v6858_v25  ;;  %s9911_s4 = smov 32   ;;  %vm1662_vm7 = vcmask 64512  }
 0x14a   : > { %1235 = vrot.lane.b32.xlu1 %v5832_v10, %s6863_s29  ;;  %s9928_s29 = smov 32  }
 0x16d   : > { %v1158_v13 = vpop.permute.xlu0 %1157 }
 0x16e   : > { %v1246_v24 = vsel %vm1245_vm1, %v7433_v40, %v1158_v13 }
 0x173   : > { %v1160_v15 = vpop.permute.xlu0 %1159 }
 0x174   : > { %v1247_v33 = vsel %vm1245_vm1, %v7436_v45, %v1160_v15 }
 0x179   : > { %v1162_v18 = vpop.permute.xlu0 %1161 }
 0x17a   : > { %v1248_v37 = vsel %vm1245_vm1, %v7439_v51, %v1162_v18 }
 0x17f   : > { %v1164_v16 = vpop.permute.xlu1 %1163 }
 0x180   : > { %v1249_v47 = vsel %vm1245_vm1, %v7442_v57, %v1164_v16 }
 0x185   : > { %v1166_v20 = vpop.permute.xlu0 %1165 }
 0x186   : > { %v1250_v58 = vsel %vm1245_vm1, %v7445_v63, %v1166_v20 }
 0x18b   : > { %v7477_v19 = vpop.permute.xlu1 %1167 }
 0x18c   : > { %v1251_v63 = vsel %vm1245_vm1, %v7448_v5, %v7477_v19 }
 0x191   : > { %v7481_v23 = vpop.permute.xlu0 %1169 }
 0x192   : > { %v1252_v5 = vsel %vm1245_vm1, %v7451_v11, %v7481_v23 }
 0x197   : > { %v7479_v21 = vpop.permute.xlu1 %1171 }
 0x198   : > { %v1253_v11 = vsel %vm1245_vm1, %v7454_v17, %v7479_v21  ;;  %v1289_v17 = vadd.s32 24, %v7487_v28 }
 0x19c   : > { %v1190_v26 = vpop.permute.xlu1 %1189 }
 0x19d   : > { %v1255_v27 = vsel %vm1254_vm2, %v1246_v24, %v1190_v26 }
 0x19e   : > { %v1222_v29 = vpop.permute.xlu0 %1221 }
 0x19f   : > { %v1264_v30 = vsel %vm1263_vm3, %v1255_v27, %v1222_v29  ;;  %v1288_v27 = vadd.s32 16, %v7487_v28 }
 0x1a0   : > { %1277 = vst.msk [vmem:[#allocation2 + $0x10] sm:$0xff] %vm1272_vm0, %v1264_v30  ;;  %v1192_v31 = vpop.permute.xlu1 %1191 }
 0x1a1   : > { %v1256_v40 = vsel %vm1254_vm2, %v1247_v33, %v1192_v31  ;;  %v1296_v32 = vand.u32 7, %v1288_v27 }
 0x1a3   : > { %vm1320_vm8 = vcmp.le.s32.totalorder %v1296_v32, 6  ;;  %vm1304_vm11 = vcmp.ge.s32.totalorder %v1296_v32, 1 }
 0x1a4   : > { %v1194_v34 = vpop.permute.xlu0 %1193  ;;  %v1224_v35 = vpop.permute.xlu1 %1223 }
 0x1a5   : > { %v1265_v36 = vsel %vm1263_vm3, %v1256_v40, %v1224_v35  ;;  %v1257_v42 = vsel %vm1254_vm2, %v1248_v37, %v1194_v34  ;;  %v1297_v40 = vand.u32 7, %v1289_v17  ;;  %v7594_v34 = vsel %vm1320_vm8, 1.0, %v6858_v25 }
 0x1a6   : > { %1278 = vst.msk [vmem:[#allocation2 + $0x18] sm:$0xff] %vm1272_vm0, %v1265_v36  ;;  %vm1671_vm8 = vcmask 97280  }
 0x1a7   : > { %v1351_v38 = vld [vmem:[#allocation2 + $0x10] sm:$0xff]  ;;  %vm1321_vm10 = vcmp.le.s32.totalorder %v1297_v40, 6  ;;  %vm1305_vm13 = vcmp.ge.s32.totalorder %v1297_v40, 1 }
 0x1a8   : > { %v1358_v41 = vld [vmem:[#allocation2 + $0x9] sm:$0xff]  ;;  %1509 = vrot.lane.b32.xlu0 %v1351_v38, %s9905_s30  ;;  %1422 = vrot.lane.b32.xlu1 %v1351_v38, %s6859_s25  ;;  %v1226_v45 = vpop.permute.xlu0 %1225  ;;  %v1196_v43 = vpop.permute.xlu1 %1195  ;;  %v7598_v36 = vsel %vm1321_vm10, 1.0, %v6858_v25  ;;  %v1729_v38 = vld [vmem:[%s9923_s7 + $0x20] sm:$0xf]  ;;  %vm1680_vm10 = vcmask 130048  }
 0x1a9   : > { %v1266_v46 = vsel %vm1263_vm3, %v1257_v42, %v1226_v45  ;;  %v1366_v51 = vmul.f32 %v1358_v41, %v7500_v39  ;;  %v7513_v48 = vld [vmem:[#allocation2 + $0xf] sm:$0xff]  ;;  %v1258_v49 = vsel %vm1254_vm2, %v1249_v47, %v1196_v43  ;;  %6355 = vmatprep.subr.msk.mxu1 %vm1762_vm12, %v1729_v38  ;;  %v1728_v45 = vld [vmem:[%s9923_s7 + $0x18] sm:$0xff]  ;;  %v7613_v43 = vsel %vm1304_vm11, 1.0, %v6858_v25 }
 0x1aa   : > { %1279 = vst.msk [vmem:[#allocation2 + $0x20] sm:$0xff] %vm1272_vm0, %v1266_v46  ;;  %v1375_v57 = vmul.f32 %v7513_v48, %v7519_v54  ;;  %6356 = vmatpush3.msk.msra.mxu1 %vm1762_vm12, %v1729_v38  ;;  %vm1689_vm11 = vcmask 162816  }
 0x1ab   : > { %6357 = vmatprep.subr.mxu1 %v1728_v45 }
 0x1ac   : > { %1452 = vrot.lane.b32.xlu0 %v1366_v51, %s6865_s0  ;;  %v1198_v50 = vpop.permute.xlu0 %1197  ;;  %v1228_v52 = vpop.permute.xlu1 %1227  ;;  %v1727_v51 = vld [vmem:[%s9923_s7 + $0x10] sm:$0xff]  ;;  %6358 = vmatpush3.msra.mxu1 %v1728_v45 }
 0x1ad   : > { %v1267_v55 = vsel %vm1263_vm3, %v1258_v49, %v1228_v52  ;;  %v1352_v56 = vld [vmem:[#allocation2 + $0x18] sm:$0xff]  ;;  %v1259_v59 = vsel %vm1254_vm2, %v1250_v58, %v1198_v50  ;;  %v7624_v49 = vsel %vm1305_vm13, 1.0, %v6858_v25  ;;  %6359 = vmatprep.subr.mxu1 %v1727_v51  ;;  %v1726_v52 = vld [vmem:[%s9923_s7 + $0x8] sm:$0xff]  ;;  %vm1698_vm13 = vcmask 195584  }
 0x1ae   : > { %1280 = vst.msk [vmem:[#allocation2 + $0x28] sm:$0xff] %vm1272_vm0, %v1267_v55  ;;  %1424 = vrot.lane.b32.xlu1 %v1352_v56, %s6859_s25  ;;  %v1359_v1 = vld [vmem:[#allocation2 + $0x11] sm:$0xff]  ;;  %6360 = vmatpush3.msra.mxu1 %v1727_v51 }
 0x1af   : > { %v1367_v6 = vmul.f32 %v1359_v1, %v7532_v0  ;;  %v7543_v8 = vld [vmem:[#allocation2 + $0x17] sm:$0xff]  ;;  %v1385_v26 = vmul.f32 %v1359_v1, %v7500_v39  ;;  %6361 = vmatprep.subr.mxu1 %v1726_v52 }
 0x1b0   : > { %1484 = vrot.lane.b32.xlu0 %v1375_v57, %s6866_s21  ;;  %v1230_v60 = vpop.permute.xlu0 %1229  ;;  %v1200_v61 = vpop.permute.xlu1 %1199  ;;  %v1376_v18 = vmul.f32 %v7543_v8, %v7551_v9  ;;  %v1394_v31 = vmul.f32 %v7543_v8, %v7519_v54  ;;  %6362 = vmatpush3.msra.mxu1 %v1726_v52 }
 0x1b1   : > { %v1268_v62 = vsel %vm1263_vm3, %v1259_v59, %v1230_v60  ;;  %v1260_v2 = vsel %vm1254_vm2, %v1251_v63, %v1200_v61  ;;  %v1353_v10 = vld [vmem:[#allocation2 + $0x20] sm:$0xff]  ;;  %6363 = vmatprep.subr.mxu1 %v1725_v53  ;;  %v1290_v60 = vadd.s32 32, %v7487_v28 }
 0x1b2   : > { %1281 = vst.msk [vmem:[#allocation2 + $0x30] sm:$0xff] %vm1272_vm0, %v1268_v62  ;;  %1598 = vrot.lane.b32.xlu1 %v1352_v56, %s6860_s27  ;;  %v1360_v20 = vld [vmem:[#allocation2 + $0x19] sm:$0xff]  ;;  %6364 = vmatpush3.msra.mxu1 %v1725_v53  ;;  %v1291_v62 = vadd.s32 40, %v7487_v28 }
 0x1b3   : > { %v1386_v30 = vmul.f32 %v1360_v20, %v7532_v0  ;;  %v7572_v21 = vld [vmem:[#allocation2 + $0x1f] sm:$0xff]  ;;  %v1368_v41 = vmul.f32 %v1360_v20, %v7594_v34  ;;  %v1404_v55 = vmul.f32 %v1360_v20, %v7500_v39 }
 0x1b4   : > { %1511 = vrot.lane.b32.xlu0 %v1352_v56, %s9905_s30  ;;  %v1202_v3 = vpop.permute.xlu0 %1201  ;;  %v1232_v4 = vpop.permute.xlu1 %1231  ;;  %v1395_v33 = vmul.f32 %v7572_v21, %v7551_v9  ;;  %v1377_v47 = vmul.f32 %v7572_v21, %v7613_v43 }
 0x1b5   : > { %v1269_v7 = vsel %vm1263_vm3, %v1260_v2, %v1232_v4  ;;  %v1261_v13 = vsel %vm1254_vm2, %v1252_v5, %v1202_v3  ;;  %v1354_v35 = vld [vmem:[#allocation2 + $0x28] sm:$0xff]  ;;  %v1298_v2 = vand.u32 7, %v1290_v60  ;;  %v1299_v4 = vand.u32 7, %v1291_v62 }
 0x1b6   : > { %1282 = vst.msk [vmem:[#allocation2 + $0x38] sm:$0xff] %vm1272_vm0, %v1269_v7  ;;  %1454 = vrot.lane.b32.xlu1 %v1367_v6, %s6865_s0  ;;  %v1361_v37 = vld [vmem:[#allocation2 + $0x21] sm:$0xff] }
 0x1b7   : > { %v1369_v42 = vmul.f32 %v1361_v37, %v7598_v36  ;;  %v7615_v46 = vld [vmem:[#allocation2 + $0x27] sm:$0xff]  ;;  %v1387_v56 = vmul.f32 %v1361_v37, %v7594_v34  ;;  %v1405_v59 = vmul.f32 %v1361_v37, %v7532_v0  ;;  %vm1322_vm14 = vcmp.le.s32.totalorder %v1298_v2, 6 }
 0x1b8   : > { %1426 = vrot.lane.b32.xlu0 %v1353_v10, %s6859_s25  ;;  %v1234_v15 = vpop.permute.xlu0 %1233  ;;  %v1204_v16 = vpop.permute.xlu1 %1203  ;;  %v1378_v50 = vmul.f32 %v7615_v46, %v7624_v49  ;;  %v1396_v63 = vmul.f32 %v7615_v46, %v7613_v43  ;;  %vm1323_vm15 = vcmp.le.s32.totalorder %v1299_v4, 6  ;;  %v7659_v6 = vsel %vm1322_vm14, 1.0, %v6858_v25 }
 0x1b9   : > { %v1270_v19 = vsel %vm1263_vm3, %v1261_v13, %v1234_v15  ;;  %v1262_v23 = vsel %vm1254_vm2, %v1253_v11, %v1204_v16  ;;  %v1355_v57 = vld [vmem:[#allocation2 + $0x30] sm:$0xff]  ;;  %v7663_v5 = vsel %vm1323_vm15, 1.0, %v6858_v25  ;;  %vm1306_vm1 = vcmp.ge.s32.totalorder %v1298_v2, 1 }
 0x1ba   : > { %1283 = vst.msk [vmem:[#allocation2 + $0x40] sm:$0xff] %vm1272_vm0, %v1270_v19  ;;  %1486 = vrot.lane.b32.xlu1 %v1376_v18, %s6866_s21  ;;  %v1362_v58 = vld [vmem:[#allocation2 + $0x29] sm:$0xff]  ;;  %vm1307_vm2 = vcmp.ge.s32.totalorder %v1299_v4, 1  ;;  %v7670_v16 = vsel %vm1306_vm1, 1.0, %v6858_v25  ;;  %v1403_v2 = vld [vmem:[#allocation2 + $0x51] sm:$0xff]  ;;  %vm1707_vm14 = vcmask 228352  }
 0x1bb   : > { %v1388_v61 = vmul.f32 %v1362_v58, %v7598_v36  ;;  %v7649_v1 = vld [vmem:[#allocation2 + $0x2f] sm:$0xff]  ;;  %v1370_v13 = vmul.f32 %v1362_v58, %v7659_v6  ;;  %v7678_v11 = vsel %vm1307_vm2, 1.0, %v6858_v25  ;;  %vm1737_vm15 = vcmask 293888  }
 0x1bc   : > { %1600 = vrot.lane.b32.xlu0 %v1353_v10, %s6860_s27  ;;  %v1236_v24 = vpop.permute.xlu1 %1235  ;;  %v1397_v3 = vmul.f32 %v7649_v1, %v7624_v49  ;;  %v1379_v19 = vmul.f32 %v7649_v1, %v7670_v16  ;;  %vm2243_vm1 = vcmask 392192  }
 0x1bd   : > { %v1271_v29 = vsel %vm1263_vm3, %v1262_v23, %v1236_v24  ;;  %v1356_v7 = vld [vmem:[#allocation2 + $0x38] sm:$0xff]  ;;  %v1406_v23 = vmul.f32 %v1362_v58, %v7594_v34 }
 0x1be   : > { %1284 = vst.msk [vmem:[#allocation2 + $0x48] sm:$0xff] %vm1272_vm0, %v1271_v29  ;;  %1541 = vrot.lane.b32.xlu1 %v1385_v26, %s6867_s1  ;;  %v7672_v18 = vld [vmem:[#allocation2 + $0x37] sm:$0xff] }
 0x1bf   : > { %v1380_v20 = vmul.f32 %v7672_v18, %v7678_v11  ;;  %v1398_v32 = vmul.f32 %v7672_v18, %v7670_v16 }
 0x1c0   : > { %1543 = vrot.lane.b32.xlu0 %v1386_v30, %s6867_s1  ;;  %v1292_v30 = vadd.s32 48, %v7487_v28 }
 0x1c1   : > { %v1357_v26 = vld [vmem:[#allocation2 + $0x40] sm:$0xff] }
 0x1c2   : > { %1573 = vrot.lane.b32.xlu1 %v1394_v31, %s6868_s22  ;;  %v1364_v27 = vld [vmem:[#allocation2 + $0x39] sm:$0xff] }
 0x1c3   : > { %v1390_v17 = vmul.f32 %v1364_v27, %v7663_v5  ;;  %v7696_v31 = vld [vmem:[#allocation2 + $0x3f] sm:$0xff] }
 0x1c4   : > { %1575 = vrot.lane.b32.xlu0 %v1395_v33, %s6868_s22  ;;  %v1300_v33 = vand.u32 7, %v1292_v30  ;;  %v1399_v40 = vmul.f32 %v7696_v31, %v7678_v11 }
 0x1c5   : > { %v1374_v53 = vld [vmem:[#allocation2 + $0x47] sm:$0xff]  ;;  %v1393_v62 = vld [vmem:[#allocation2 + $0x4f] sm:$0xff] }
 0x1c6   : > { %1513 = vrot.lane.b32.xlu1 %v1353_v10, %s9905_s30  ;;  %v1363_v10 = vld [vmem:[#allocation2 + $0x31] sm:$0xff]  ;;  %vm1324_vm3 = vcmp.le.s32.totalorder %v1300_v33, 6  ;;  %vm1308_vm4 = vcmp.ge.s32.totalorder %v1300_v33, 1 }
 0x1c7   : > { %v1371_v15 = vmul.f32 %v1363_v10, %v7663_v5  ;;  %v1389_v24 = vmul.f32 %v1363_v10, %v7659_v6  ;;  %v1407_v29 = vmul.f32 %v1363_v10, %v7598_v36  ;;  %v7707_v37 = vsel %vm1324_vm3, 1.0, %v6858_v25 }
 0x1c8   : > { %1428 = vrot.lane.b32.xlu0 %v1354_v35, %s6859_s25  ;;  %v7714_v45 = vsel %vm1308_vm4, 1.0, %v6858_v25 }
 0x1ca   : > { %1456 = vrot.lane.b32.xlu1 %v1368_v41, %s6865_s0  ;;  %v1383_v41 = vld [vmem:[#allocation2 + $0x48] sm:$0xff] }
 0x1cc   : > { %1458 = vrot.lane.b32.xlu0 %v1369_v42, %s6865_s0  ;;  %v1372_v42 = vmul.f32 %v1364_v27, %v7707_v37 }
 0x1ce   : > { %1488 = vrot.lane.b32.xlu1 %v1377_v47, %s6866_s21  ;;  %v1365_v47 = vld [vmem:[#allocation2 + $0x41] sm:$0xff] }
 0x1cf   : > { %v1391_v58 = vmul.f32 %v1365_v47, %v7707_v37  ;;  %v1409_v60 = vmul.f32 %v1365_v47, %v7663_v5 }
 0x1d0   : > { %1490 = vrot.lane.b32.xlu0 %v1378_v50, %s6866_s21  ;;  %v1381_v50 = vmul.f32 %v7696_v31, %v7714_v45 }
 0x1d2   : > { %1630 = vrot.lane.b32.xlu1 %v1404_v55, %s9911_s4  ;;  %v1408_v55 = vmul.f32 %v1364_v27, %v7659_v6 }
 0x1d4   : > { %1545 = vrot.lane.b32.xlu0 %v1387_v56, %s6867_s1 }
 0x1d6   : > { %1515 = vrot.lane.b32.xlu1 %v1354_v35, %s9905_s30 }
 0x1d8   : > { %1430 = vrot.lane.b32.xlu0 %v1355_v57, %s6859_s25 }
 0x1da   : > { %1602 = vrot.lane.b32.xlu1 %v1354_v35, %s6860_s27  ;;  %v1293_v35 = vadd.s32 56, %v7487_v28 }
 0x1dc   : > { %1604 = vrot.lane.b32.xlu0 %v1355_v57, %s6860_s27  ;;  %v1301_v38 = vand.u32 7, %v1293_v35 }
 0x1de   : > { %1632 = vrot.lane.b32.xlu1 %v1405_v59, %s9911_s4  ;;  %vm1325_vm5 = vcmp.le.s32.totalorder %v1301_v38, 6  ;;  %vm1309_vm6 = vcmp.ge.s32.totalorder %v1301_v38, 1  ;;  %v1384_v59 = vld [vmem:[#allocation2 + $0x49] sm:$0xff] }
 0x1df   : > { %v7717_v51 = vsel %vm1325_vm5, 1.0, %v6858_v25  ;;  %v7727_v56 = vsel %vm1309_vm6, 1.0, %v6858_v25  ;;  %v1410_v10 = vmul.f32 %v1384_v59, %v7707_v37  ;;  %vm6872_vm6 = vmmov 0  }
 0x1e0   : > { %1547 = vrot.lane.b32.xlu0 %v1388_v61, %s6867_s1  ;;  %v1373_v52 = vmul.f32 %v1365_v47, %v7717_v51  ;;  %v1392_v61 = vmul.f32 %v1384_v59, %v7717_v51  ;;  %v1401_v4 = vmul.f32 %v1393_v62, %v7727_v56 }
 0x1e2   : > { %1577 = vrot.lane.b32.xlu1 %v1396_v63, %s6868_s22  ;;  %v1400_v63 = vmul.f32 %v1374_v53, %v7714_v45 }
 0x1e4   : > { %1579 = vrot.lane.b32.xlu0 %v1397_v3, %s6868_s22 }
 0x1e6   : > { %1517 = vrot.lane.b32.xlu1 %v1355_v57, %s9905_s30  ;;  %v1382_v57 = vmul.f32 %v1374_v53, %v7727_v56 }
 0x1e8   : > { %1432 = vrot.lane.b32.xlu0 %v1356_v7, %s6859_s25 }
 0x1ea   : > { %1460 = vrot.lane.b32.xlu1 %v1370_v13, %s6865_s0  ;;  %v1411_v13 = vmul.f32 %v1403_v2, %v7717_v51 }
 0x1ec   : > { %1462 = vrot.lane.b32.xlu0 %v1371_v15, %s6865_s0 }
 0x1ee   : > { %1492 = vrot.lane.b32.xlu1 %v1379_v19, %s6866_s21 }
 0x1f0   : > { %1494 = vrot.lane.b32.xlu0 %v1380_v20, %s6866_s21 }
 0x1f2   : > { %1634 = vrot.lane.b32.xlu1 %v1406_v23, %s9911_s4 }
 0x1f4   : > { %1549 = vrot.lane.b32.xlu0 %v1389_v24, %s6867_s1 }
 0x1f6   : > { %1519 = vrot.lane.b32.xlu1 %v1356_v7, %s9905_s30 }
 0x1f8   : > { %1434 = vrot.lane.b32.xlu0 %v1357_v26, %s6859_s25  ;;  %s9926_s25 = sld [smem:[#allocation12_spill]] }
 0x1fa   : > { %1606 = vrot.lane.b32.xlu1 %v1356_v7, %s6860_s27 }
 0x1fc   : > { %1608 = vrot.lane.b32.xlu0 %v1357_v26, %s6860_s27 }
 0x1fe   : > { %1636 = vrot.lane.b32.xlu1 %v1407_v29, %s9911_s4 }
 0x200   : > { %1551 = vrot.lane.b32.xlu0 %v1390_v17, %s6867_s1 }
 0x202   : > { %1581 = vrot.lane.b32.xlu1 %v1398_v32, %s6868_s22  ;;  %v1334_v32 = vld [vmem:[#allocation2 + $0x7] sm:$0xff] }
 0x204   : > { %1583 = vrot.lane.b32.xlu0 %v1399_v40, %s6868_s22  ;;  %v1342_v40 = vmul.f32 %v1334_v32, %v7519_v54 }
 0x206   : > { %1521 = vrot.lane.b32.xlu1 %v1357_v26, %s9905_s30 }
 0x208   : > { %1523 = vrot.lane.b32.xlu0 %v1383_v41, %s9905_s30 }
 0x20a   : > { %1464 = vrot.lane.b32.xlu1 %v1372_v42, %s6865_s0 }
 0x20c   : > { %1610 = vrot.lane.b32.xlu0 %v1383_v41, %s6860_s27  ;;  %v1654_v41 = vsel %vm1272_vm0, %v1342_v40, %v7473_v12  ;;  %s6874_s27 = smov 80  }
 0x20e   : > { %1496 = vrot.lane.b32.xlu1 %v1381_v50, %s6866_s21 }
 0x210   : > { %1466 = vrot.lane.b32.xlu0 %v1373_v52, %s6865_s0  ;;  %s9924_s0 = sld [smem:[#allocation11_spill]] }
 0x212   : > { %1638 = vrot.lane.b32.xlu1 %v1408_v55, %s9911_s4 }
 0x214   : > { %1498 = vrot.lane.b32.xlu0 %v1382_v57, %s6866_s21  ;;  %s9909_s21 = smov 96  }
 0x216   : > { %1553 = vrot.lane.b32.xlu1 %v1391_v58, %s6867_s1 }
 0x218   : > { %1640 = vrot.lane.b32.xlu0 %v1409_v60, %s9911_s4  ;;  %v1343_v60 = vmul.f32 %v7513_v48, %v7551_v9 }
 0x21a   : > { %v1510_v25 = vpop.permute.xlu0 %1509  ;;  %1555 = vrot.lane.b32.xlu1 %v1392_v61, %s6867_s1  ;;  %v1423_v3 = vpop.permute.xlu1 %1422 }
 0x21b   : > { %v1655_v2 = vsel %vm1272_vm0, %v1343_v60, %v1423_v3 }
 0x21c   : > { %1585 = vrot.lane.b32.xlu0 %v1400_v63, %s6868_s22 }
 0x21e   : > { %v1453_v7 = vpop.permute.xlu0 %1452  ;;  %1587 = vrot.lane.b32.xlu1 %v1401_v4, %s6868_s22  ;;  %s9931_s22 = smov 16  }
 0x21f   : > { %v1663_v47 = vsel %vm1662_vm7, %v1654_v41, %v1453_v7 }
 0x220   : > { %1642 = vrot.lane.b32.xlu0 %v1410_v10, %s9911_s4  ;;  %v1425_v15 = vpop.permute.xlu1 %1424 }
 0x222   : > { %v1485_v19 = vpop.permute.xlu0 %1484  ;;  %1644 = vrot.lane.b32.xlu1 %v1411_v13, %s9911_s4 }
 0x223   : > { %v1672_v50 = vsel %vm1671_vm8, %v1663_v47, %v1485_v19  ;;  %v1344_v47 = vmul.f32 %v7543_v8, %v7613_v43 }
 0x224   : > { %v1599_v20 = vpop.permute.xlu1 %1598  ;;  %v1681_v55 = vsel %vm1680_vm10, %v1672_v50, %v1510_v25 }
 0x226   : > { %v1512_v23 = vpop.permute.xlu0 %1511 }
 0x228   : > { %v1455_v24 = vpop.permute.xlu1 %1454 }
 0x229   : > { %v1664_v25 = vsel %vm1662_vm7, %v1655_v2, %v1455_v24 }
 0x22a   : > { %v7746_v26 = vpop.permute.xlu0 %1426 }
 0x22c   : > { %v1487_v27 = vpop.permute.xlu1 %1486 }
 0x22d   : > { %v1673_v7 = vsel %vm1671_vm8, %v1664_v25, %v1487_v27 }
 0x22e   : > { %v1601_v29 = vpop.permute.xlu0 %1600  ;;  %v1682_v19 = vsel %vm1680_vm10, %v1673_v7, %v1512_v23 }
 0x230   : > { %v1542_v30 = vpop.permute.xlu1 %1541 }
 0x231   : > { %v1690_v57 = vsel %vm1689_vm11, %v1681_v55, %v1542_v30 }
 0x232   : > { %v1544_v17 = vpop.permute.xlu0 %1543 }
 0x233   : > { %v1691_v48 = vsel %vm1689_vm11, %v1682_v19, %v1544_v17  ;;  %v1656_v17 = vsel %vm1272_vm0, %v1344_v47, %v1425_v15 }
 0x234   : > { %v1574_v33 = vpop.permute.xlu1 %1573 }
 0x235   : > { %v1699_v59 = vsel %vm1698_vm13, %v1690_v57, %v1574_v33 }
 0x236   : > { %v1576_v35 = vpop.permute.xlu0 %1575  ;;  %v1708_v62 = vsel %vm1707_vm14, %v1699_v59, %v1599_v20 }
 0x237   : > { %v1700_v20 = vsel %vm1698_vm13, %v1691_v48, %v1576_v35 }
 0x238   : > { %v1514_v38 = vpop.permute.xlu1 %1513  ;;  %v1709_v3 = vsel %vm1707_vm14, %v1700_v20, %v1601_v29 }
 0x23a   : > { %v7751_v42 = vpop.permute.xlu0 %1428 }
 0x23c   : > { %v1457_v52 = vpop.permute.xlu1 %1456 }
 0x23d   : > { %v1665_v35 = vsel %vm1662_vm7, %v1656_v17, %v1457_v52  ;;  %v1345_v52 = vmul.f32 %v7572_v21, %v7624_v49 }
 0x23e   : > { %v1459_v53 = vpop.permute.xlu0 %1458 }
 0x240   : > { %v1489_v58 = vpop.permute.xlu1 %1488 }
 0x241   : > { %v1674_v55 = vsel %vm1671_vm8, %v1665_v35, %v1489_v58 }
 0x242   : > { %v1491_v12 = vpop.permute.xlu0 %1490  ;;  %v1683_v59 = vsel %vm1680_vm10, %v1674_v55, %v1514_v38  ;;  %v1657_v38 = vsel %vm1272_vm0, %v1345_v52, %v7746_v26 }
 0x244   : > { %v1631_v61 = vpop.permute.xlu1 %1630 }
 0x245   : > { %v1717_v63 = vsel %vm1716_vm9, %v1708_v62, %v1631_v61 }
 0x246   : > { %v1546_v4 = vpop.permute.xlu0 %1545  ;;  %6365 = vmatprep.mubr.msk.f32.mxu1 %vm1737_vm15, %v1717_v63 }
 0x247   : > { %v1692_v60 = vsel %vm1689_vm11, %v1683_v59, %v1546_v4  ;;  %v1666_v4 = vsel %vm1662_vm7, %v1657_v38, %v1459_v53 }
 0x248   : > { %v1516_v10 = vpop.permute.xlu1 %1515  ;;  %v1675_v7 = vsel %vm1671_vm8, %v1666_v4, %v1491_v12  ;;  %v1346_v12 = vmul.f32 %v7615_v46, %v7670_v16 }
 0x249   : > { %v1684_v48 = vsel %vm1680_vm10, %v1675_v7, %v1516_v10 }
 0x24a   : > { %v7766_v13 = vpop.permute.xlu0 %1430 }
 0x24c   : > { %v1603_v30 = vpop.permute.xlu1 %1602 }
 0x24e   : > { %v1605_v32 = vpop.permute.xlu0 %1604 }
 0x250   : > { %v1633_v33 = vpop.permute.xlu1 %1632 }
 0x251   : > { %v1718_v40 = vsel %vm1716_vm9, %v1709_v3, %v1633_v33 }
 0x252   : > { %v1548_v41 = vpop.permute.xlu0 %1547  ;;  %6366 = vmatmul.mubr.msk.f32.vlgmr.msra.gmra.mxu1 %vm1737_vm15, %v1718_v40 }
 0x254   : > { %v1578_v24 = vpop.permute.xlu1 %1577 }
 0x255   : > { %v1701_v62 = vsel %vm1698_vm13, %v1692_v60, %v1578_v24  ;;  %v1347_v60 = vmul.f32 %v7649_v1, %v7678_v11 }
 0x256   : > { %v1580_v27 = vpop.permute.xlu0 %1579  ;;  %v1710_v8 = vsel %vm1707_vm14, %v1701_v62, %v1603_v30  ;;  %v1693_v30 = vsel %vm1689_vm11, %v1684_v48, %v1548_v41  ;;  %v1658_v41 = vsel %vm1272_vm0, %v1346_v12, %v7751_v42 }
 0x257   : > { %v1702_v33 = vsel %vm1698_vm13, %v1693_v30, %v1580_v27  ;;  %v1659_v42 = vsel %vm1272_vm0, %v1347_v60, %v7766_v13  ;;  %v7851_v60 = vld [vmem:[#allocation4] sm:$0xff] }
 0x258   : > { %v1518_v23 = vpop.permute.xlu1 %1517  ;;  %v1711_v40 = vsel %vm1707_vm14, %v1702_v33, %v1605_v32 }
 0x25a   : > { %v1433_v50 = vpop.permute.xlu0 %1432 }
 0x25c   : > { %v1461_v57 = vpop.permute.xlu1 %1460 }
 0x25d   : > { %v1667_v27 = vsel %vm1662_vm7, %v1658_v41, %v1461_v57 }
 0x25e   : > { %v1463_v29 = vpop.permute.xlu0 %1462 }
 0x25f   : > { %v1668_v57 = vsel %vm1662_vm7, %v1659_v42, %v1463_v29 }
 0x260   : > { %v1493_v61 = vpop.permute.xlu1 %1492 }
 0x261   : > { %v1676_v35 = vsel %vm1671_vm8, %v1667_v27, %v1493_v61 }
 0x262   : > { %v1495_v63 = vpop.permute.xlu0 %1494  ;;  %v1685_v59 = vsel %vm1680_vm10, %v1676_v35, %v1518_v23 }
 0x263   : > { %v1677_v61 = vsel %vm1671_vm8, %v1668_v57, %v1495_v63  ;;  %v1349_v63 = vmul.f32 %v7696_v31, %v7727_v56  ;;  %v5499_v57 = vld [vmem:[%s9893_s13] ss:$0 sm:$0xff] }
 0x264   : > { %v1635_v2 = vpop.permute.xlu1 %1634 }
 0x265   : > { %v1719_v15 = vsel %vm1716_vm9, %v1710_v8, %v1635_v2 }
 0x266   : > { %v1550_v25 = vpop.permute.xlu0 %1549  ;;  %6368 = vmatprep.mubr.msk.f32.mxu1 %vm1737_vm15, %v1719_v15 }
 0x267   : > { %v1694_v62 = vsel %vm1689_vm11, %v1685_v59, %v1550_v25  ;;  %v1348_v25 = vmul.f32 %v7672_v18, %v7714_v45  ;;  %v5511_v59 = vld [vmem:[%s9924_s0 + $0x10] sm:$0xff] }
 0x268   : > { %v1520_v58 = vpop.permute.xlu1 %1519 }
 0x269   : > { %v1686_v23 = vsel %vm1680_vm10, %v1677_v61, %v1520_v58  ;;  %v1660_v29 = vsel %vm1272_vm0, %v1348_v25, %v1433_v50 }
 0x26a   : > { %v1435_v19 = vpop.permute.xlu0 %1434 }
 0x26b   : > { %v1661_v48 = vsel %vm1272_vm0, %v1349_v63, %v1435_v19  ;;  %vm1881_vm0 = vcmask 523264  }
 0x26c   : > { %v1607_v20 = vpop.permute.xlu1 %1606  ;;  %6412 = vmatprep.mubr.msk.f32.mxu0 %vm1881_vm0, %v5511_v59  ;;  %2246 = vst.msk [vmem:[#allocation3] sm:$0xff] %vm1881_vm0, %v7851_v60  ;;  %2247 = vst.msk [vmem:[#allocation3 + $0x18] sm:$0xff] %vm1881_vm0, %v7851_v60  ;;  %v2337_v59 = vld [vmem:[%s9925_s8 + $0x70] sm:$0xff] }
 0x26d   : > { %3813 = vst.msk [vmem:[#allocation6] sm:$0xff] %vm1881_vm0, %v7851_v60  ;;  %3814 = vst.msk [vmem:[#allocation6 + $0x18] sm:$0xff] %vm1881_vm0, %v7851_v60 }
 0x26e   : > { %v1609_v21 = vpop.permute.xlu0 %1608 }
 0x270   : > { %v1637_v3 = vpop.permute.xlu1 %1636 }
 0x271   : > { %v1720_v24 = vsel %vm1716_vm9, %v1711_v40, %v1637_v3 }
 0x272   : > { %v1552_v26 = vpop.permute.xlu0 %1551  ;;  %6369 = vmatmul.mubr.msk.f32.gmra.mxu1 %vm1737_vm15, %v1720_v24 }
 0x273   : > { %v1695_v38 = vsel %vm1689_vm11, %v1686_v23, %v1552_v26 }
 0x274   : > { %v1582_v53 = vpop.permute.xlu1 %1581 }
 0x275   : > { %v1703_v46 = vsel %vm1698_vm13, %v1694_v62, %v1582_v53 }
 0x276   : > { %v1584_v47 = vpop.permute.xlu0 %1583  ;;  %v1712_v52 = vsel %vm1707_vm14, %v1703_v46, %v1607_v20 }
 0x277   : > { %v1704_v13 = vsel %vm1698_vm13, %v1695_v38, %v1584_v47 }
 0x278   : > { %v1522_v10 = vpop.permute.xlu1 %1521  ;;  %v1713_v18 = vsel %vm1707_vm14, %v1704_v13, %v1609_v21 }
 0x27a   : > { %v1524_v17 = vpop.permute.xlu0 %1523 }
 0x27c   : > { %v1465_v32 = vpop.permute.xlu1 %1464 }
 0x27d   : > { %v1669_v58 = vsel %vm1662_vm7, %v1660_v29, %v1465_v32 }
 0x27e   : > { %v1611_v55 = vpop.permute.xlu0 %1610 }
 0x280   : > { %v1497_v2 = vpop.permute.xlu1 %1496 }
 0x281   : > { %v1678_v30 = vsel %vm1671_vm8, %v1669_v58, %v1497_v2 }
 0x282   : > { %v1467_v8 = vpop.permute.xlu0 %1466  ;;  %v1687_v31 = vsel %vm1680_vm10, %v1678_v30, %v1522_v10 }
 0x283   : > { %v1670_v33 = vsel %vm1662_vm7, %v1661_v48, %v1467_v8  ;;  %vm2948_vm7 = vcmask 785408  }
 0x284   : > { %v1639_v15 = vpop.permute.xlu1 %1638 }
 0x285   : > { %v1721_v1 = vsel %vm1716_vm9, %v1712_v52, %v1639_v15 }
 0x286   : > { %v1499_v4 = vpop.permute.xlu0 %1498  ;;  %6371 = vmatprep.mubr.msk.f32.mxu1 %vm1737_vm15, %v1721_v1 }
 0x287   : > { %v1679_v40 = vsel %vm1671_vm8, %v1670_v33, %v1499_v4 }
 0x288   : > { %v1554_v7 = vpop.permute.xlu1 %1553  ;;  %v1688_v19 = vsel %vm1680_vm10, %v1679_v40, %v1524_v17  ;;  %v1880_v40 = vld [vmem:[%s9924_s0 + $0x8] sm:$0xff] }
 0x289   : > { %v1696_v24 = vsel %vm1689_vm11, %v1687_v31, %v1554_v7  ;;  %v5516_v31 = vld [vmem:[%s9924_s0 + $0x28] sm:$0xff] }
 0x28a   : > { %v1641_v20 = vpop.permute.xlu0 %1640 }
 0x28b   : > { %v1722_v3 = vsel %vm1716_vm9, %v1713_v18, %v1641_v20 }
 0x28c   : > { %6372 = vmatmul.mubr.msk.f32.gmra.mxu1 %vm1737_vm15, %v1722_v3  ;;  %v1556_v50 = vpop.permute.xlu1 %1555  ;;  %v5512_v3 = vld [vmem:[%s9924_s0 + $0x18] sm:$0xff] }
 0x28d   : > { %v1697_v21 = vsel %vm1689_vm11, %v1688_v19, %v1556_v50  ;;  %v5515_v50 = vld [vmem:[%s9924_s0 + $0x20] sm:$0xff] }
 0x28e   : > { %v1586_v26 = vpop.permute.xlu0 %1585 }
 0x28f   : > { %v1705_v53 = vsel %vm1698_vm13, %v1696_v24, %v1586_v26  ;;  %v5519_v24 = vld [vmem:[%s9924_s0 + $0x30] sm:$0xff]  ;;  %v5520_v26 = vld [vmem:[%s9924_s0 + $0x38] sm:$0xff] }
 0x290   : > { %v1588_v47 = vpop.permute.xlu1 %1587  ;;  %v1714_v41 = vsel %vm1707_vm14, %v1705_v53, %v1611_v55  ;;  %v1879_v55 = vld [vmem:[%s9924_s0] sm:$0xff] }
 0x291   : > { %v1706_v12 = vsel %vm1698_vm13, %v1697_v21, %v1588_v47  ;;  %vm3475_vm13 = vcmask 257024  }
 0x292   : > { %v1643_v27 = vpop.permute.xlu0 %1642  ;;  %v1715_v32 = vsel %vm1707_vm14, %v1706_v12, %v7475_v14 }
 0x293   : > { %v1723_v35 = vsel %vm1716_vm9, %v1714_v41, %v1643_v27 }
 0x294   : > { %6374 = vmatprep.mubr.msk.f32.mxu1 %vm1737_vm15, %v1723_v35  ;;  %v1645_v10 = vpop.permute.xlu1 %1644 }
 0x295   : > { %v1724_v17 = vsel %vm1716_vm9, %v1715_v32, %v1645_v10  ;;  %v2354_v10 = vld [vmem:[%s9925_s8 + $0xf8] sm:$0xff] }
 0x296   : > { %6375 = vmatmul.mubr.msk.f32.gmra.mxu1 %vm1737_vm15, %v1724_v17  ;;  %v2338_v32 = vld [vmem:[%s9925_s8 + $0x78] sm:$0xff]  ;;  %v2353_v17 = vld [vmem:[%s9925_s8 + $0xf0] sm:$0xff] }
 0x297   : > { %6393 = vmatprep.mubr.msk.f32.mxu1 %vm1881_vm0, %v1879_v55  ;;  %v2352_v55 = vld [vmem:[%s9925_s8 + $0xe8] sm:$0xff] }
 0x312   : > { %v6367_v14 = vpop.f32.mrf.mxu1 }
 0x313   : > { %v1838_v58 = vadd.f32 %v6367_v14, %v5499_v57  ;;  %v2336_v14 = vld [vmem:[%s9925_s8 + $0x68] sm:$0xff] }
 0x314   : > { %v1832_v62 = vpop.f32.mrf.mxu1 }
 0x315   : > { %v1833_v30 = vadd.f32 %v5499_v57, %v1832_v62  ;;  %v7897_v20 = vmax.f32 %v1838_v58, 0.0  ;;  %v2386_v62 = vld [vmem:[%s9925_s8 + $0x1f8] sm:$0xff] }
 0x316   : > { %v2382_v58 = vld [vmem:[%s9925_s8 + $0x1d8] sm:$0xff] }
 0x317   : > { %v7903_v33 = vmax.f32 %v1833_v30, 0.0  ;;  %v2348_v30 = vld [vmem:[%s9925_s8 + $0xc8] sm:$0xff] }
 0x332   : > { %v6370_v2 = vpop.f32.mrf.mxu1 }
 0x333   : > { %v1848_v13 = vadd.f32 %v6370_v2, %v5499_v57  ;;  %v2370_v2 = vld [vmem:[%s9925_s8 + $0x178] sm:$0xff] }
 0x334   : > { %v1842_v46 = vpop.f32.mrf.mxu1 }
 0x335   : > { %v1843_v63 = vadd.f32 %v5499_v57, %v1842_v46  ;;  %v7885_v48 = vmax.f32 %v1848_v13, 0.0  ;;  %v2351_v46 = vld [vmem:[%s9925_s8 + $0xe0] sm:$0xff] }
 0x336   : > { %v2367_v13 = vld [vmem:[%s9925_s8 + $0x160] sm:$0xff] }
 0x337   : > { %v7891_v18 = vmax.f32 %v1843_v63, 0.0  ;;  %v2333_v63 = vld [vmem:[%s9925_s8 + $0x50] sm:$0xff] }
 0x34c   : > { %v6373_v42 = vpop.f32.mrf.mxu1 }
 0x34d   : > { %v1858_v23 = vadd.f32 %v6373_v42, %v5499_v57  ;;  %v2385_v42 = vld [vmem:[%s9925_s8 + $0x1f0] sm:$0xff] }
 0x34e   : > { %v1852_v8 = vpop.f32.mrf.mxu1 }
 0x34f   : > { %v1853_v38 = vadd.f32 %v5499_v57, %v1852_v8  ;;  %v7873_v29 = vmax.f32 %v1858_v23, 0.0  ;;  %v2335_v8 = vld [vmem:[%s9925_s8 + $0x60] sm:$0xff]  ;;  %v2334_v23 = vld [vmem:[%s9925_s8 + $0x58] sm:$0xff] }
 0x351   : > { %v7879_v7 = vmax.f32 %v1853_v38, 0.0  ;;  %v2349_v38 = vld [vmem:[%s9925_s8 + $0xd0] sm:$0xff] }
 0x356   : > { %v6376_v61 = vpop.f32.mrf.mxu1 }
 0x357   : > { %v1868_v15 = vadd.f32 %v6376_v61, %v5499_v57  ;;  %v2384_v61 = vld [vmem:[%s9925_s8 + $0x1e8] sm:$0xff] }
 0x358   : > { %v1862_v52 = vpop.f32.mrf.mxu1 }
 0x359   : > { %v7865_v1 = vmax.f32 %v1868_v15, 0.0  ;;  %v1863_v25 = vadd.f32 %v5499_v57, %v1862_v52  ;;  %v2369_v57 = vld [vmem:[%s9925_s8 + $0x170] sm:$0xff]  ;;  %v2350_v15 = vld [vmem:[%s9925_s8 + $0xd8] sm:$0xff]  ;;  %v2368_v52 = vld [vmem:[%s9925_s8 + $0x168] sm:$0xff] }
 0x35b   : > { %v7867_v4 = vmax.f32 %v1863_v25, 0.0  ;;  %6377 = vmatprep.subr.mxu1 %v7865_v1  ;;  %6396 = vmatprep.subr.mxu0 %v7865_v1  ;;  %v2383_v25 = vld [vmem:[%s9925_s8 + $0x1e0] sm:$0xff] }
 0x35c   : > { %6378 = vmatpush3.msra.mxu1 %v7865_v1  ;;  %6397 = vmatpush3.msra.mxu0 %v7865_v1 }
 0x35d   : > { %6379 = vmatprep.subr.mxu1 %v7867_v4  ;;  %6398 = vmatprep.subr.mxu0 %v7867_v4 }
 0x35e   : > { %6380 = vmatpush3.msra.mxu1 %v7867_v4  ;;  %6399 = vmatpush3.msra.mxu0 %v7867_v4 }
 0x35f   : > { %6381 = vmatprep.subr.mxu1 %v7873_v29  ;;  %6400 = vmatprep.subr.mxu0 %v7873_v29 }
 0x360   : > { %6382 = vmatpush3.msra.mxu1 %v7873_v29  ;;  %6401 = vmatpush3.msra.mxu0 %v7873_v29 }
 0x361   : > { %6383 = vmatprep.subr.mxu1 %v7879_v7  ;;  %6402 = vmatprep.subr.mxu0 %v7879_v7 }
 0x362   : > { %6384 = vmatpush3.msra.mxu1 %v7879_v7  ;;  %6403 = vmatpush3.msra.mxu0 %v7879_v7 }
 0x363   : > { %6385 = vmatprep.subr.mxu1 %v7885_v48  ;;  %6404 = vmatprep.subr.mxu0 %v7885_v48 }
 0x364   : > { %6386 = vmatpush3.msra.mxu1 %v7885_v48  ;;  %6405 = vmatpush3.msra.mxu0 %v7885_v48 }
 0x365   : > { %6387 = vmatprep.subr.mxu1 %v7891_v18  ;;  %6406 = vmatprep.subr.mxu0 %v7891_v18 }
 0x366   : > { %6388 = vmatpush3.msra.mxu1 %v7891_v18  ;;  %6407 = vmatpush3.msra.mxu0 %v7891_v18 }
 0x367   : > { %6389 = vmatprep.subr.mxu1 %v7897_v20  ;;  %6408 = vmatprep.subr.mxu0 %v7897_v20 }
 0x368   : > { %6390 = vmatpush3.msra.mxu1 %v7897_v20  ;;  %6409 = vmatpush3.msra.mxu0 %v7897_v20 }
 0x369   : > { %6391 = vmatprep.subr.mxu1 %v7903_v33  ;;  %6410 = vmatprep.subr.mxu0 %v7903_v33 }
 0x36a   : > { %6392 = vmatpush3.msra.mxu1 %v7903_v33  ;;  %6411 = vmatpush3.msra.mxu0 %v7903_v33 }
 0x36b   : > { %6413 = vmatmul.mubr.msk.f32.vlgmr.msra.gmra.mxu0 %vm1881_vm0, %v5512_v3  ;;  %6415 = vmatprep.subr.mxu1 %v7865_v1  ;;  %v2366_v3 = vld [vmem:[%s9925_s8 + $0x158] sm:$0xff] }
 0x36c   : > { %6434 = vmatprep.subr.mxu0 %v7865_v1  ;;  %6394 = vmatmul.mubr.msk.f32.vlgmr.msra.gmra.mxu1 %vm1881_vm0, %v1880_v40  ;;  %v2332_v40 = vld [vmem:[%s9925_s8 + $0x48] sm:$0xff] }
 0x36d   : > { %6416 = vmatpush3.msra.mxu1 %v7865_v1  ;;  %6435 = vmatpush3.msra.mxu0 %v7865_v1 }
 0x36e   : > { %6417 = vmatprep.subr.mxu1 %v7867_v4  ;;  %6436 = vmatprep.subr.mxu0 %v7867_v4 }
 0x36f   : > { %6418 = vmatpush3.msra.mxu1 %v7867_v4  ;;  %6437 = vmatpush3.msra.mxu0 %v7867_v4 }
 0x370   : > { %6419 = vmatprep.subr.mxu1 %v7873_v29  ;;  %6438 = vmatprep.subr.mxu0 %v7873_v29 }
 0x371   : > { %6420 = vmatpush3.msra.mxu1 %v7873_v29  ;;  %6439 = vmatpush3.msra.mxu0 %v7873_v29 }
 0x372   : > { %6421 = vmatprep.subr.mxu1 %v7879_v7  ;;  %6440 = vmatprep.subr.mxu0 %v7879_v7 }
 0x373   : > { %6422 = vmatpush3.msra.mxu1 %v7879_v7  ;;  %6441 = vmatpush3.msra.mxu0 %v7879_v7 }
 0x374   : > { %6423 = vmatprep.subr.mxu1 %v7885_v48  ;;  %6442 = vmatprep.subr.mxu0 %v7885_v48 }
 0x375   : > { %6424 = vmatpush3.msra.mxu1 %v7885_v48  ;;  %6443 = vmatpush3.msra.mxu0 %v7885_v48 }
 0x376   : > { %6425 = vmatprep.subr.mxu1 %v7891_v18  ;;  %6444 = vmatprep.subr.mxu0 %v7891_v18 }
 0x377   : > { %6426 = vmatpush3.msra.mxu1 %v7891_v18  ;;  %6445 = vmatpush3.msra.mxu0 %v7891_v18 }
 0x378   : > { %6427 = vmatprep.subr.mxu1 %v7897_v20  ;;  %6446 = vmatprep.subr.mxu0 %v7897_v20 }
 0x379   : > { %6428 = vmatpush3.msra.mxu1 %v7897_v20  ;;  %6447 = vmatpush3.msra.mxu0 %v7897_v20 }
 0x37a   : > { %6429 = vmatprep.subr.mxu1 %v7903_v33  ;;  %6448 = vmatprep.subr.mxu0 %v7903_v33 }
 0x37b   : > { %6430 = vmatpush3.msra.mxu1 %v7903_v33  ;;  %6431 = vmatprep.mubr.msk.f32.mxu1 %vm1881_vm0, %v5515_v50  ;;  %v2381_v50 = vld [vmem:[%s9925_s8 + $0x1d0] sm:$0xff] }
 0x37c   : > { %6449 = vmatpush3.msra.mxu0 %v7903_v33  ;;  %6432 = vmatmul.mubr.msk.f32.vlgmr.msra.gmra.mxu1 %vm1881_vm0, %v5516_v31  ;;  %v2347_v31 = vld [vmem:[%s9925_s8 + $0xc0] sm:$0xff] }
 0x37d   : > { %6450 = vmatprep.mubr.msk.f32.mxu0 %vm1881_vm0, %v5519_v24  ;;  %5886 = vmatprep.subr.mxu1 %v2354_v10  ;;  %v2365_v24 = vld [vmem:[%s9925_s8 + $0x150] sm:$0xff]  ;;  %v2363_v10 = vld [vmem:[%s9925_s8 + $0x140] sm:$0xff] }
 0x37e   : > { %6451 = vmatmul.mubr.msk.f32.vlgmr.msra.gmra.mxu0 %vm1881_vm0, %v5520_v26  ;;  %5887 = vmatpush3.msra.mxu1 %v2338_v32  ;;  %v2331_v26 = vld [vmem:[%s9925_s8 + $0x40] sm:$0xff]  ;;  %v2329_v32 = vld [vmem:[%s9925_s8 + $0x30] sm:$0xff] }
 0x37f   : > { %5888 = vmatprep.subr.mxu1 %v2353_v17  ;;  %5924 = vmatprep.subr.mxu0 %v2386_v62  ;;  %v2378_v17 = vld [vmem:[%s9925_s8 + $0x1b8] sm:$0xff]  ;;  %v2377_v62 = vld [vmem:[%s9925_s8 + $0x1b0] sm:$0xff] }
 0x380   : > { %5889 = vmatpush3.msra.mxu1 %v2337_v59  ;;  %5925 = vmatpush3.msra.mxu0 %v2370_v2  ;;  %v2344_v59 = vld [vmem:[%s9925_s8 + $0xa8] sm:$0xff]  ;;  %v2343_v2 = vld [vmem:[%s9925_s8 + $0xa0] sm:$0xff] }
 0x381   : > { %5890 = vmatprep.subr.mxu1 %v2352_v55  ;;  %5926 = vmatprep.subr.mxu0 %v2385_v42  ;;  %v2362_v55 = vld [vmem:[%s9925_s8 + $0x138] sm:$0xff]  ;;  %v2327_v42 = vld [vmem:[%s9925_s8 + $0x20] sm:$0xff] }
 0x382   : > { %5891 = vmatpush3.msra.mxu1 %v2336_v14  ;;  %5927 = vmatpush3.msra.mxu0 %v2369_v57  ;;  %v2328_v14 = vld [vmem:[%s9925_s8 + $0x28] sm:$0xff]  ;;  %v2342_v57 = vld [vmem:[%s9925_s8 + $0x98] sm:$0xff] }
 0x383   : > { %5892 = vmatprep.subr.mxu1 %v2351_v46  ;;  %5928 = vmatprep.subr.mxu0 %v2384_v61  ;;  %v2361_v46 = vld [vmem:[%s9925_s8 + $0x130] sm:$0xff]  ;;  %v2326_v61 = vld [vmem:[%s9925_s8 + $0x18] sm:$0xff] }
 0x384   : > { %5893 = vmatpush3.msra.mxu1 %v2335_v8  ;;  %5929 = vmatpush3.msra.mxu0 %v2368_v52  ;;  %v2376_v8 = vld [vmem:[%s9925_s8 + $0x1a8] sm:$0xff]  ;;  %v2325_v52 = vld [vmem:[%s9925_s8 + $0x10] sm:$0xff] }
 0x385   : > { %5894 = vmatprep.subr.mxu1 %v2350_v15  ;;  %5930 = vmatprep.subr.mxu0 %v2383_v25  ;;  %v2341_v15 = vld [vmem:[%s9925_s8 + $0x90] sm:$0xff] }
 0x386   : > { %5895 = vmatpush3.msra.mxu1 %v2334_v23  ;;  %5931 = vmatpush3.msra.mxu0 %v2367_v13  ;;  %v2340_v23 = vld [vmem:[%s9925_s8 + $0x88] sm:$0xff] }
 0x387   : > { %5896 = vmatprep.subr.mxu1 %v2349_v38  ;;  %5932 = vmatprep.subr.mxu0 %v2382_v58 }
 0x388   : > { %5897 = vmatpush3.msra.mxu1 %v2333_v63  ;;  %5933 = vmatpush3.msra.mxu0 %v2366_v3 }
 0x389   : > { %5898 = vmatprep.subr.mxu1 %v2348_v30  ;;  %5934 = vmatprep.subr.mxu0 %v2381_v50  ;;  %v2250_v30 = vand.u32 3, %v7487_v28  ;;  %v2360_v50 = vld [vmem:[%s9925_s8 + $0x128] sm:$0xff] }
 0x38a   : > { %5899 = vmatpush3.msra.mxu1 %v2332_v40  ;;  %5935 = vmatpush3.msra.mxu0 %v2365_v24  ;;  %v2324_v40 = vld [vmem:[%s9925_s8 + $0x8] sm:$0xff]  ;;  %v2375_v24 = vld [vmem:[%s9925_s8 + $0x1a0] sm:$0xff] }
 0x38b   : > { %5900 = vmatprep.subr.mxu1 %v2347_v31  ;;  %vm2252_vm2 = vcmp.ge.s32.totalorder %v2250_v30, 1  ;;  %vm2256_vm4 = vcmp.le.s32.totalorder %v2250_v30, 2 }
 0x38c   : > { %5901 = vmatpush3.msra.mxu1 %v2331_v26  ;;  %v2323_v26 = vld [vmem:[%s9925_s8] sm:$0xff] }
 0x42b   : > { %v6414_v19 = vpop.f32.mrf.mxu0 }
 0x42c   : > { %v7970_v21 = vpop.f32.mrf.mxu1 }
 0x42d   : > { %v2038_v53 = vpop.f32.mrf.mxu0 }
 0x42e   : > { %2217 = vrot.lane.b32.xlu0 %v2038_v53, %s9905_s30  ;;  %v7972_v47 = vpop.f32.mrf.mxu1  ;;  %v2346_v53 = vld [vmem:[%s9925_s8 + $0xb8] sm:$0xff] }
 0x42f   : > { %5902 = vmatprep.subr.mxu1 %v2346_v53 }
 0x43c   : > { %v6433_v12 = vpop.f32.mrf.mxu1 }
 0x43e   : > { %v6452_v41 = vpop.f32.mrf.mxu0  ;;  %v2122_v27 = vpop.f32.mrf.mxu1 }
 0x43f   : > { %2225 = vrot.lane.b32.xlu1 %v2122_v27, %s9911_s4  ;;  %v2379_v27 = vld [vmem:[%s9925_s8 + $0x1c0] sm:$0xff] }
 0x440   : > { %v2206_v35 = vpop.f32.mrf.mxu0 }
 0x441   : > { %2233 = vrot.lane.b32.xlu0 %v2206_v35, %s6870_s26  ;;  %v2345_v35 = vld [vmem:[%s9925_s8 + $0xb0] sm:$0xff] }
 0x443   : > { %2219 = vrot.lane.b32.xlu1 %v6414_v19, %s9905_s30  ;;  %v2380_v19 = vld [vmem:[%s9925_s8 + $0x1c8] sm:$0xff] }
 0x444   : > { %5936 = vmatprep.subr.mxu0 %v2380_v19  ;;  %v2359_v19 = vld [vmem:[%s9925_s8 + $0x120] sm:$0xff] }
 0x445   : > { %2227 = vrot.lane.b32.xlu0 %v6433_v12, %s9911_s4  ;;  %v2364_v12 = vld [vmem:[%s9925_s8 + $0x148] sm:$0xff] }
 0x446   : > { %5937 = vmatpush3.msra.mxu0 %v2364_v12 }
 0x447   : > { %2235 = vrot.lane.b32.xlu1 %v6452_v41, %s6870_s26  ;;  %v2330_v41 = vld [vmem:[%s9925_s8 + $0x38] sm:$0xff]  ;;  %5938 = vmatprep.subr.mxu0 %v2379_v27  ;;  %s9930_s26 = sld [smem:[#allocation13_spill]] }
 0x448   : > { %5903 = vmatpush3.msra.mxu1 %v2330_v41  ;;  %5939 = vmatpush3.msra.mxu0 %v2363_v10  ;;  %v2374_v41 = vld [vmem:[%s9925_s8 + $0x198] sm:$0xff] }
 0x449   : > { %5904 = vmatprep.subr.mxu1 %v2345_v35  ;;  %5940 = vmatprep.subr.mxu0 %v2378_v17  ;;  %v2394_v27 = vld [vmem:[%s9925_s8 + $0x238] sm:$0xff]  ;;  %v2373_v17 = vld [vmem:[%s9925_s8 + $0x190] sm:$0xff] }
 0x44a   : > { %5905 = vmatpush3.msra.mxu1 %v2329_v32  ;;  %5941 = vmatpush3.msra.mxu0 %v2362_v55  ;;  %v2251_v32 = vand.u32 3, %v7506_v44  ;;  %v8169_v55 = vsel %vm2252_vm2, 1.0, %v7851_v60  ;;  %v2372_v44 = vld [vmem:[%s9925_s8 + $0x188] sm:$0xff] }
 0x44b   : > { %5906 = vmatprep.subr.mxu1 %v2344_v59  ;;  %5942 = vmatprep.subr.mxu0 %v2377_v62 }
 0x44c   : > { %5907 = vmatpush3.msra.mxu1 %v2328_v14  ;;  %5943 = vmatpush3.msra.mxu0 %v2361_v46  ;;  %v2357_v14 = vld [vmem:[%s9925_s8 + $0x110] sm:$0xff]  ;;  %vm2253_vm3 = vcmp.ge.s32.totalorder %v2251_v32, 1  ;;  %v2356_v46 = vld [vmem:[%s9925_s8 + $0x108] sm:$0xff]  ;;  %vm2257_vm5 = vcmp.le.s32.totalorder %v2251_v32, 2 }
 0x44d   : > { %5908 = vmatprep.subr.mxu1 %v2343_v2  ;;  %5944 = vmatprep.subr.mxu0 %v2376_v8 }
 0x44e   : > { %5909 = vmatpush3.msra.mxu1 %v2327_v42  ;;  %5945 = vmatpush3.msra.mxu0 %v2360_v50  ;;  %v2371_v42 = vld [vmem:[%s9925_s8 + $0x180] sm:$0xff] }
 0x44f   : > { %5910 = vmatprep.subr.mxu1 %v2342_v57  ;;  %5946 = vmatprep.subr.mxu0 %v2375_v24  ;;  %v2355_v57 = vld [vmem:[%s9925_s8 + $0x100] sm:$0xff] }
 0x450   : > { %5911 = vmatpush3.msra.mxu1 %v2326_v61  ;;  %5947 = vmatpush3.msra.mxu0 %v2359_v19 }
 0x451   : > { %5912 = vmatprep.subr.mxu1 %v2341_v15  ;;  %5948 = vmatprep.subr.mxu0 %v2374_v41  ;;  %v8189_v15 = vsel %vm2253_vm3, 1.0, %v7851_v60 }
 0x452   : > { %5913 = vmatpush3.msra.mxu1 %v2325_v52 }
 0x453   : > { %5914 = vmatprep.subr.mxu1 %v2340_v23 }
 0x454   : > { %5915 = vmatpush3.msra.mxu1 %v2324_v40  ;;  %v8200_v40 = vsel %vm2257_vm5, 1.0, %v7851_v60 }
 0x4a0   : > { %v2218_v25 = vpop.permute.xlu0 %2217 }
 0x4a1   : > { %v2239_v38 = vsel %vm1680_vm10, %v7972_v47, %v2218_v25  ;;  %v2339_v47 = vld [vmem:[%s9925_s8 + $0x80] sm:$0xff]  ;;  %v8195_v25 = vsel %vm2256_vm4, 1.0, %v7851_v60 }
 0x4a2   : > { %5916 = vmatprep.subr.mxu1 %v2339_v47 }
 0x4a3   : > { %5917 = vmatpush3.msra.mxu1 %v2323_v26 }
 0x4a4   : > { %6453 = vmatprep.subr.mxu1 %v2394_v27 }
 0x4b1   : > { %v2226_v13 = vpop.permute.xlu1 %2225 }
 0x4b2   : > { %v2241_v63 = vsel %vm1716_vm9, %v2239_v38, %v2226_v13 }
 0x4b3   : > { %v2234_v58 = vpop.permute.xlu0 %2233 }
 0x4b4   : > { %v2244_v3 = vsel %vm2243_vm1, %v2241_v63, %v2234_v58 }
 0x4b5   : > { %2248 = vst.msk [vmem:[#allocation3 + $0x8] sm:$0xff] %vm1881_vm0, %v2244_v3  ;;  %v2220_v31 = vpop.permute.xlu1 %2219 }
 0x4b6   : > { %v2240_v53 = vsel %vm1680_vm10, %v7970_v21, %v2220_v31  ;;  %v2358_v21 = vld [vmem:[%s9925_s8 + $0x118] sm:$0xff] }
 0x4b7   : > { %v2228_v12 = vpop.permute.xlu0 %2227  ;;  %5949 = vmatpush3.msra.mxu0 %v2358_v21 }
 0x4b8   : > { %v2242_v35 = vsel %vm1716_vm9, %v2240_v53, %v2228_v12  ;;  %5950 = vmatprep.subr.mxu0 %v2373_v17 }
 0x4b9   : > { %v2236_v10 = vpop.permute.xlu1 %2235  ;;  %5951 = vmatpush3.msra.mxu0 %v2357_v14  ;;  %v2392_v14 = vld [vmem:[%s9925_s8 + $0x228] sm:$0xff] }
 0x4ba   : > { %v2245_v59 = vsel %vm2243_vm1, %v2242_v35, %v2236_v10  ;;  %5952 = vmatprep.subr.mxu0 %v2372_v44  ;;  %v2393_v10 = vld [vmem:[%s9925_s8 + $0x230] sm:$0xff] }
 0x4bb   : > { %2249 = vst.msk [vmem:[#allocation3 + $0x10] sm:$0xff] %vm1881_vm0, %v2245_v59  ;;  %5953 = vmatpush3.msra.mxu0 %v2356_v46 }
 0x4bc   : > { %v2270_v62 = vld [vmem:[#allocation3 + $0x7] sm:$0xff]  ;;  %5954 = vmatprep.subr.mxu0 %v2371_v42 }
 0x4bd   : > { %v2272_v2 = vmul.f32 %v2270_v62, %v8169_v55  ;;  %v2264_v8 = vld [vmem:[#allocation3 + $0x4] sm:$0xff]  ;;  %5955 = vmatpush3.msra.mxu0 %v2355_v57 }
 0x4be   : > { %6479 = vmatprep.subr.mxu0 %v7851_v60  ;;  %v2266_v31 = vld [vmem:[#allocation3 + $0x5] sm:$0xff] }
 0x4bf   : > { %v6651_v61 = vpack.i.bf16 %v2264_v8, %v2272_v2  ;;  %v2260_v24 = vld [vmem:[#allocation3 + $0x3] sm:$0xff]  ;;  %v2268_v12 = vmul.f32 %v2266_v31, %v8195_v25 }
 0x4c0   : > { %v2262_v41 = vmul.f32 %v2260_v24, %v8169_v55  ;;  %v2391_v8 = vld [vmem:[%s9925_s8 + $0x220] sm:$0xff] }
 0x4c1   : > { %6652 = vrot.lane.b32.xlu0 %v6651_v61, %s9907_s28 }
 0x4c2   : > { %v2271_v52 = vld [vmem:[#allocation3 + $0xf] sm:$0xff] }
 0x4c3   : > { %v2273_v23 = vmul.f32 %v2271_v52, %v8189_v15  ;;  %v2276_v38 = vld [vmem:[#allocation3 + $0x9] sm:$0xff]  ;;  %v2283_v13 = vld [vmem:[#allocation3 + $0x14] sm:$0xff] }
 0x4c4   : > { %v2278_v63 = vmul.f32 %v2276_v38, %v8195_v25  ;;  %v2265_v3 = vld [vmem:[#allocation3 + $0xc] sm:$0xff] }
 0x4c5   : > { %v6661_v58 = vpack.i.bf16 %v2283_v13, %v2273_v23  ;;  %v2277_v50 = vld [vmem:[#allocation3 + $0x11] sm:$0xff]  ;;  %v2274_v38 = vld [vmem:[#allocation3 + $0x8] sm:$0xff] }
 0x4c6   : > { %v6656_v30 = vpack.i.bf16 %v2278_v63, %v2265_v3  ;;  %v2279_v47 = vmul.f32 %v2277_v50, %v8200_v40  ;;  %v2267_v32 = vld [vmem:[#allocation3 + $0xd] sm:$0xff]  ;;  %v2390_v3 = vld [vmem:[%s9925_s8 + $0x218] sm:$0xff] }
 0x4c7   : > { %6662 = vrot.lane.b32.xlu0 %v6661_v58, %s9907_s28  ;;  %v2261_v17 = vld [vmem:[#allocation3 + $0xb] sm:$0xff]  ;;  %v2269_v2 = vmul.f32 %v2267_v32, %v8200_v40  ;;  %v2280_v61 = vld [vmem:[#allocation3 + $0x13] sm:$0xff]  ;;  %v2285_v24 = vmul.f32 %v2267_v32, %v8195_v25 }
 0x4c8   : > { %6657 = vrot.lane.b32.xlu1 %v6656_v30, %s9907_s28  ;;  %v2281_v57 = vmul.f32 %v2261_v17, %v8169_v55  ;;  %v2282_v30 = vmul.f32 %v2280_v61, %v8189_v15 }
 0x4cc   : > { %2307 = vrot.lane.b32.xlu1 %v2279_v47, %s9907_s28  ;;  %v2389_v47 = vld [vmem:[%s9925_s8 + $0x210] sm:$0xff] }
 0x533   : > { %v6653_v26 = vpop.permute.xlu0 %6652 }
 0x534   : > { %v6655_v19 = vunpack.i.h.bf16 %v6653_v26  ;;  %v6654_v53 = vunpack.i.l.bf16 %v6653_v26  ;;  %v2275_v26 = vld [vmem:[#allocation3 + $0x10] sm:$0xff] }
 0x536   : > { %v2317_v21 = vsel %vm1881_vm0, %v2268_v12, %v6654_v53  ;;  %v2315_v35 = vsel %vm1881_vm0, %v2262_v41, %v6655_v19  ;;  %v2388_v19 = vld [vmem:[%s9925_s8 + $0x208] sm:$0xff]  ;;  %v2387_v12 = vld [vmem:[%s9925_s8 + $0x200] sm:$0xff]  ;;  %v2284_v41 = vld [vmem:[#allocation3 + $0x15] sm:$0xff]  ;;  %s6875_s8 = smov 112  }
 0x537   : > { %2472 = vmatprep.mubr.f32.mxu1 %v2317_v21  ;;  %v2286_v21 = vmul.f32 %v2284_v41, %v8200_v40  ;;  %v2985_v41 = vld [vmem:[%s9889_s9 + $0x70] sm:$0xff] }
 0x538   : > { %2473 = vmatmul.mubr.f32.vlgmr.msra.gmra.mxu1 %v2315_v35 }
 0x539   : > { %6454 = vmatpush3.msra.mxu1 %v2394_v27  ;;  %v6663_v59 = vpop.permute.xlu0 %6662  ;;  %v2263_v27 = vmul.f32 %v2261_v17, %v8189_v15 }
 0x53a   : > { %6455 = vmatprep.subr.mxu1 %v2393_v10  ;;  %v6664_v44 = vunpack.i.l.bf16 %v6663_v59  ;;  %v6658_v62 = vpop.permute.xlu1 %6657  ;;  %v6665_v52 = vunpack.i.h.bf16 %v6663_v59 }
 0x53b   : > { %6456 = vmatpush3.msra.mxu1 %v2393_v10  ;;  %v6660_v46 = vunpack.i.h.bf16 %v6658_v62  ;;  %v6659_v42 = vunpack.i.l.bf16 %v6658_v62 }
 0x53c   : > { %6457 = vmatprep.subr.mxu1 %v2392_v14  ;;  %v2318_v23 = vsel %vm1881_vm0, %v2269_v2, %v6664_v44  ;;  %v2322_v31 = vsel %vm1881_vm0, %v2282_v30, %v6665_v52 }
 0x53d   : > { %6458 = vmatpush3.msra.mxu1 %v2392_v14  ;;  %2477 = vmatprep.mubr.f32.mxu1 %v2318_v23  ;;  %v2321_v13 = vsel %vm1881_vm0, %v2281_v57, %v6659_v42  ;;  %v2316_v63 = vsel %vm1881_vm0, %v2263_v27, %v6659_v42  ;;  %v2319_v58 = vsel %vm1881_vm0, %v2274_v38, %v6660_v46  ;;  %v5523_v46 = vld [vmem:[%s9894_s14] ss:$0 sm:$0xff] }
 0x53e   : > { %6459 = vmatprep.subr.mxu1 %v2391_v8  ;;  %2547 = vmatprep.mubr.f32.mxu0 %v2321_v13  ;;  %v2308_v50 = vpop.permute.xlu1 %2307 }
 0x53f   : > { %6460 = vmatpush3.msra.mxu1 %v2391_v8  ;;  %2548 = vmatmul.mubr.f32.vlgmr.msra.gmra.mxu0 %v2319_v58  ;;  %v2320_v53 = vsel %vm1881_vm0, %v2275_v26, %v2308_v50  ;;  %v2635_v50 = vld [vmem:[%s9926_s25] sm:$0xf]  ;;  %v3002_v26 = vld [vmem:[%s9889_s9 + $0xf8] sm:$0xff] }
 0x540   : > { %2478 = vmatmul.mubr.f32.gmra.mxu1 %v2316_v63  ;;  %6461 = vmatprep.subr.mxu1 %v2390_v3 }
 0x541   : > { %2552 = vmatprep.mubr.f32.mxu0 %v2322_v31  ;;  %6462 = vmatpush3.msra.mxu1 %v2390_v3  ;;  %v5529_v31 = vld [vmem:[%s9926_s25 + $0x8] sm:$0xf] }
 0x542   : > { %6469 = vmatprep.mubr.msk.f32.mxu1 %vm1881_vm0, %v2285_v24  ;;  %6463 = vmatprep.subr.mxu1 %v2389_v47  ;;  %v5531_v24 = vld [vmem:[%s9926_s25 + $0xc] sm:$0xf] }
 0x543   : > { %6464 = vmatpush3.msra.mxu1 %v2389_v47  ;;  %2553 = vmatmul.mubr.f32.gmra.mxu0 %v2320_v53  ;;  %v5527_v47 = vld [vmem:[%s9926_s25 + $0x4] sm:$0xf]  ;;  %v3034_v53 = vld [vmem:[%s9889_s9 + $0x1f8] sm:$0xff] }
 0x544   : > { %6465 = vmatprep.subr.mxu1 %v2388_v19  ;;  %6483 = vmatprep.mubr.msk.f32.mxu0 %vm6872_vm6, %v7851_v60 }
 0x545   : > { %6466 = vmatpush3.msra.mxu1 %v2388_v19  ;;  %v2986_v19 = vld [vmem:[%s9889_s9 + $0x78] sm:$0xff] }
 0x546   : > { %6467 = vmatprep.subr.mxu1 %v2387_v12 }
 0x547   : > { %6468 = vmatpush3.msra.mxu1 %v2387_v12  ;;  %v3018_v12 = vld [vmem:[%s9889_s9 + $0x178] sm:$0xff] }
 0x548   : > { %6470 = vmatmul.mubr.msk.f32.vlgmr.msra.gmra.mxu1 %vm1881_vm0, %v2286_v21  ;;  %6472 = vmatprep.subr.mxu1 %v7851_v60  ;;  %v3033_v21 = vld [vmem:[%s9889_s9 + $0x1f0] sm:$0xff] }
 0x549   : > { %6476 = vmatprep.mubr.msk.f32.mxu1 %vm6872_vm6, %v7851_v60 }
 0x5f8   : > { %v5918_v35 = vpop.f32.mrf.mxu1 }
 0x5fa   : > { %v5919_v10 = vpop.f32.mrf.mxu1 }
 0x5fb   : > { %v5920_v44 = vadd.f32 %v5919_v10, %v5918_v35  ;;  %v3000_v35 = vld [vmem:[%s9889_s9 + $0xe8] sm:$0xff]  ;;  %v3017_v10 = vld [vmem:[%s9889_s9 + $0x170] sm:$0xff] }
 0x5fd   : > { %v2475_v61 = vadd.f32 %v5920_v44, %v5523_v46  ;;  %v3031_v44 = vld [vmem:[%s9889_s9 + $0x1e0] sm:$0xff] }
 0x5ff   : > { %v5956_v32 = vpop.f32.mrf.mxu0 }
 0x600   : > { %v5921_v17 = vpop.f32.mrf.mxu1 }
 0x601   : > { %v5957_v59 = vpop.f32.mrf.mxu0 }
 0x602   : > { %v5922_v14 = vpop.f32.mrf.mxu1  ;;  %v5958_v42 = vadd.f32 %v5957_v59, %v5956_v32  ;;  %v2984_v32 = vld [vmem:[%s9889_s9 + $0x68] sm:$0xff]  ;;  %v2999_v59 = vld [vmem:[%s9889_s9 + $0xe0] sm:$0xff] }
 0x603   : > { %v5923_v62 = vadd.f32 %v5922_v14, %v5921_v17  ;;  %v5959_v2 = vpop.f32.mrf.mxu0  ;;  %v3032_v17 = vld [vmem:[%s9889_s9 + $0x1e8] sm:$0xff] }
 0x604   : > { %v2550_v38 = vadd.f32 %v5958_v42, %v2475_v61  ;;  %v3016_v14 = vld [vmem:[%s9889_s9 + $0x168] sm:$0xff]  ;;  %v3030_v42 = vld [vmem:[%s9889_s9 + $0x1d8] sm:$0xff]  ;;  %v3029_v61 = vld [vmem:[%s9889_s9 + $0x1d0] sm:$0xff] }
 0x605   : > { %v5960_v8 = vpop.f32.mrf.mxu0  ;;  %v2480_v57 = vadd.f32 %v5923_v62, %v5523_v46  ;;  %v2983_v62 = vld [vmem:[%s9889_s9 + $0x60] sm:$0xff]  ;;  %v2998_v46 = vld [vmem:[%s9889_s9 + $0xd8] sm:$0xff] }
 0x606   : > { %v5961_v27 = vadd.f32 %v5960_v8, %v5959_v2  ;;  %v3015_v2 = vld [vmem:[%s9889_s9 + $0x160] sm:$0xff]  ;;  %v2982_v8 = vld [vmem:[%s9889_s9 + $0x58] sm:$0xff] }
 0x608   : > { %v2555_v52 = vadd.f32 %v5961_v27, %v2480_v57  ;;  %v6471_v23 = vpop.f32.mrf.mxu1  ;;  %v3014_v57 = vld [vmem:[%s9889_s9 + $0x158] sm:$0xff]  ;;  %v2997_v27 = vld [vmem:[%s9889_s9 + $0xd0] sm:$0xff] }
 0x60a   : > { %v2630_v13 = vadd.f32 %v6471_v23, %v2555_v52  ;;  %v2624_v63 = vpop.f32.mrf.mxu1  ;;  %v2981_v52 = vld [vmem:[%s9889_s9 + $0x50] sm:$0xff] }
 0x60b   : > { %v2625_v58 = vadd.f32 %v2624_v63, %v2550_v38  ;;  %v3013_v23 = vld [vmem:[%s9889_s9 + $0x150] sm:$0xff]  ;;  %v2996_v38 = vld [vmem:[%s9889_s9 + $0xc8] sm:$0xff] }
 0x60c   : > { %v8252_v3 = vmax.f32 %v2630_v13, 0.0  ;;  %v3028_v13 = vld [vmem:[%s9889_s9 + $0x1c8] sm:$0xff] }
 0x60d   : > { %v8254_v30 = vmax.f32 %v2625_v58, 0.0  ;;  %v2980_v63 = vld [vmem:[%s9889_s9 + $0x48] sm:$0xff] }
 0x60e   : > { %6473 = vmatpush3.msra.mxu1 %v8252_v3  ;;  %6480 = vmatpush3.msra.mxu0 %v8252_v3  ;;  %v3012_v58 = vld [vmem:[%s9889_s9 + $0x148] sm:$0xff] }
 0x60f   : > { %6474 = vmatprep.subr.mxu1 %v7851_v60  ;;  %6481 = vmatprep.subr.mxu0 %v7851_v60 }
 0x610   : > { %6475 = vmatpush3.msra.mxu1 %v8254_v30  ;;  %6482 = vmatpush3.msra.mxu0 %v8254_v30 }
 0x611   : > { %6477 = vmatmul.mubr.msk.f32.vlgmr.msra.gmra.mxu1 %vm1680_vm10, %v2635_v50  ;;  %6484 = vmatmul.mubr.msk.f32.vlgmr.msra.gmra.mxu0 %vm1680_vm10, %v5527_v47  ;;  %v2995_v50 = vld [vmem:[%s9889_s9 + $0xc0] sm:$0xff] }
 0x612   : > { %6486 = vmatprep.subr.mxu1 %v7851_v60  ;;  %6493 = vmatprep.subr.mxu0 %v7851_v60  ;;  %v3027_v47 = vld [vmem:[%s9889_s9 + $0x1c0] sm:$0xff] }
 0x613   : > { %6487 = vmatpush3.msra.mxu1 %v8252_v3  ;;  %6494 = vmatpush3.msra.mxu0 %v8252_v3 }
 0x614   : > { %6488 = vmatprep.subr.mxu1 %v7851_v60  ;;  %6495 = vmatprep.subr.mxu0 %v7851_v60 }
 0x615   : > { %6489 = vmatpush3.msra.mxu1 %v8254_v30  ;;  %6490 = vmatprep.mubr.msk.f32.mxu1 %vm6872_vm6, %v7851_v60 }
 0x616   : > { %6496 = vmatpush3.msra.mxu0 %v8254_v30  ;;  %6491 = vmatmul.mubr.msk.f32.vlgmr.msra.gmra.mxu1 %vm1680_vm10, %v5529_v31  ;;  %v2979_v31 = vld [vmem:[%s9889_s9 + $0x40] sm:$0xff] }
 0x617   : > { %6497 = vmatprep.mubr.msk.f32.mxu0 %vm6872_vm6, %v7851_v60  ;;  %5984 = vmatprep.subr.mxu1 %v3002_v26  ;;  %v3001_v60 = vld [vmem:[%s9889_s9 + $0xf0] sm:$0xff]  ;;  %v2994_v26 = vld [vmem:[%s9889_s9 + $0xb8] sm:$0xff] }
 0x618   : > { %6498 = vmatmul.mubr.msk.f32.vlgmr.msra.gmra.mxu0 %vm1680_vm10, %v5531_v24  ;;  %6019 = vmatprep.subr.mxu0 %v3034_v53  ;;  %v3011_v24 = vld [vmem:[%s9889_s9 + $0x140] sm:$0xff]  ;;  %v3026_v53 = vld [vmem:[%s9889_s9 + $0x1b8] sm:$0xff] }
 0x619   : > { %5985 = vmatpush3.msra.mxu1 %v2986_v19  ;;  %6020 = vmatpush3.msra.mxu0 %v3018_v12  ;;  %v2978_v19 = vld [vmem:[%s9889_s9 + $0x38] sm:$0xff] }
 0x61a   : > { %5986 = vmatprep.subr.mxu1 %v3001_v60  ;;  %6021 = vmatprep.subr.mxu0 %v3033_v21  ;;  %v2993_v60 = vld [vmem:[%s9889_s9 + $0xb0] sm:$0xff]  ;;  %v3010_v12 = vld [vmem:[%s9889_s9 + $0x138] sm:$0xff] }
 0x61b   : > { %5987 = vmatpush3.msra.mxu1 %v2985_v41  ;;  %6022 = vmatpush3.msra.mxu0 %v3017_v10  ;;  %v2977_v41 = vld [vmem:[%s9889_s9 + $0x30] sm:$0xff] }
 0x61c   : > { %5988 = vmatprep.subr.mxu1 %v3000_v35  ;;  %6023 = vmatprep.subr.mxu0 %v3032_v17  ;;  %v3025_v21 = vld [vmem:[%s9889_s9 + $0x1b0] sm:$0xff]  ;;  %v2992_v35 = vld [vmem:[%s9889_s9 + $0xa8] sm:$0xff] }
 0x61d   : > { %5989 = vmatpush3.msra.mxu1 %v2984_v32  ;;  %6024 = vmatpush3.msra.mxu0 %v3016_v14  ;;  %v3009_v10 = vld [vmem:[%s9889_s9 + $0x130] sm:$0xff]  ;;  %v3024_v32 = vld [vmem:[%s9889_s9 + $0x1a8] sm:$0xff] }
 0x61e   : > { %5990 = vmatprep.subr.mxu1 %v2999_v59  ;;  %6025 = vmatprep.subr.mxu0 %v3031_v44  ;;  %v2976_v17 = vld [vmem:[%s9889_s9 + $0x28] sm:$0xff]  ;;  %v2991_v59 = vld [vmem:[%s9889_s9 + $0xa0] sm:$0xff] }
 0x61f   : > { %5991 = vmatpush3.msra.mxu1 %v2983_v62  ;;  %6026 = vmatpush3.msra.mxu0 %v3015_v2  ;;  %v3008_v14 = vld [vmem:[%s9889_s9 + $0x128] sm:$0xff]  ;;  %v2975_v44 = vld [vmem:[%s9889_s9 + $0x20] sm:$0xff]  ;;  %v2990_v2 = vld [vmem:[%s9889_s9 + $0x98] sm:$0xff] }
 0x620   : > { %5992 = vmatprep.subr.mxu1 %v2998_v46  ;;  %6027 = vmatprep.subr.mxu0 %v3030_v42  ;;  %v3023_v62 = vld [vmem:[%s9889_s9 + $0x1a0] sm:$0xff]  ;;  %v2974_v42 = vld [vmem:[%s9889_s9 + $0x18] sm:$0xff] }
 0x621   : > { %5993 = vmatpush3.msra.mxu1 %v2982_v8  ;;  %6028 = vmatpush3.msra.mxu0 %v3014_v57  ;;  %v3007_v46 = vld [vmem:[%s9889_s9 + $0x120] sm:$0xff]  ;;  %v3022_v8 = vld [vmem:[%s9889_s9 + $0x198] sm:$0xff]  ;;  %v2989_v57 = vld [vmem:[%s9889_s9 + $0x90] sm:$0xff] }
 0x622   : > { %5994 = vmatprep.subr.mxu1 %v2997_v27  ;;  %6029 = vmatprep.subr.mxu0 %v3029_v61  ;;  %v3006_v27 = vld [vmem:[%s9889_s9 + $0x118] sm:$0xff]  ;;  %v2973_v61 = vld [vmem:[%s9889_s9 + $0x10] sm:$0xff] }
 0x623   : > { %5995 = vmatpush3.msra.mxu1 %v2981_v52  ;;  %6030 = vmatpush3.msra.mxu0 %v3013_v23  ;;  %v3021_v52 = vld [vmem:[%s9889_s9 + $0x190] sm:$0xff]  ;;  %v2988_v23 = vld [vmem:[%s9889_s9 + $0x88] sm:$0xff] }
 0x624   : > { %5996 = vmatprep.subr.mxu1 %v2996_v38  ;;  %6031 = vmatprep.subr.mxu0 %v3028_v13 }
 0x625   : > { %5997 = vmatpush3.msra.mxu1 %v2980_v63  ;;  %6032 = vmatpush3.msra.mxu0 %v3012_v58  ;;  %v3005_v63 = vld [vmem:[%s9889_s9 + $0x110] sm:$0xff]  ;;  %v2972_v58 = vld [vmem:[%s9889_s9 + $0x8] sm:$0xff] }
 0x626   : > { %5998 = vmatprep.subr.mxu1 %v2995_v50  ;;  %6033 = vmatprep.subr.mxu0 %v3027_v47  ;;  %v3020_v50 = vld [vmem:[%s9889_s9 + $0x188] sm:$0xff]  ;;  %v2987_v47 = vld [vmem:[%s9889_s9 + $0x80] sm:$0xff] }
 0x627   : > { %5999 = vmatpush3.msra.mxu1 %v2979_v31  ;;  %6034 = vmatpush3.msra.mxu0 %v3011_v24 }
 0x628   : > { %6000 = vmatprep.subr.mxu1 %v2994_v26  ;;  %6035 = vmatprep.subr.mxu0 %v3026_v53  ;;  %v3004_v26 = vld [vmem:[%s9889_s9 + $0x108] sm:$0xff]  ;;  %v3019_v53 = vld [vmem:[%s9889_s9 + $0x180] sm:$0xff] }
 0x629   : > { %6001 = vmatpush3.msra.mxu1 %v2978_v19  ;;  %6036 = vmatpush3.msra.mxu0 %v3010_v12  ;;  %v2971_v19 = vld [vmem:[%s9889_s9] sm:$0xff]  ;;  %v3066_v12 = vld [vmem:[%s9889_s9 + $0x2f8] sm:$0xff] }
 0x62a   : > { %6002 = vmatprep.subr.mxu1 %v2993_v60  ;;  %6037 = vmatprep.subr.mxu0 %v3025_v21  ;;  %v3003_v60 = vld [vmem:[%s9889_s9 + $0x100] sm:$0xff]  ;;  %v3098_v21 = vld [vmem:[%s9889_s9 + $0x3f8] sm:$0xff] }
 0x62b   : > { %6003 = vmatpush3.msra.mxu1 %v2977_v41  ;;  %6038 = vmatpush3.msra.mxu0 %v3009_v10 }
 0x62c   : > { %6004 = vmatprep.subr.mxu1 %v2992_v35  ;;  %6039 = vmatprep.subr.mxu0 %v3024_v32 }
 0x62d   : > { %6005 = vmatpush3.msra.mxu1 %v2976_v17  ;;  %6040 = vmatpush3.msra.mxu0 %v3008_v14 }
 0x62e   : > { %6006 = vmatprep.subr.mxu1 %v2991_v59  ;;  %6041 = vmatprep.subr.mxu0 %v3023_v62 }
 0x62f   : > { %6007 = vmatpush3.msra.mxu1 %v2975_v44  ;;  %6042 = vmatpush3.msra.mxu0 %v3007_v46 }
 0x630   : > { %6008 = vmatprep.subr.mxu1 %v2990_v2  ;;  %6043 = vmatprep.subr.mxu0 %v3022_v8  ;;  %v2953_v2 = vand.u32 1, %v7487_v28 }
 0x631   : > { %6009 = vmatpush3.msra.mxu1 %v2974_v42  ;;  %6044 = vmatpush3.msra.mxu0 %v3006_v27  ;;  %v8495_v42 = vld [vmem:[#allocation4] sm:$0xff] }
 0x632   : > { %6010 = vmatprep.subr.mxu1 %v2989_v57  ;;  %6045 = vmatprep.subr.mxu0 %v3021_v52  ;;  %vm2954_vm8 = vcmp.ge.s32.totalorder %v2953_v2, 1  ;;  %vm2956_vm11 = vcmp.le.s32.totalorder %v2953_v2, 0  ;;  %v3078_v2 = vld [vmem:[%s9889_s9 + $0x358] sm:$0xff] }
 0x633   : > { %6011 = vmatpush3.msra.mxu1 %v2973_v61  ;;  %6046 = vmatpush3.msra.mxu0 %v3005_v63  ;;  %v8498_v8 = vsel %vm2954_vm8, 1.0, %v8495_v42  ;;  %v8501_v57 = vsel %vm2956_vm11, 1.0, %v8495_v42  ;;  %v3050_v63 = vld [vmem:[%s9889_s9 + $0x278] sm:$0xff] }
 0x634   : > { %6012 = vmatprep.subr.mxu1 %v2988_v23  ;;  %6047 = vmatprep.subr.mxu0 %v3020_v50  ;;  %v3065_v50 = vld [vmem:[%s9889_s9 + $0x2f0] sm:$0xff] }
 0x635   : > { %6013 = vmatpush3.msra.mxu1 %v2972_v58  ;;  %6048 = vmatpush3.msra.mxu0 %v3004_v26  ;;  %v3097_v26 = vld [vmem:[%s9889_s9 + $0x3f0] sm:$0xff] }
 0x636   : > { %6014 = vmatprep.subr.mxu1 %v2987_v47  ;;  %6049 = vmatprep.subr.mxu0 %v3019_v53  ;;  %v3081_v53 = vld [vmem:[%s9889_s9 + $0x370] sm:$0xff] }
 0x637   : > { %6015 = vmatpush3.msra.mxu1 %v2971_v19  ;;  %6050 = vmatpush3.msra.mxu0 %v3003_v60  ;;  %v3064_v19 = vld [vmem:[%s9889_s9 + $0x2e8] sm:$0xff] }
 0x638   : > { %6054 = vmatprep.subr.mxu1 %v3066_v12  ;;  %6089 = vmatprep.subr.mxu0 %v3098_v21  ;;  %v3048_v12 = vld [vmem:[%s9889_s9 + $0x268] sm:$0xff]  ;;  %v3063_v21 = vld [vmem:[%s9889_s9 + $0x2e0] sm:$0xff] }
 0x6d1   : > { %v2705_v38 = vpop.f32.mrf.mxu1  ;;  %v2780_v13 = vpop.f32.mrf.mxu0 }
 0x6d2   : > { %2935 = vrot.lane.b32.xlu0 %v2780_v13, %s9911_s4  ;;  %s9929_s4 = smov 96  }
 0x6d3   : > { %v6478_v31 = vpop.f32.mrf.mxu1  ;;  %v6485_v24 = vpop.f32.mrf.mxu0 }
 0x6d4   : > { %v3082_v31 = vld [vmem:[%s9889_s9 + $0x378] sm:$0xff]  ;;  %v3049_v24 = vld [vmem:[%s9889_s9 + $0x270] sm:$0xff] }
 0x6d6   : > { %v2855_v41 = vpop.f32.mrf.mxu1 }
 0x6d7   : > { %2939 = vrot.lane.b32.xlu1 %v2855_v41, %s9927_s3  ;;  %v3096_v41 = vld [vmem:[%s9889_s9 + $0x3e8] sm:$0xff] }
 0x6d8   : > { %v2930_v35 = vpop.f32.mrf.mxu0  ;;  %v6492_v10 = vpop.f32.mrf.mxu1 }
 0x6d9   : > { %2943 = vrot.lane.b32.xlu0 %v2930_v35, %s9909_s21  ;;  %v3080_v35 = vld [vmem:[%s9889_s9 + $0x368] sm:$0xff]  ;;  %v3047_v10 = vld [vmem:[%s9889_s9 + $0x260] sm:$0xff] }
 0x6da   : > { %v6499_v32 = vpop.f32.mrf.mxu0 }
 0x6db   : > { %v3095_v32 = vld [vmem:[%s9889_s9 + $0x3e0] sm:$0xff] }
 0x744   : > { %v2936_v17 = vpop.permute.xlu0 %2935 }
 0x745   : > { %v2946_v59 = vsel %vm1716_vm9, %v2705_v38, %v2936_v17  ;;  %v3062_v17 = vld [vmem:[%s9889_s9 + $0x2d8] sm:$0xff] }
 0x749   : > { %v2940_v14 = vpop.permute.xlu1 %2939 }
 0x74a   : > { %v2947_v44 = vsel %vm1881_vm0, %v2946_v59, %v2940_v14  ;;  %v3079_v59 = vld [vmem:[%s9889_s9 + $0x360] sm:$0xff]  ;;  %v3046_v14 = vld [vmem:[%s9889_s9 + $0x258] sm:$0xff] }
 0x74b   : > { %v2944_v62 = vpop.permute.xlu0 %2943 }
 0x74c   : > { %v2949_v46 = vsel %vm2948_vm7, %v2947_v44, %v2944_v62  ;;  %v3094_v44 = vld [vmem:[%s9889_s9 + $0x3d8] sm:$0xff]  ;;  %v3061_v62 = vld [vmem:[%s9889_s9 + $0x2d0] sm:$0xff] }
 0x74d   : > { %2952 = vst [vmem:[#allocation4 + $0x8] sm:$0xf] %v2949_v46  ;;  %v3045_v46 = vld [vmem:[%s9889_s9 + $0x250] sm:$0xff] }
 0x754   : > { %v2960_v27 = vld [vmem:[#allocation4 + $0x6] sm:$0xf]  ;;  %v2968_v60 = vld [vmem:[#allocation4 + $0xa] sm:$0xf] }
 0x755   : > { %v2958_v61 = vld [vmem:[#allocation4 + $0x5] sm:$0xf]  ;;  %3186 = vmatprep.mubr.f32.mxu1 %v2960_v27  ;;  %v8509_v58 = vld [vmem:[#allocation4 + $0x9] sm:$0xf]  ;;  %v3093_v27 = vld [vmem:[%s9889_s9 + $0x3d0] sm:$0xff] }
 0x756   : > { %v2961_v52 = vld [vmem:[#allocation4 + $0x7] sm:$0xf]  ;;  %v2959_v23 = vmul.f32 %v2958_v61, %v8498_v8  ;;  %v2966_v47 = vmul.f32 %v8509_v58, %v8501_v57 }
 0x757   : > { %v2962_v38 = vmul.f32 %v2961_v52, %v8501_v57  ;;  %v2963_v13 = vmul.f32 %v2961_v52, %v8498_v8  ;;  %v3060_v61 = vld [vmem:[%s9889_s9 + $0x2c8] sm:$0xff]  ;;  %v3077_v52 = vld [vmem:[%s9889_s9 + $0x350] sm:$0xff] }
 0x758   : > { %3187 = vmatmul.mubr.f32.vlgmr.msra.gmra.mxu1 %v2959_v23  ;;  %v3044_v23 = vld [vmem:[%s9889_s9 + $0x248] sm:$0xff] }
 0x759   : > { %3256 = vmatprep.mubr.f32.mxu0 %v2963_v13  ;;  %6055 = vmatpush3.msra.mxu1 %v3050_v63  ;;  %v3059_v13 = vld [vmem:[%s9889_s9 + $0x2c0] sm:$0xff]  ;;  %v3076_v63 = vld [vmem:[%s9889_s9 + $0x348] sm:$0xff] }
 0x75a   : > { %3257 = vmatmul.mubr.f32.vlgmr.msra.gmra.mxu0 %v2962_v38  ;;  %6056 = vmatprep.subr.mxu1 %v3065_v50  ;;  %v3092_v38 = vld [vmem:[%s9889_s9 + $0x3c8] sm:$0xff]  ;;  %v3043_v50 = vld [vmem:[%s9889_s9 + $0x240] sm:$0xff] }
 0x75b   : > { %3326 = vmatprep.mubr.f32.mxu1 %v2966_v47  ;;  %6090 = vmatpush3.msra.mxu0 %v3082_v31  ;;  %v3091_v47 = vld [vmem:[%s9889_s9 + $0x3c0] sm:$0xff]  ;;  %v3058_v31 = vld [vmem:[%s9889_s9 + $0x2b8] sm:$0xff] }
 0x75c   : > { %6057 = vmatpush3.msra.mxu1 %v3049_v24  ;;  %6091 = vmatprep.subr.mxu0 %v3097_v26  ;;  %v3075_v24 = vld [vmem:[%s9889_s9 + $0x340] sm:$0xff]  ;;  %v3042_v26 = vld [vmem:[%s9889_s9 + $0x238] sm:$0xff] }
 0x75d   : > { %3396 = vmatprep.mubr.f32.mxu0 %v2968_v60  ;;  %6058 = vmatprep.subr.mxu1 %v3064_v19  ;;  %v3090_v19 = vld [vmem:[%s9889_s9 + $0x3b8] sm:$0xff] }
 0x75e   : > { %6092 = vmatpush3.msra.mxu0 %v3081_v53  ;;  %6059 = vmatpush3.msra.mxu1 %v3048_v12  ;;  %v3057_v53 = vld [vmem:[%s9889_s9 + $0x2b0] sm:$0xff]  ;;  %v3074_v60 = vld [vmem:[%s9889_s9 + $0x338] sm:$0xff] }
 0x75f   : > { %6093 = vmatprep.subr.mxu0 %v3096_v41  ;;  %6060 = vmatprep.subr.mxu1 %v3063_v21  ;;  %v3041_v12 = vld [vmem:[%s9889_s9 + $0x230] sm:$0xff]  ;;  %v3056_v21 = vld [vmem:[%s9889_s9 + $0x2a8] sm:$0xff] }
 0x760   : > { %6094 = vmatpush3.msra.mxu0 %v3080_v35  ;;  %6061 = vmatpush3.msra.mxu1 %v3047_v10  ;;  %v3089_v41 = vld [vmem:[%s9889_s9 + $0x3b0] sm:$0xff]  ;;  %v3040_v10 = vld [vmem:[%s9889_s9 + $0x228] sm:$0xff] }
 0x761   : > { %6095 = vmatprep.subr.mxu0 %v3095_v32  ;;  %6062 = vmatprep.subr.mxu1 %v3062_v17  ;;  %v3073_v35 = vld [vmem:[%s9889_s9 + $0x330] sm:$0xff]  ;;  %v3088_v32 = vld [vmem:[%s9889_s9 + $0x3a8] sm:$0xff]  ;;  %v3055_v17 = vld [vmem:[%s9889_s9 + $0x2a0] sm:$0xff] }
 0x762   : > { %6096 = vmatpush3.msra.mxu0 %v3079_v59  ;;  %6063 = vmatpush3.msra.mxu1 %v3046_v14  ;;  %v3072_v59 = vld [vmem:[%s9889_s9 + $0x328] sm:$0xff]  ;;  %v3039_v14 = vld [vmem:[%s9889_s9 + $0x220] sm:$0xff] }
 0x763   : > { %6097 = vmatprep.subr.mxu0 %v3094_v44  ;;  %6064 = vmatprep.subr.mxu1 %v3061_v62  ;;  %v3087_v44 = vld [vmem:[%s9889_s9 + $0x3a0] sm:$0xff]  ;;  %v3054_v62 = vld [vmem:[%s9889_s9 + $0x298] sm:$0xff] }
 0x764   : > { %6098 = vmatpush3.msra.mxu0 %v3078_v2  ;;  %6065 = vmatpush3.msra.mxu1 %v3045_v46  ;;  %v3071_v2 = vld [vmem:[%s9889_s9 + $0x320] sm:$0xff]  ;;  %v3038_v46 = vld [vmem:[%s9889_s9 + $0x218] sm:$0xff] }
 0x765   : > { %6099 = vmatprep.subr.mxu0 %v3093_v27  ;;  %6066 = vmatprep.subr.mxu1 %v3060_v61  ;;  %v3086_v27 = vld [vmem:[%s9889_s9 + $0x398] sm:$0xff]  ;;  %v3053_v61 = vld [vmem:[%s9889_s9 + $0x290] sm:$0xff] }
 0x766   : > { %6100 = vmatpush3.msra.mxu0 %v3077_v52  ;;  %6067 = vmatpush3.msra.mxu1 %v3044_v23  ;;  %v3070_v52 = vld [vmem:[%s9889_s9 + $0x318] sm:$0xff]  ;;  %v3037_v23 = vld [vmem:[%s9889_s9 + $0x210] sm:$0xff] }
 0x767   : > { %6101 = vmatprep.subr.mxu0 %v3092_v38  ;;  %6068 = vmatprep.subr.mxu1 %v3059_v13  ;;  %v3085_v38 = vld [vmem:[%s9889_s9 + $0x390] sm:$0xff]  ;;  %v3052_v13 = vld [vmem:[%s9889_s9 + $0x288] sm:$0xff] }
 0x768   : > { %6102 = vmatpush3.msra.mxu0 %v3076_v63  ;;  %6069 = vmatpush3.msra.mxu1 %v3043_v50  ;;  %v3069_v63 = vld [vmem:[%s9889_s9 + $0x310] sm:$0xff]  ;;  %v3036_v50 = vld [vmem:[%s9889_s9 + $0x208] sm:$0xff] }
 0x769   : > { %6103 = vmatprep.subr.mxu0 %v3091_v47  ;;  %6070 = vmatprep.subr.mxu1 %v3058_v31  ;;  %v3084_v47 = vld [vmem:[%s9889_s9 + $0x388] sm:$0xff]  ;;  %v3051_v31 = vld [vmem:[%s9889_s9 + $0x280] sm:$0xff] }
 0x76a   : > { %6104 = vmatpush3.msra.mxu0 %v3075_v24  ;;  %6071 = vmatpush3.msra.mxu1 %v3042_v26  ;;  %v3068_v24 = vld [vmem:[%s9889_s9 + $0x308] sm:$0xff]  ;;  %v3035_v26 = vld [vmem:[%s9889_s9 + $0x200] sm:$0xff] }
 0x76b   : > { %6105 = vmatprep.subr.mxu0 %v3090_v19  ;;  %6072 = vmatprep.subr.mxu1 %v3057_v53  ;;  %v3083_v19 = vld [vmem:[%s9889_s9 + $0x380] sm:$0xff] }
 0x76c   : > { %6106 = vmatpush3.msra.mxu0 %v3074_v60  ;;  %6073 = vmatpush3.msra.mxu1 %v3041_v12  ;;  %v3067_v53 = vld [vmem:[%s9889_s9 + $0x300] sm:$0xff]  ;;  %v2967_v60 = vmul.f32 %v8509_v58, %v8498_v8  ;;  %v2964_v12 = vld [vmem:[#allocation4 + $0x8] sm:$0xf] }
 0x76d   : > { %6107 = vmatprep.subr.mxu0 %v3089_v41  ;;  %6074 = vmatprep.subr.mxu1 %v3056_v21  ;;  %v3114_v41 = vld [vmem:[%s9889_s9 + $0x478] sm:$0xff]  ;;  %v3113_v21 = vld [vmem:[%s9889_s9 + $0x470] sm:$0xff]  ;;  %v3112_v58 = vld [vmem:[%s9889_s9 + $0x468] sm:$0xff] }
 0x76e   : > { %6108 = vmatpush3.msra.mxu0 %v3073_v35  ;;  %6075 = vmatpush3.msra.mxu1 %v3040_v10  ;;  %v3111_v35 = vld [vmem:[%s9889_s9 + $0x460] sm:$0xff]  ;;  %v3110_v10 = vld [vmem:[%s9889_s9 + $0x458] sm:$0xff] }
 0x76f   : > { %6109 = vmatprep.subr.mxu0 %v3088_v32  ;;  %6076 = vmatprep.subr.mxu1 %v3055_v17  ;;  %v3109_v32 = vld [vmem:[%s9889_s9 + $0x450] sm:$0xff]  ;;  %v3108_v17 = vld [vmem:[%s9889_s9 + $0x448] sm:$0xff] }
 0x770   : > { %6110 = vmatpush3.msra.mxu0 %v3072_v59  ;;  %6077 = vmatpush3.msra.mxu1 %v3039_v14  ;;  %v3107_v59 = vld [vmem:[%s9889_s9 + $0x440] sm:$0xff]  ;;  %v3106_v14 = vld [vmem:[%s9889_s9 + $0x438] sm:$0xff] }
 0x771   : > { %6111 = vmatprep.subr.mxu0 %v3087_v44  ;;  %6078 = vmatprep.subr.mxu1 %v3054_v62  ;;  %v3105_v44 = vld [vmem:[%s9889_s9 + $0x430] sm:$0xff]  ;;  %v3104_v62 = vld [vmem:[%s9889_s9 + $0x428] sm:$0xff] }
 0x772   : > { %6112 = vmatpush3.msra.mxu0 %v3071_v2  ;;  %6079 = vmatpush3.msra.mxu1 %v3038_v46  ;;  %v3103_v2 = vld [vmem:[%s9889_s9 + $0x420] sm:$0xff]  ;;  %v3102_v46 = vld [vmem:[%s9889_s9 + $0x418] sm:$0xff] }
 0x773   : > { %6113 = vmatprep.subr.mxu0 %v3086_v27  ;;  %6080 = vmatprep.subr.mxu1 %v3053_v61  ;;  %v3101_v27 = vld [vmem:[%s9889_s9 + $0x410] sm:$0xff]  ;;  %v3100_v61 = vld [vmem:[%s9889_s9 + $0x408] sm:$0xff] }
 0x774   : > { %6114 = vmatpush3.msra.mxu0 %v3070_v52  ;;  %6081 = vmatpush3.msra.mxu1 %v3037_v23  ;;  %v2969_v52 = vld [vmem:[#allocation4 + $0xb] sm:$0xf]  ;;  %v3099_v23 = vld [vmem:[%s9889_s9 + $0x400] sm:$0xff] }
 0x775   : > { %6115 = vmatprep.subr.mxu0 %v3085_v38  ;;  %6082 = vmatprep.subr.mxu1 %v3052_v13  ;;  %v2970_v38 = vmul.f32 %v2969_v52, %v8501_v57  ;;  %v3555_v13 = vld [vmem:[%s9890_s10 + $0x118] sm:$0xff]  ;;  %v3524_v52 = vld [vmem:[%s9890_s10 + $0x20] sm:$0xff] }
 0x776   : > { %6116 = vmatpush3.msra.mxu0 %v3069_v63  ;;  %6083 = vmatpush3.msra.mxu1 %v3036_v50  ;;  %v3554_v63 = vld [vmem:[%s9890_s10 + $0x110] sm:$0xff]  ;;  %v3553_v50 = vld [vmem:[%s9890_s10 + $0x108] sm:$0xff] }
 0x777   : > { %6117 = vmatprep.subr.mxu0 %v3084_v47  ;;  %6084 = vmatprep.subr.mxu1 %v3051_v31  ;;  %v3552_v47 = vld [vmem:[%s9890_s10 + $0x100] sm:$0xff]  ;;  %v3551_v31 = vld [vmem:[%s9890_s10 + $0xf8] sm:$0xff] }
 0x778   : > { %6118 = vmatpush3.msra.mxu0 %v3068_v24  ;;  %6085 = vmatpush3.msra.mxu1 %v3035_v26  ;;  %v3535_v24 = vld [vmem:[%s9890_s10 + $0x78] sm:$0xff]  ;;  %v3550_v26 = vld [vmem:[%s9890_s10 + $0xf0] sm:$0xff] }
 0x779   : > { %6119 = vmatprep.subr.mxu0 %v3083_v19  ;;  %3327 = vmatmul.mubr.f32.vlgmr.msra.gmra.mxu1 %v2964_v12  ;;  %v3534_v19 = vld [vmem:[%s9890_s10 + $0x70] sm:$0xff]  ;;  %v3532_v12 = vld [vmem:[%s9890_s10 + $0x60] sm:$0xff] }
 0x77a   : > { %6120 = vmatpush3.msra.mxu0 %v3067_v53  ;;  %6500 = vmatprep.subr.mxu1 %v8495_v42  ;;  %v3533_v53 = vld [vmem:[%s9890_s10 + $0x68] sm:$0xff] }
 0x77b   : > { %3397 = vmatmul.mubr.f32.vlgmr.msra.gmra.mxu0 %v2967_v60  ;;  %6501 = vmatpush3.msra.mxu1 %v3114_v41  ;;  %v3548_v60 = vld [vmem:[%s9890_s10 + $0xe0] sm:$0xff]  ;;  %v3547_v41 = vld [vmem:[%s9890_s10 + $0xd8] sm:$0xff] }
 0x77c   : > { %6532 = vmatprep.mubr.msk.f32.mxu1 %vm6872_vm6, %v8495_v42  ;;  %6502 = vmatprep.subr.mxu1 %v8495_v42 }
 0x77d   : > { %6503 = vmatpush3.msra.mxu1 %v3113_v21  ;;  %6141 = vmatprep.subr.mxu0 %v3551_v31  ;;  %v3531_v21 = vld [vmem:[%s9890_s10 + $0x58] sm:$0xff] }
 0x77e   : > { %6504 = vmatprep.subr.mxu1 %v8495_v42  ;;  %6142 = vmatpush3.msra.mxu0 %v3535_v24 }
 0x77f   : > { %6505 = vmatpush3.msra.mxu1 %v3112_v58  ;;  %6143 = vmatprep.subr.mxu0 %v3550_v26  ;;  %v3546_v58 = vld [vmem:[%s9890_s10 + $0xd0] sm:$0xff] }
 0x780   : > { %6506 = vmatprep.subr.mxu1 %v8495_v42  ;;  %6144 = vmatpush3.msra.mxu0 %v3534_v19 }
 0x781   : > { %6507 = vmatpush3.msra.mxu1 %v3111_v35  ;;  %v3530_v35 = vld [vmem:[%s9890_s10 + $0x50] sm:$0xff] }
 0x782   : > { %6508 = vmatprep.subr.mxu1 %v8495_v42 }
 0x783   : > { %6509 = vmatpush3.msra.mxu1 %v3110_v10  ;;  %v3545_v10 = vld [vmem:[%s9890_s10 + $0xc8] sm:$0xff] }
 0x784   : > { %6510 = vmatprep.subr.mxu1 %v8495_v42 }
 0x785   : > { %6511 = vmatpush3.msra.mxu1 %v3109_v32  ;;  %v3529_v32 = vld [vmem:[%s9890_s10 + $0x48] sm:$0xff] }
 0x786   : > { %6512 = vmatprep.subr.mxu1 %v8495_v42 }
 0x787   : > { %6513 = vmatpush3.msra.mxu1 %v3108_v17  ;;  %v3544_v17 = vld [vmem:[%s9890_s10 + $0xc0] sm:$0xff] }
 0x788   : > { %6514 = vmatprep.subr.mxu1 %v8495_v42 }
 0x789   : > { %6515 = vmatpush3.msra.mxu1 %v3107_v59  ;;  %v3528_v59 = vld [vmem:[%s9890_s10 + $0x40] sm:$0xff] }
 0x78a   : > { %6516 = vmatprep.subr.mxu1 %v8495_v42 }
 0x78b   : > { %6517 = vmatpush3.msra.mxu1 %v3106_v14  ;;  %v3543_v14 = vld [vmem:[%s9890_s10 + $0xb8] sm:$0xff] }
 0x78c   : > { %6518 = vmatprep.subr.mxu1 %v8495_v42 }
 0x78d   : > { %6519 = vmatpush3.msra.mxu1 %v3105_v44  ;;  %v3527_v44 = vld [vmem:[%s9890_s10 + $0x38] sm:$0xff] }
 0x78e   : > { %6520 = vmatprep.subr.mxu1 %v8495_v42 }
 0x78f   : > { %6521 = vmatpush3.msra.mxu1 %v3104_v62  ;;  %v3542_v62 = vld [vmem:[%s9890_s10 + $0xb0] sm:$0xff] }
 0x790   : > { %6522 = vmatprep.subr.mxu1 %v8495_v42 }
 0x791   : > { %6523 = vmatpush3.msra.mxu1 %v3103_v2  ;;  %v3526_v2 = vld [vmem:[%s9890_s10 + $0x30] sm:$0xff] }
 0x792   : > { %6524 = vmatprep.subr.mxu1 %v8495_v42 }
 0x793   : > { %6525 = vmatpush3.msra.mxu1 %v3102_v46  ;;  %v3541_v46 = vld [vmem:[%s9890_s10 + $0xa8] sm:$0xff] }
 0x794   : > { %6526 = vmatprep.subr.mxu1 %v8495_v42 }
 0x795   : > { %6527 = vmatpush3.msra.mxu1 %v3101_v27  ;;  %v3525_v27 = vld [vmem:[%s9890_s10 + $0x28] sm:$0xff] }
 0x796   : > { %6528 = vmatprep.subr.mxu1 %v8495_v42 }
 0x797   : > { %6529 = vmatpush3.msra.mxu1 %v3100_v61  ;;  %v3540_v61 = vld [vmem:[%s9890_s10 + $0xa0] sm:$0xff] }
 0x798   : > { %6530 = vmatprep.subr.mxu1 %v8495_v42 }
 0x799   : > { %6531 = vmatpush3.msra.mxu1 %v3099_v23 }
 0x79a   : > { %6533 = vmatmul.mubr.f32.vlgmr.msra.gmra.mxu1 %v2970_v38  ;;  %6535 = vmatprep.subr.mxu1 %v8495_v42 }
 0x79b   : > { %6543 = vmatprep.mubr.msk.f32.mxu1 %vm6872_vm6, %v8495_v42  ;;  %6536 = vmatpush3.msra.mxu1 %v3555_v13 }
 0x79c   : > { %6537 = vmatprep.subr.mxu1 %v8495_v42 }
 0x79d   : > { %6538 = vmatpush3.msra.mxu1 %v3554_v63 }
 0x79e   : > { %6539 = vmatprep.subr.mxu1 %v8495_v42 }
 0x79f   : > { %6540 = vmatpush3.msra.mxu1 %v3553_v50 }
 0x7a0   : > { %6541 = vmatprep.subr.mxu1 %v8495_v42  ;;  %v3549_v42 = vld [vmem:[%s9890_s10 + $0xe8] sm:$0xff] }
 0x7a1   : > { %6542 = vmatpush3.msra.mxu1 %v3552_v47  ;;  %6145 = vmatprep.subr.mxu0 %v3549_v42  ;;  %v5533_v47 = vld [vmem:[%s9895_s15] ss:$0 sm:$0xff] }
 0x7a2   : > { %6146 = vmatpush3.msra.mxu0 %v3533_v53 }
 0x7a3   : > { %6147 = vmatprep.subr.mxu0 %v3548_v60 }
 0x7a4   : > { %6148 = vmatpush3.msra.mxu0 %v3532_v12 }
 0x7a5   : > { %6149 = vmatprep.subr.mxu0 %v3547_v41 }
 0x7a6   : > { %6150 = vmatpush3.msra.mxu0 %v3531_v21 }
 0x7a7   : > { %6151 = vmatprep.subr.mxu0 %v3546_v58 }
 0x7a8   : > { %6152 = vmatpush3.msra.mxu0 %v3530_v35 }
 0x7a9   : > { %6153 = vmatprep.subr.mxu0 %v3545_v10 }
 0x7aa   : > { %6154 = vmatpush3.msra.mxu0 %v3529_v32 }
 0x7ab   : > { %6155 = vmatprep.subr.mxu0 %v3544_v17 }
 0x7ac   : > { %6156 = vmatpush3.msra.mxu0 %v3528_v59  ;;  %v3539_v59 = vld [vmem:[%s9890_s10 + $0x98] sm:$0xff] }
 0x7ad   : > { %6157 = vmatprep.subr.mxu0 %v3543_v14  ;;  %v3523_v14 = vld [vmem:[%s9890_s10 + $0x18] sm:$0xff] }
 0x7ae   : > { %6158 = vmatpush3.msra.mxu0 %v3527_v44  ;;  %v3538_v44 = vld [vmem:[%s9890_s10 + $0x90] sm:$0xff] }
 0x7af   : > { %6159 = vmatprep.subr.mxu0 %v3542_v62  ;;  %v3522_v62 = vld [vmem:[%s9890_s10 + $0x10] sm:$0xff] }
 0x7b0   : > { %6160 = vmatpush3.msra.mxu0 %v3526_v2  ;;  %v3537_v2 = vld [vmem:[%s9890_s10 + $0x88] sm:$0xff] }
 0x7b1   : > { %6161 = vmatprep.subr.mxu0 %v3541_v46  ;;  %v3521_v46 = vld [vmem:[%s9890_s10 + $0x8] sm:$0xff] }
 0x7b2   : > { %6162 = vmatpush3.msra.mxu0 %v3525_v27  ;;  %v3536_v27 = vld [vmem:[%s9890_s10 + $0x80] sm:$0xff] }
 0x7b3   : > { %6163 = vmatprep.subr.mxu0 %v3540_v61  ;;  %v3520_v61 = vld [vmem:[%s9890_s10] sm:$0xff] }
 0x7b4   : > { %6164 = vmatpush3.msra.mxu0 %v3524_v52 }
 0x7b5   : > { %6165 = vmatprep.subr.mxu0 %v3539_v59 }
 0x7b6   : > { %6166 = vmatpush3.msra.mxu0 %v3523_v14 }
 0x7b7   : > { %6167 = vmatprep.subr.mxu0 %v3538_v44 }
 0x7b8   : > { %6168 = vmatpush3.msra.mxu0 %v3522_v62 }
 0x7b9   : > { %6169 = vmatprep.subr.mxu0 %v3537_v2 }
 0x7ba   : > { %6170 = vmatpush3.msra.mxu0 %v3521_v46 }
 0x7bb   : > { %6171 = vmatprep.subr.mxu0 %v3536_v27 }
 0x7bc   : > { %6172 = vmatpush3.msra.mxu0 %v3520_v61 }
 0x818   : > { %v6016_v23 = vpop.f32.mrf.mxu1 }
 0x81a   : > { %v6051_v38 = vpop.f32.mrf.mxu0  ;;  %v6017_v13 = vpop.f32.mrf.mxu1 }
 0x81b   : > { %v6018_v50 = vadd.f32 %v6017_v13, %v6016_v23 }
 0x81c   : > { %v6052_v31 = vpop.f32.mrf.mxu0 }
 0x81d   : > { %v3189_v19 = vadd.f32 %v6018_v50, %v5533_v47  ;;  %v6053_v42 = vadd.f32 %v6052_v31, %v6051_v38 }
 0x81f   : > { %v3259_v12 = vadd.f32 %v6053_v42, %v3189_v19 }
 0x839   : > { %v6086_v63 = vpop.f32.mrf.mxu1 }
 0x83b   : > { %v6121_v24 = vpop.f32.mrf.mxu0  ;;  %v6087_v26 = vpop.f32.mrf.mxu1 }
 0x83c   : > { %v6088_v53 = vadd.f32 %v6087_v26, %v6086_v63 }
 0x83d   : > { %v6122_v60 = vpop.f32.mrf.mxu0 }
 0x83e   : > { %v3329_v41 = vadd.f32 %v6088_v53, %v3259_v12  ;;  %v6123_v21 = vadd.f32 %v6122_v60, %v6121_v24 }
 0x840   : > { %v3399_v58 = vadd.f32 %v6123_v21, %v3329_v41 }
 0x85a   : > { %v3468_v35 = vpop.f32.mrf.mxu1 }
 0x85b   : > { %v3469_v10 = vadd.f32 %v3468_v35, %v3399_v58 }
 0x85c   : > { %v6534_v32 = vpop.f32.mrf.mxu1 }
 0x85d   : > { %v3472_v17 = vmax.f32 %v3469_v10, 0.0 }
 0x85f   : > { %3476 = vst.msk [vmem:[#allocation5 + $0x8] sm:$0xf] %vm3475_vm13, %v3472_v17 }
 0x866   : > { %v3488_v52 = vld [vmem:[#allocation5 + $0xb] sm:$0xf]  ;;  %v3480_v23 = vld [vmem:[#allocation5 + $0x7] sm:$0xf] }
 0x867   : > { %v3484_v38 = vld [vmem:[#allocation5 + $0x9] sm:$0xf]  ;;  %v3489_v13 = vmul.f32 %v3488_v52, %v8501_v57  ;;  %v3481_v63 = vmul.f32 %v3480_v23, %v8501_v57  ;;  %v3482_v19 = vmul.f32 %v3480_v23, %v8498_v8  ;;  %v3477_v60 = vld [vmem:[#allocation5 + $0x5] sm:$0xf] }
 0x868   : > { %v3486_v50 = vmul.f32 %v3484_v38, %v8498_v8  ;;  %v3485_v47 = vmul.f32 %v3484_v38, %v8501_v57  ;;  %v3479_v31 = vld [vmem:[#allocation5 + $0x6] sm:$0xf]  ;;  %v3487_v42 = vld [vmem:[#allocation5 + $0xa] sm:$0xf]  ;;  %v3478_v58 = vmul.f32 %v3477_v60, %v8498_v8 }
 0x869   : > { %6544 = vmatmul.mubr.msk.f32.vlgmr.msra.gmra.mxu1 %vm1716_vm9, %v3489_v13  ;;  %v6676_v53 = vpack.i.bf16 %v3482_v19, %v3487_v42  ;;  %v3483_v32 = vld [vmem:[#allocation5 + $0x8] sm:$0xf] }
 0x86a   : > { %v6671_v24 = vpack.i.bf16 %v3481_v63, %v3486_v50  ;;  %v6666_v26 = vpack.i.bf16 %v3479_v31, %v3485_v47  ;;  %v5534_v38 = vld [vmem:[%s9896_s16] ss:$0 sm:$0xff] }
 0x86b   : > { %v3720_v50 = vld [vmem:[%s9930_s26] sm:$0xff] }
 0x86c   : > { %6672 = vrot.lane.b32.xlu0 %v6671_v24, %s9927_s3  ;;  %6667 = vrot.lane.b32.xlu1 %v6666_v26, %s9928_s29 }
 0x870   : > { %6677 = vrot.lane.b32.xlu1 %v6676_v53, %s9929_s4 }
 0x8de   : > { %v6673_v12 = vpop.permute.xlu0 %6672  ;;  %v6668_v41 = vpop.permute.xlu1 %6667 }
 0x8df   : > { %v6670_v21 = vunpack.i.h.bf16 %v6668_v41  ;;  %v6669_v57 = vunpack.i.l.bf16 %v6668_v41  ;;  %v6675_v35 = vunpack.i.h.bf16 %v6673_v12  ;;  %v6674_v10 = vunpack.i.l.bf16 %v6673_v12  ;;  %v3721_v41 = vld [vmem:[%s9930_s26 + $0x8] sm:$0xff] }
 0x8e1   : > { %v3514_v17 = vsel %vm1716_vm9, %v3478_v58, %v6670_v21  ;;  %v3517_v59 = vsel %vm1716_vm9, %v3483_v32, %v6669_v57  ;;  %v3943_v21 = vld [vmem:[%s9891_s11 + $0x1f8] sm:$0xff]  ;;  %v3910_v57 = vld [vmem:[%s9891_s11 + $0xf0] sm:$0xff]  ;;  %v3909_v32 = vld [vmem:[%s9891_s11 + $0xe8] sm:$0xff] }
 0x8e2   : > { %v6678_v14 = vpop.permute.xlu1 %6677  ;;  %v3518_v2 = vsel %vm1881_vm0, %v3517_v59, %v6674_v10  ;;  %v3515_v46 = vsel %vm1881_vm0, %v3514_v17, %v6675_v35  ;;  %6223 = vmatprep.subr.mxu1 %v3943_v21  ;;  %v3927_v58 = vld [vmem:[%s9891_s11 + $0x178] sm:$0xff]  ;;  %v3894_v35 = vld [vmem:[%s9891_s11 + $0x70] sm:$0xff]  ;;  %v3893_v59 = vld [vmem:[%s9891_s11 + $0x68] sm:$0xff] }
 0x8e3   : > { %v6680_v44 = vunpack.i.h.bf16 %v6678_v14  ;;  %v6679_v62 = vunpack.i.l.bf16 %v6678_v14  ;;  %6224 = vmatpush3.msra.mxu1 %v3927_v58  ;;  %v3942_v10 = vld [vmem:[%s9891_s11 + $0x1f0] sm:$0xff]  ;;  %v3941_v14 = vld [vmem:[%s9891_s11 + $0x1e8] sm:$0xff] }
 0x8e4   : > { %v3926_v17 = vld [vmem:[%s9891_s11 + $0x170] sm:$0xff]  ;;  %6225 = vmatprep.subr.mxu1 %v3942_v10  ;;  %v3901_v10 = vld [vmem:[%s9891_s11 + $0xa8] sm:$0xff] }
 0x8e5   : > { %v3519_v27 = vsel %vm2948_vm7, %v3518_v2, %v6679_v62  ;;  %v3516_v61 = vsel %vm2948_vm7, %v3515_v46, %v6680_v44  ;;  %6226 = vmatpush3.msra.mxu1 %v3926_v17  ;;  %v3908_v44 = vld [vmem:[%s9891_s11 + $0xe0] sm:$0xff]  ;;  %v3925_v62 = vld [vmem:[%s9891_s11 + $0x168] sm:$0xff]  ;;  %v3902_v21 = vld [vmem:[%s9891_s11 + $0xb0] sm:$0xff] }
 0x8e6   : > { %3630 = vmatprep.mubr.f32.mxu0 %v3519_v27  ;;  %v3940_v2 = vld [vmem:[%s9891_s11 + $0x1e0] sm:$0xff]  ;;  %6227 = vmatprep.subr.mxu1 %v3941_v14  ;;  %v3886_v58 = vld [vmem:[%s9891_s11 + $0x30] sm:$0xff]  ;;  %v3885_v17 = vld [vmem:[%s9891_s11 + $0x28] sm:$0xff] }
 0x8e7   : > { %3631 = vmatmul.mubr.f32.vlgmr.msra.gmra.mxu0 %v3516_v61  ;;  %v3892_v46 = vld [vmem:[%s9891_s11 + $0x60] sm:$0xff]  ;;  %6228 = vmatpush3.msra.mxu1 %v3925_v62  ;;  %v3907_v61 = vld [vmem:[%s9891_s11 + $0xd8] sm:$0xff] }
 0x8e8   : > { %6550 = vmatprep.mubr.msk.f32.mxu0 %vm1680_vm10, %v3720_v50  ;;  %v3924_v27 = vld [vmem:[%s9891_s11 + $0x160] sm:$0xff]  ;;  %6229 = vmatprep.subr.mxu1 %v3940_v2  ;;  %v3922_v50 = vld [vmem:[%s9891_s11 + $0x150] sm:$0xff] }
 0x8e9   : > { %6230 = vmatpush3.msra.mxu1 %v3924_v27  ;;  %v3900_v14 = vld [vmem:[%s9891_s11 + $0xa0] sm:$0xff]  ;;  %v3931_v27 = vld [vmem:[%s9891_s11 + $0x198] sm:$0xff] }
 0x8ea   : > { %v3884_v62 = vld [vmem:[%s9891_s11 + $0x20] sm:$0xff] }
 0x8eb   : > { %v3916_v2 = vld [vmem:[%s9891_s11 + $0x120] sm:$0xff] }
 0x929   : > { %v3702_v8 = vpop.f32.mrf.mxu1 }
 0x92b   : > { %v6545_v52 = vpop.f32.mrf.mxu1 }
 0x92c   : > { %v3891_v52 = vld [vmem:[%s9891_s11 + $0x58] sm:$0xff] }
 0x9a7   : > { %v6173_v23 = vpop.f32.mrf.mxu0 }
 0x9a9   : > { %v6174_v13 = vpop.f32.mrf.mxu0 }
 0x9aa   : > { %v6175_v63 = vadd.f32 %v6174_v13, %v6173_v23  ;;  %v3923_v23 = vld [vmem:[%s9891_s11 + $0x158] sm:$0xff]  ;;  %v3938_v13 = vld [vmem:[%s9891_s11 + $0x1d0] sm:$0xff] }
 0x9ac   : > { %v3633_v47 = vadd.f32 %v6175_v63, %v5534_v38  ;;  %v3906_v38 = vld [vmem:[%s9891_s11 + $0xd0] sm:$0xff] }
 0x9ad   : > { %v3890_v63 = vld [vmem:[%s9891_s11 + $0x50] sm:$0xff] }
 0x9ae   : > { %v3703_v31 = vadd.f32 %v3702_v8, %v3633_v47  ;;  %v3939_v8 = vld [vmem:[%s9891_s11 + $0x1d8] sm:$0xff]  ;;  %v3905_v47 = vld [vmem:[%s9891_s11 + $0xc8] sm:$0xff] }
 0x9af   : > { %6231 = vmatprep.subr.mxu1 %v3939_v8  ;;  %v3915_v8 = vld [vmem:[%s9891_s11 + $0x118] sm:$0xff] }
 0x9b0   : > { %v3706_v24 = vmax.f32 %v3703_v31, 0.0  ;;  %6232 = vmatpush3.msra.mxu1 %v3923_v23  ;;  %v3937_v31 = vld [vmem:[%s9891_s11 + $0x1c8] sm:$0xff]  ;;  %v3930_v23 = vld [vmem:[%s9891_s11 + $0x190] sm:$0xff] }
 0x9b1   : > { %6233 = vmatprep.subr.mxu1 %v3938_v13  ;;  %v3914_v13 = vld [vmem:[%s9891_s11 + $0x110] sm:$0xff] }
 0x9b2   : > { %3712 = vrot.lane.b32.xlu0 %v3706_v24, %s9927_s3  ;;  %v3708_v26 = vrot.slane %v3706_v24, 4  ;;  %6234 = vmatpush3.msra.mxu1 %v3922_v50 }
 0x9b3   : > { %6235 = vmatprep.subr.mxu1 %v3937_v31 }
 0x9b4   : > { %3715 = vrot.lane.b32.xlu1 %v3708_v26, %s9928_s29 }
 0x9b6   : > { %3709 = vrot.lane.b32.xlu0 %v3708_v26, %s9929_s4  ;;  %v3921_v26 = vld [vmem:[%s9891_s11 + $0x148] sm:$0xff] }
 0x9b7   : > { %6236 = vmatpush3.msra.mxu1 %v3921_v26 }
 0x9b8   : > { %3805 = vrot.lane.b32.xlu1 %v8254_v30, %s9928_s29  ;;  %v3895_v30 = vld [vmem:[%s9891_s11 + $0x78] sm:$0xff] }
 0x9ba   : > { %3807 = vrot.lane.b32.xlu0 %v8252_v3, %s9928_s29  ;;  %v3911_v3 = vld [vmem:[%s9891_s11 + $0xf8] sm:$0xff] }
 0xa24   : > { %v3713_v19 = vpop.permute.xlu0 %3712 }
 0xa26   : > { %v3716_v42 = vpop.permute.xlu1 %3715 }
 0xa27   : > { %v3719_v53 = vsel %vm1762_vm12, %v3713_v19, %v3716_v42  ;;  %v3904_v19 = vld [vmem:[%s9891_s11 + $0xc0] sm:$0xff] }
 0xa28   : > { %v3710_v60 = vpop.permute.xlu0 %3709  ;;  %6546 = vmatprep.subr.mxu0 %v3719_v53  ;;  %v3936_v42 = vld [vmem:[%s9891_s11 + $0x1c0] sm:$0xff] }
 0xa29   : > { %6547 = vmatpush3.msra.mxu0 %v3719_v53  ;;  %v3718_v12 = vsel %vm1762_vm12, %v3706_v24, %v3710_v60  ;;  %v3889_v24 = vld [vmem:[%s9891_s11 + $0x48] sm:$0xff]  ;;  %v3888_v53 = vld [vmem:[%s9891_s11 + $0x40] sm:$0xff]  ;;  %6237 = vmatprep.subr.mxu1 %v3936_v42 }
 0xa2a   : > { %6548 = vmatprep.subr.mxu0 %v3718_v12  ;;  %v3920_v60 = vld [vmem:[%s9891_s11 + $0x140] sm:$0xff]  ;;  %v3881_v42 = vld [vmem:[%s9891_s11 + $0x8] sm:$0xff] }
 0xa2b   : > { %6549 = vmatpush3.msra.mxu0 %v3718_v12  ;;  %v3903_v12 = vld [vmem:[%s9891_s11 + $0xb8] sm:$0xff]  ;;  %6238 = vmatpush3.msra.mxu1 %v3920_v60  ;;  %v3896_v60 = vld [vmem:[%s9891_s11 + $0x80] sm:$0xff] }
 0xa2c   : > { %6551 = vmatmul.mubr.msk.f32.vlgmr.msra.gmra.mxu0 %vm1680_vm10, %v3721_v41  ;;  %6185 = vmatprep.subr.mxu0 %v3911_v3  ;;  %v3935_v41 = vld [vmem:[%s9891_s11 + $0x1b8] sm:$0xff]  ;;  %v3808_v50 = vpop.permute.xlu0 %3807 }
 0xa2d   : > { %6186 = vmatpush3.msra.mxu0 %v3895_v30  ;;  %v3887_v3 = vld [vmem:[%s9891_s11 + $0x38] sm:$0xff]  ;;  %6239 = vmatprep.subr.mxu1 %v3935_v41  ;;  %v3880_v41 = vld [vmem:[%s9891_s11] sm:$0xff] }
 0xa2e   : > { %6187 = vmatprep.subr.mxu0 %v3910_v57  ;;  %v3919_v30 = vld [vmem:[%s9891_s11 + $0x138] sm:$0xff]  ;;  %v3934_v57 = vld [vmem:[%s9891_s11 + $0x1b0] sm:$0xff] }
 0xa2f   : > { %6188 = vmatpush3.msra.mxu0 %v3894_v35  ;;  %v3918_v35 = vld [vmem:[%s9891_s11 + $0x130] sm:$0xff]  ;;  %6240 = vmatpush3.msra.mxu1 %v3919_v30  ;;  %v3912_v30 = vld [vmem:[%s9891_s11 + $0x100] sm:$0xff] }
 0xa30   : > { %6189 = vmatprep.subr.mxu0 %v3909_v32  ;;  %v3933_v32 = vld [vmem:[%s9891_s11 + $0x1a8] sm:$0xff]  ;;  %6241 = vmatprep.subr.mxu1 %v3934_v57 }
 0xa31   : > { %6190 = vmatpush3.msra.mxu0 %v3893_v59  ;;  %v3917_v59 = vld [vmem:[%s9891_s11 + $0x128] sm:$0xff]  ;;  %6242 = vmatpush3.msra.mxu1 %v3918_v35 }
 0xa32   : > { %6191 = vmatprep.subr.mxu0 %v3908_v44  ;;  %v3932_v44 = vld [vmem:[%s9891_s11 + $0x1a0] sm:$0xff]  ;;  %6243 = vmatprep.subr.mxu1 %v3933_v32 }
 0xa33   : > { %6192 = vmatpush3.msra.mxu0 %v3892_v46  ;;  %6244 = vmatpush3.msra.mxu1 %v3917_v59  ;;  %v3899_v46 = vld [vmem:[%s9891_s11 + $0x98] sm:$0xff] }
 0xa34   : > { %6193 = vmatprep.subr.mxu0 %v3907_v61  ;;  %6245 = vmatprep.subr.mxu1 %v3932_v44  ;;  %v3883_v61 = vld [vmem:[%s9891_s11 + $0x18] sm:$0xff] }
 0xa35   : > { %6194 = vmatpush3.msra.mxu0 %v3891_v52  ;;  %6246 = vmatpush3.msra.mxu1 %v3916_v2  ;;  %v3898_v52 = vld [vmem:[%s9891_s11 + $0x90] sm:$0xff] }
 0xa36   : > { %6195 = vmatprep.subr.mxu0 %v3906_v38  ;;  %6247 = vmatprep.subr.mxu1 %v3931_v27  ;;  %v3882_v38 = vld [vmem:[%s9891_s11 + $0x10] sm:$0xff] }
 0xa37   : > { %6196 = vmatpush3.msra.mxu0 %v3890_v63  ;;  %6248 = vmatpush3.msra.mxu1 %v3915_v8  ;;  %v3897_v63 = vld [vmem:[%s9891_s11 + $0x88] sm:$0xff] }
 0xa38   : > { %6197 = vmatprep.subr.mxu0 %v3905_v47  ;;  %6249 = vmatprep.subr.mxu1 %v3930_v23 }
 0xa39   : > { %6198 = vmatpush3.msra.mxu0 %v3889_v24  ;;  %6250 = vmatpush3.msra.mxu1 %v3914_v13  ;;  %v3806_v24 = vpop.permute.xlu1 %3805 }
 0xa3a   : > { %6199 = vmatprep.subr.mxu0 %v3904_v19 }
 0xa3b   : > { %6200 = vmatpush3.msra.mxu0 %v3888_v53  ;;  %v3929_v53 = vld [vmem:[%s9891_s11 + $0x188] sm:$0xff] }
 0xa3c   : > { %6201 = vmatprep.subr.mxu0 %v3903_v12  ;;  %6251 = vmatprep.subr.mxu1 %v3929_v53  ;;  %v3913_v12 = vld [vmem:[%s9891_s11 + $0x108] sm:$0xff] }
 0xa3d   : > { %6202 = vmatpush3.msra.mxu0 %v3887_v3  ;;  %v3928_v3 = vld [vmem:[%s9891_s11 + $0x180] sm:$0xff]  ;;  %6252 = vmatpush3.msra.mxu1 %v3913_v12 }
 0xa3e   : > { %6203 = vmatprep.subr.mxu0 %v3902_v21  ;;  %v3951_v21 = vld [vmem:[%s9891_s11 + $0x238] sm:$0xff]  ;;  %6253 = vmatprep.subr.mxu1 %v3928_v3 }
 0xa3f   : > { %6204 = vmatpush3.msra.mxu0 %v3886_v58  ;;  %6254 = vmatpush3.msra.mxu1 %v3912_v30 }
 0xa40   : > { %6205 = vmatprep.subr.mxu0 %v3901_v10 }
 0xa41   : > { %6206 = vmatpush3.msra.mxu0 %v3885_v17 }
 0xa42   : > { %6207 = vmatprep.subr.mxu0 %v3900_v14 }
 0xa43   : > { %6208 = vmatpush3.msra.mxu0 %v3884_v62 }
 0xa44   : > { %6209 = vmatprep.subr.mxu0 %v3899_v46 }
 0xa45   : > { %6210 = vmatpush3.msra.mxu0 %v3883_v61 }
 0xa46   : > { %6211 = vmatprep.subr.mxu0 %v3898_v52 }
 0xa47   : > { %6212 = vmatpush3.msra.mxu0 %v3882_v38 }
 0xa48   : > { %6213 = vmatprep.subr.mxu0 %v3897_v63 }
 0xa49   : > { %6214 = vmatpush3.msra.mxu0 %v3881_v42 }
 0xa4a   : > { %6215 = vmatprep.subr.mxu0 %v3896_v60 }
 0xa4b   : > { %6216 = vmatpush3.msra.mxu0 %v3880_v41 }
 0xa4c   : > { %6553 = vmatprep.subr.mxu0 %v3951_v21 }
 0xaec   : > { %v6552_v47 = vpop.f32.mrf.mxu0 }
 0xaed   : > { %v3812_v31 = vsel %vm1716_vm9, %v6552_v47, %v3808_v50 }
 0xaee   : > { %3816 = vst.msk [vmem:[#allocation6 + $0x10] sm:$0xff] %vm1881_vm0, %v3812_v31  ;;  %v3794_v26 = vpop.f32.mrf.mxu0 }
 0xaef   : > { %v3811_v19 = vsel %vm1716_vm9, %v3794_v26, %v3806_v24 }
 0xaf0   : > { %3815 = vst.msk [vmem:[#allocation6 + $0x8] sm:$0xff] %vm1881_vm0, %v3811_v19 }
 0xaf5   : > { %v3834_v62 = vld [vmem:[#allocation6 + $0x11] sm:$0xff] }
 0xaf6   : > { %v3836_v46 = vmul.f32 %v3834_v62, %v8200_v40  ;;  %v3840_v27 = vld [vmem:[#allocation6 + $0x14] sm:$0xff] }
 0xaf7   : > { %v3833_v57 = vld [vmem:[#allocation6 + $0x9] sm:$0xff]  ;;  %v3837_v41 = vld [vmem:[#allocation6 + $0x13] sm:$0xff] }
 0xaf8   : > { %v3835_v58 = vmul.f32 %v3833_v57, %v8195_v25  ;;  %v3827_v35 = vld [vmem:[#allocation6 + $0x7] sm:$0xff]  ;;  %v3828_v10 = vld [vmem:[#allocation6 + $0xf] sm:$0xff] }
 0xaf9   : > { %v3822_v32 = vld [vmem:[#allocation6 + $0xc] sm:$0xff]  ;;  %v3829_v17 = vmul.f32 %v3827_v35, %v8169_v55  ;;  %v3821_v14 = vld [vmem:[#allocation6 + $0x4] sm:$0xff]  ;;  %v3830_v2 = vmul.f32 %v3828_v10, %v8189_v15 }
 0xafa   : > { %v6686_v59 = vpack.i.bf16 %v3835_v58, %v3822_v32  ;;  %v3818_v8 = vld [vmem:[#allocation6 + $0xb] sm:$0xff]  ;;  %v3817_v23 = vld [vmem:[#allocation6 + $0x3] sm:$0xff]  ;;  %v3839_v32 = vmul.f32 %v3837_v41, %v8189_v15 }
 0xafb   : > { %v6681_v44 = vpack.i.bf16 %v3821_v14, %v3829_v17  ;;  %v6691_v61 = vpack.i.bf16 %v3840_v27, %v3830_v2  ;;  %v3823_v52 = vld [vmem:[#allocation6 + $0x5] sm:$0xff]  ;;  %v3838_v47 = vmul.f32 %v3818_v8, %v8169_v55  ;;  %v3819_v19 = vmul.f32 %v3817_v23, %v8169_v55  ;;  %v3824_v12 = vld [vmem:[#allocation6 + $0xd] sm:$0xff]  ;;  %v3841_v23 = vld [vmem:[#allocation6 + $0x15] sm:$0xff] }
 0xafc   : > { %6687 = vrot.lane.b32.xlu0 %v6686_v59, %s9927_s3  ;;  %v3825_v26 = vmul.f32 %v3823_v52, %v8195_v25  ;;  %v3831_v42 = vld [vmem:[#allocation6 + $0x8] sm:$0xff]  ;;  %v3950_v58 = vld [vmem:[%s9891_s11 + $0x230] sm:$0xff]  ;;  %v3826_v10 = vmul.f32 %v3824_v12, %v8200_v40  ;;  %v3949_v59 = vld [vmem:[%s9891_s11 + $0x228] sm:$0xff]  ;;  %v3820_v62 = vmul.f32 %v3818_v8, %v8189_v15 }
 0xafd   : > { %6682 = vrot.lane.b32.xlu1 %v6681_v44, %s9927_s3  ;;  %v3832_v2 = vld [vmem:[#allocation6 + $0x10] sm:$0xff]  ;;  %v3947_v15 = vld [vmem:[%s9891_s11 + $0x218] sm:$0xff]  ;;  %v3946_v8 = vld [vmem:[%s9891_s11 + $0x210] sm:$0xff] }
 0xafe   : > { %v3948_v27 = vld [vmem:[%s9891_s11 + $0x220] sm:$0xff] }
 0xaff   : > { %v3944_v52 = vld [vmem:[%s9891_s11 + $0x200] sm:$0xff] }
 0xb00   : > { %3864 = vrot.lane.b32.xlu0 %v3836_v46, %s9927_s3 }
 0xb01   : > { %6692 = vrot.lane.b32.xlu1 %v6691_v61, %s9927_s3  ;;  %v3842_v61 = vmul.f32 %v3824_v12, %v8195_v25  ;;  %v3945_v25 = vld [vmem:[%s9891_s11 + $0x208] sm:$0xff] }
 0xb6e   : > { %v6688_v38 = vpop.permute.xlu0 %6687 }
 0xb6f   : > { %v6690_v13 = vunpack.i.h.bf16 %v6688_v38  ;;  %v6689_v63 = vunpack.i.l.bf16 %v6688_v38  ;;  %v6683_v50 = vpop.permute.xlu1 %6682  ;;  %v3843_v38 = vmul.f32 %v3841_v23, %v8200_v40  ;;  %v4727_v23 = vld [vmem:[%s9892_s12 + $0x70] sm:$0xff] }
 0xb70   : > { %v6685_v31 = vunpack.i.h.bf16 %v6683_v50  ;;  %v6684_v24 = vunpack.i.l.bf16 %v6683_v50 }
 0xb71   : > { %v3878_v53 = vsel %vm1881_vm0, %v3838_v47, %v6689_v63  ;;  %v3876_v60 = vsel %vm1881_vm0, %v3831_v42, %v6690_v13  ;;  %v3873_v46 = vsel %vm1881_vm0, %v3820_v62, %v6689_v63  ;;  %v4217_v62 = vld [vmem:[%s9885_s5 + $0x28] sm:$0xff] }
 0xb72   : > { %v3874_v3 = vsel %vm1881_vm0, %v3825_v26, %v6684_v24  ;;  %4104 = vmatprep.mubr.f32.mxu1 %v3878_v53  ;;  %v3872_v30 = vsel %vm1881_vm0, %v3819_v19, %v6685_v31  ;;  %v3865_v17 = vpop.permute.xlu0 %3864  ;;  %v5538_v53 = vld [vmem:[%s9897_s17] ss:$0 sm:$0xff] }
 0xb73   : > { %v6693_v57 = vpop.permute.xlu1 %6692  ;;  %4029 = vmatprep.mubr.f32.mxu0 %v3874_v3  ;;  %4105 = vmatmul.mubr.f32.vlgmr.msra.gmra.mxu1 %v3876_v60 }
 0xb74   : > { %v6695_v55 = vunpack.i.h.bf16 %v6693_v57  ;;  %v6694_v35 = vunpack.i.l.bf16 %v6693_v57  ;;  %4030 = vmatmul.mubr.f32.vlgmr.msra.gmra.mxu0 %v3872_v30 }
 0xb75   : > { %6554 = vmatpush3.msra.mxu0 %v3951_v21  ;;  %v3877_v21 = vsel %vm1881_vm0, %v3832_v2, %v3865_v17  ;;  %v4218_v2 = vld [vmem:[%s9885_s5 + $0x30] sm:$0xff] }
 0xb76   : > { %6555 = vmatprep.subr.mxu0 %v3950_v58  ;;  %v3875_v14 = vsel %vm1881_vm0, %v3826_v10, %v6694_v35  ;;  %v3879_v44 = vsel %vm1881_vm0, %v3839_v32, %v6695_v55 }
 0xb77   : > { %6556 = vmatpush3.msra.mxu0 %v3950_v58  ;;  %4034 = vmatprep.mubr.f32.mxu0 %v3875_v14  ;;  %v4215_v14 = vld [vmem:[%s9885_s5 + $0x18] sm:$0xff] }
 0xb78   : > { %4109 = vmatprep.mubr.f32.mxu1 %v3879_v44  ;;  %6557 = vmatprep.subr.mxu0 %v3949_v59  ;;  %v4216_v44 = vld [vmem:[%s9885_s5 + $0x20] sm:$0xff] }
 0xb79   : > { %4035 = vmatmul.mubr.f32.gmra.mxu0 %v3873_v46  ;;  %4110 = vmatmul.mubr.f32.gmra.mxu1 %v3877_v21  ;;  %v4219_v46 = vld [vmem:[%s9885_s5 + $0x38] sm:$0xff] }
 0xb7a   : > { %6558 = vmatpush3.msra.mxu0 %v3949_v59  ;;  %6569 = vmatprep.mubr.msk.f32.mxu0 %vm1881_vm0, %v3842_v61  ;;  %v4212_v59 = vld [vmem:[%s9885_s5] sm:$0xff]  ;;  %v4748_v21 = vld [vmem:[%s9892_s12 + $0x118] sm:$0xff]  ;;  %v4746_v61 = vld [vmem:[%s9892_s12 + $0x108] sm:$0xff] }
 0xb7b   : > { %6559 = vmatprep.subr.mxu0 %v3948_v27  ;;  %6588 = vmatprep.mubr.msk.f32.mxu1 %vm1881_vm0, %v4212_v59 }
 0xb7c   : > { %6560 = vmatpush3.msra.mxu0 %v3948_v27  ;;  %v4747_v27 = vld [vmem:[%s9892_s12 + $0x110] sm:$0xff] }
 0xb7d   : > { %6561 = vmatprep.subr.mxu0 %v3947_v15 }
 0xb7e   : > { %6562 = vmatpush3.msra.mxu0 %v3947_v15  ;;  %v4745_v15 = vld [vmem:[%s9892_s12 + $0x100] sm:$0xff] }
 0xb7f   : > { %6563 = vmatprep.subr.mxu0 %v3946_v8 }
 0xb80   : > { %6564 = vmatpush3.msra.mxu0 %v3946_v8  ;;  %v4744_v8 = vld [vmem:[%s9892_s12 + $0xf8] sm:$0xff] }
 0xb81   : > { %6565 = vmatprep.subr.mxu0 %v3945_v25 }
 0xb82   : > { %6566 = vmatpush3.msra.mxu0 %v3945_v25  ;;  %v4728_v25 = vld [vmem:[%s9892_s12 + $0x78] sm:$0xff] }
 0xb83   : > { %6567 = vmatprep.subr.mxu0 %v3944_v52 }
 0xb84   : > { %6568 = vmatpush3.msra.mxu0 %v3944_v52  ;;  %v4743_v52 = vld [vmem:[%s9892_s12 + $0xf0] sm:$0xff] }
 0xb85   : > { %6570 = vmatmul.mubr.msk.f32.vlgmr.msra.gmra.mxu0 %vm1881_vm0, %v3843_v38  ;;  %6287 = vmatprep.subr.mxu0 %v4744_v8  ;;  %v4742_v38 = vld [vmem:[%s9892_s12 + $0xe8] sm:$0xff]  ;;  %v4729_v8 = vld [vmem:[%s9892_s12 + $0x80] sm:$0xff] }
 0xb86   : > { %6288 = vmatpush3.msra.mxu0 %v4728_v25 }
 0xb87   : > { %6289 = vmatprep.subr.mxu0 %v4743_v52  ;;  %v4417_v52 = vld [vmem:[#allocation7 + $0x8] sm:$0xff] }
 0xb88   : > { %6290 = vmatpush3.msra.mxu0 %v4727_v23  ;;  %v4713_v23 = vld [vmem:[%s9892_s12] sm:$0xff] }
 0xb89   : > { %6291 = vmatprep.subr.mxu0 %v4742_v38 }
 0xc33   : > { %v6255_v13 = vpop.f32.mrf.mxu1 }
 0xc34   : > { %v6217_v63 = vpop.f32.mrf.mxu0 }
 0xc35   : > { %v6256_v47 = vpop.f32.mrf.mxu1 }
 0xc36   : > { %v6218_v50 = vpop.f32.mrf.mxu0  ;;  %v6257_v3 = vadd.f32 %v6256_v47, %v6255_v13  ;;  %v4726_v13 = vld [vmem:[%s9892_s12 + $0x68] sm:$0xff]  ;;  %v4740_v47 = vld [vmem:[%s9892_s12 + $0xd8] sm:$0xff] }
 0xc37   : > { %v6219_v42 = vadd.f32 %v6218_v50, %v6217_v63  ;;  %v4741_v63 = vld [vmem:[%s9892_s12 + $0xe0] sm:$0xff]  ;;  %6292 = vmatpush3.msra.mxu0 %v4726_v13 }
 0xc38   : > { %v4725_v50 = vld [vmem:[%s9892_s12 + $0x60] sm:$0xff]  ;;  %6293 = vmatprep.subr.mxu0 %v4741_v63 }
 0xc39   : > { %v6220_v31 = vpop.f32.mrf.mxu0  ;;  %v6258_v24 = vpop.f32.mrf.mxu1  ;;  %v4032_v41 = vadd.f32 %v6219_v42, %v5538_v53  ;;  %6294 = vmatpush3.msra.mxu0 %v4725_v50  ;;  %v4722_v42 = vld [vmem:[%s9892_s12 + $0x48] sm:$0xff] }
 0xc3a   : > { %6295 = vmatprep.subr.mxu0 %v4740_v47 }
 0xc3b   : > { %v6221_v26 = vpop.f32.mrf.mxu0  ;;  %v6259_v60 = vpop.f32.mrf.mxu1  ;;  %v4107_v55 = vadd.f32 %v6257_v3, %v4032_v41  ;;  %v4720_v41 = vld [vmem:[%s9892_s12 + $0x38] sm:$0xff]  ;;  %v4719_v3 = vld [vmem:[%s9892_s12 + $0x30] sm:$0xff] }
 0xc3c   : > { %v6222_v19 = vadd.f32 %v6221_v26, %v6220_v31  ;;  %v6260_v40 = vadd.f32 %v6259_v60, %v6258_v24  ;;  %v4724_v31 = vld [vmem:[%s9892_s12 + $0x58] sm:$0xff]  ;;  %v4739_v24 = vld [vmem:[%s9892_s12 + $0xd0] sm:$0xff]  ;;  %v4721_v60 = vld [vmem:[%s9892_s12 + $0x40] sm:$0xff] }
 0xc3d   : > { %v4723_v26 = vld [vmem:[%s9892_s12 + $0x50] sm:$0xff]  ;;  %6296 = vmatpush3.msra.mxu0 %v4724_v31 }
 0xc3e   : > { %v4037_v12 = vadd.f32 %v6222_v19, %v5538_v53  ;;  %v4738_v19 = vld [vmem:[%s9892_s12 + $0xc8] sm:$0xff]  ;;  %6297 = vmatprep.subr.mxu0 %v4739_v24  ;;  %v4737_v53 = vld [vmem:[%s9892_s12 + $0xc0] sm:$0xff] }
 0xc3f   : > { %6298 = vmatpush3.msra.mxu0 %v4723_v26 }
 0xc40   : > { %v4112_v30 = vadd.f32 %v6260_v40, %v4037_v12  ;;  %6299 = vmatprep.subr.mxu0 %v4738_v19  ;;  %v4736_v12 = vld [vmem:[%s9892_s12 + $0xb8] sm:$0xff]  ;;  %v4735_v40 = vld [vmem:[%s9892_s12 + $0xb0] sm:$0xff] }
 0xc41   : > { %6300 = vmatpush3.msra.mxu0 %v4722_v42 }
 0xc42   : > { %6301 = vmatprep.subr.mxu0 %v4737_v53 }
 0xc43   : > { %6302 = vmatpush3.msra.mxu0 %v4721_v60 }
 0xc44   : > { %6303 = vmatprep.subr.mxu0 %v4736_v12 }
 0xc45   : > { %v6571_v57 = vpop.f32.mrf.mxu0  ;;  %6304 = vmatpush3.msra.mxu0 %v4720_v41 }
 0xc46   : > { %v4187_v58 = vadd.f32 %v6571_v57, %v4112_v30  ;;  %v4734_v30 = vld [vmem:[%s9892_s12 + $0xa8] sm:$0xff]  ;;  %6305 = vmatprep.subr.mxu0 %v4735_v40 }
 0xc47   : > { %v4181_v35 = vpop.f32.mrf.mxu0  ;;  %v4718_v57 = vld [vmem:[%s9892_s12 + $0x28] sm:$0xff]  ;;  %6306 = vmatpush3.msra.mxu0 %v4719_v3 }
 0xc48   : > { %v4191_v10 = vmax.f32 %v4187_v58, 0.0  ;;  %v4182_v32 = vadd.f32 %v4181_v35, %v4107_v55  ;;  %v4733_v58 = vld [vmem:[%s9892_s12 + $0xa0] sm:$0xff]  ;;  %6307 = vmatprep.subr.mxu0 %v4734_v30 }
 0xc49   : > { %v4717_v55 = vld [vmem:[%s9892_s12 + $0x20] sm:$0xff]  ;;  %6308 = vmatpush3.msra.mxu0 %v4718_v57 }
 0xc4a   : > { %v4190_v17 = vmax.f32 %v4182_v32, 0.0  ;;  %4208 = vrot.lane.b32.xlu1 %v4191_v10, %s6874_s27  ;;  %6309 = vmatprep.subr.mxu0 %v4733_v58 }
 0xc4b   : > { %6310 = vmatpush3.msra.mxu0 %v4717_v55 }
 0xc4c   : > { %4206 = vrot.lane.b32.xlu0 %v4190_v17, %s6874_s27 }
 0xc4e   : > { %4202 = vrot.lane.b32.xlu1 %v4191_v10, %s9929_s4 }
 0xc50   : > { %4200 = vrot.lane.b32.xlu0 %v4190_v17, %s9929_s4 }
 0xc52   : > { %4196 = vrot.lane.b32.xlu1 %v4191_v10, %s6875_s8 }
 0xc54   : > { %4194 = vrot.lane.b32.xlu0 %v4190_v17, %s6875_s8 }
 0xc56   : > { %4357 = vrot.lane.b32.xlu1 %v7903_v33, %s9931_s22 }
 0xc58   : > { %4359 = vrot.lane.b32.xlu0 %v7897_v20, %s9931_s22 }
 0xc5a   : > { %4361 = vrot.lane.b32.xlu1 %v7891_v18, %s9931_s22 }
 0xc5c   : > { %4363 = vrot.lane.b32.xlu0 %v7885_v48, %s9931_s22 }
 0xc5e   : > { %4365 = vrot.lane.b32.xlu1 %v7879_v7, %s9931_s22 }
 0xc60   : > { %4367 = vrot.lane.b32.xlu0 %v7873_v29, %s9931_s22 }
 0xc62   : > { %4369 = vrot.lane.b32.xlu1 %v7867_v4, %s9931_s22  ;;  %v4214_v4 = vld [vmem:[%s9885_s5 + $0x10] sm:$0xff] }
 0xc64   : > { %4371 = vrot.lane.b32.xlu0 %v7865_v1, %s9931_s22  ;;  %v4213_v1 = vld [vmem:[%s9885_s5 + $0x8] sm:$0xff] }
 0xcbc   : > { %v4209_v33 = vpop.permute.xlu1 %4208 }
 0xcbd   : > { %6572 = vmatprep.subr.mxu1 %v4209_v33 }
 0xcbe   : > { %6573 = vmatpush3.msra.mxu1 %v4209_v33  ;;  %v4207_v20 = vpop.permute.xlu0 %4206 }
 0xcbf   : > { %6574 = vmatprep.subr.mxu1 %v4207_v20 }
 0xcc0   : > { %v4203_v18 = vpop.permute.xlu1 %4202  ;;  %6575 = vmatpush3.msra.mxu1 %v4207_v20 }
 0xcc1   : > { %6576 = vmatprep.subr.mxu1 %v4203_v18 }
 0xcc2   : > { %6577 = vmatpush3.msra.mxu1 %v4203_v18  ;;  %v4201_v48 = vpop.permute.xlu0 %4200 }
 0xcc3   : > { %6578 = vmatprep.subr.mxu1 %v4201_v48 }
 0xcc4   : > { %v4197_v7 = vpop.permute.xlu1 %4196  ;;  %6579 = vmatpush3.msra.mxu1 %v4201_v48 }
 0xcc5   : > { %6580 = vmatprep.subr.mxu1 %v4197_v7 }
 0xcc6   : > { %6581 = vmatpush3.msra.mxu1 %v4197_v7  ;;  %v4195_v29 = vpop.permute.xlu0 %4194 }
 0xcc7   : > { %6582 = vmatprep.subr.mxu1 %v4195_v29 }
 0xcc8   : > { %6583 = vmatpush3.msra.mxu1 %v4195_v29  ;;  %v4732_v29 = vld [vmem:[%s9892_s12 + $0x98] sm:$0xff] }
 0xcc9   : > { %6584 = vmatprep.subr.mxu1 %v4191_v10  ;;  %6311 = vmatprep.subr.mxu0 %v4732_v29 }
 0xcca   : > { %6585 = vmatpush3.msra.mxu1 %v4191_v10  ;;  %v4360_v35 = vpop.permute.xlu0 %4359  ;;  %v4358_v10 = vpop.permute.xlu1 %4357 }
 0xccb   : > { %6586 = vmatprep.subr.mxu1 %v4190_v17 }
 0xccc   : > { %6587 = vmatpush3.msra.mxu1 %v4190_v17 }
 0xccd   : > { %6589 = vmatmul.mubr.msk.f32.vlgmr.msra.gmra.mxu1 %vm1881_vm0, %v4213_v1  ;;  %6600 = vmatprep.subr.mxu1 %v4748_v21  ;;  %v4716_v1 = vld [vmem:[%s9892_s12 + $0x18] sm:$0xff] }
 0xcce   : > { %6591 = vmatprep.mubr.msk.f32.mxu1 %vm1881_vm0, %v4214_v4  ;;  %6601 = vmatpush3.msra.mxu1 %v4748_v21  ;;  %v4364_v32 = vpop.permute.xlu0 %4363  ;;  %v4362_v33 = vpop.permute.xlu1 %4361  ;;  %v4731_v4 = vld [vmem:[%s9892_s12 + $0x90] sm:$0xff] }
 0xccf   : > { %6602 = vmatprep.subr.mxu1 %v4747_v27  ;;  %6312 = vmatpush3.msra.mxu0 %v4716_v1 }
 0xcd0   : > { %6603 = vmatpush3.msra.mxu1 %v4747_v27  ;;  %6313 = vmatprep.subr.mxu0 %v4731_v4 }
 0xcd1   : > { %6592 = vmatmul.mubr.msk.f32.gmra.mxu1 %vm1881_vm0, %v4215_v14  ;;  %6604 = vmatprep.subr.mxu1 %v4746_v61 }
 0xcd2   : > { %6594 = vmatprep.mubr.msk.f32.mxu1 %vm1881_vm0, %v4216_v44  ;;  %6605 = vmatpush3.msra.mxu1 %v4746_v61  ;;  %v4368_v14 = vpop.permute.xlu0 %4367  ;;  %v4366_v21 = vpop.permute.xlu1 %4365  ;;  %v4714_v61 = vld [vmem:[%s9892_s12 + $0x8] sm:$0xff] }
 0xcd3   : > { %6606 = vmatprep.subr.mxu1 %v4745_v15 }
 0xcd4   : > { %6607 = vmatpush3.msra.mxu1 %v4745_v15 }
 0xcd5   : > { %6595 = vmatmul.mubr.msk.f32.gmra.mxu1 %vm1881_vm0, %v4217_v62  ;;  %v4715_v62 = vld [vmem:[%s9892_s12 + $0x10] sm:$0xff] }
 0xcd6   : > { %6597 = vmatprep.mubr.msk.f32.mxu1 %vm1881_vm0, %v4218_v2  ;;  %6314 = vmatpush3.msra.mxu0 %v4715_v62  ;;  %v4372_v47 = vpop.permute.xlu0 %4371  ;;  %v4370_v60 = vpop.permute.xlu1 %4369 }
 0xcd9   : > { %6598 = vmatmul.mubr.msk.f32.gmra.mxu1 %vm1881_vm0, %v4219_v46  ;;  %v4730_v46 = vld [vmem:[%s9892_s12 + $0x88] sm:$0xff] }
 0xcda   : > { %6315 = vmatprep.subr.mxu0 %v4730_v46 }
 0xcdb   : > { %6316 = vmatpush3.msra.mxu0 %v4714_v61 }
 0xcdc   : > { %6317 = vmatprep.subr.mxu0 %v4729_v8 }
 0xcdd   : > { %6318 = vmatpush3.msra.mxu0 %v4713_v23 }
 0xd8d   : > { %v6590_v17 = vpop.f32.mrf.mxu1 }
 0xd8e   : > { %v4382_v59 = vsel %vm1680_vm10, %v6590_v17, %v4360_v35 }
 0xd8f   : > { %4394 = vst.msk [vmem:[#allocation7 + $0x18] sm:$0xff] %vm1716_vm9, %v4382_v59  ;;  %v4310_v20 = vpop.f32.mrf.mxu1 }
 0xd90   : > { %v4381_v18 = vsel %vm1680_vm10, %v4310_v20, %v4358_v10 }
 0xd91   : > { %4393 = vst.msk [vmem:[#allocation7 + $0x10] sm:$0xff] %vm1716_vm9, %v4381_v18  ;;  %v6593_v48 = vpop.f32.mrf.mxu1 }
 0xd92   : > { %v4384_v7 = vsel %vm1680_vm10, %v6593_v48, %v4364_v32 }
 0xd93   : > { %4396 = vst.msk [vmem:[#allocation7 + $0x28] sm:$0xff] %vm1716_vm9, %v4384_v7  ;;  %v4320_v44 = vpop.f32.mrf.mxu1 }
 0xd94   : > { %v4383_v2 = vsel %vm1680_vm10, %v4320_v44, %v4362_v33 }
 0xd95   : > { %4395 = vst.msk [vmem:[#allocation7 + $0x20] sm:$0xff] %vm1716_vm9, %v4383_v2  ;;  %v6596_v27 = vpop.f32.mrf.mxu1 }
 0xd96   : > { %v4386_v15 = vsel %vm1680_vm10, %v6596_v27, %v4368_v14  ;;  %v9361_v59 = vld [vmem:[#allocation7 + $0x18] sm:$0xff] }
 0xd97   : > { %4398 = vst.msk [vmem:[#allocation7 + $0x38] sm:$0xff] %vm1716_vm9, %v4386_v15  ;;  %v4330_v25 = vpop.f32.mrf.mxu1 }
 0xd98   : > { %v4385_v38 = vsel %vm1680_vm10, %v4330_v25, %v4366_v21  ;;  %v4426_v13 = vld [vmem:[#allocation7 + $0x11] sm:$0xff]  ;;  %v4425_v50 = vld [vmem:[#allocation7 + $0x9] sm:$0xff] }
 0xd99   : > { %v9336_v63 = vld [vmem:[#allocation7 + $0x17] sm:$0xff]  ;;  %4397 = vst.msk [vmem:[#allocation7 + $0x30] sm:$0xff] %vm1716_vm9, %v4385_v38  ;;  %v6599_v31 = vpop.f32.mrf.mxu1  ;;  %v4452_v24 = vmul.f32 %v4426_v13, %v7500_v39  ;;  %v4433_v26 = vmul.f32 %v4425_v50, %v7500_v39  ;;  %v9343_v42 = vld [vmem:[#allocation7 + $0xf] sm:$0xff]  ;;  %v4434_v14 = vmul.f32 %v4426_v13, %v7532_v0 }
 0xd9a   : > { %v4461_v19 = vmul.f32 %v9336_v63, %v7519_v54  ;;  %v4388_v53 = vsel %vm1680_vm10, %v6599_v31, %v4372_v47  ;;  %v4442_v3 = vmul.f32 %v9343_v42, %v7519_v54  ;;  %v4443_v32 = vmul.f32 %v9336_v63, %v7551_v9  ;;  %v9380_v44 = vld [vmem:[#allocation7 + $0x10] sm:$0xff]  ;;  %v9411_v31 = vld [vmem:[#allocation7 + $0x28] sm:$0xff] }
 0xd9b   : > { %4400 = vst.msk [vmem:[#allocation7 + $0x48] sm:$0xff] %vm1716_vm9, %v4388_v53  ;;  %v4340_v12 = vpop.f32.mrf.mxu1  ;;  %v6696_v41 = vpack.i.bf16 %v4417_v52, %v4452_v24 }
 0xd9c   : > { %v6701_v40 = vpack.i.bf16 %v4433_v26, %v4461_v19  ;;  %v4387_v30 = vsel %vm1680_vm10, %v4340_v12, %v4370_v60  ;;  %v4427_v57 = vld [vmem:[#allocation7 + $0x19] sm:$0xff]  ;;  %v4428_v58 = vld [vmem:[#allocation7 + $0x21] sm:$0xff]  ;;  %v6706_v33 = vpack.i.bf16 %v4442_v3, %v9361_v59 }
 0xd9d   : > { %v9350_v55 = vld [vmem:[#allocation7 + $0x20] sm:$0xff]  ;;  %4399 = vst.msk [vmem:[#allocation7 + $0x40] sm:$0xff] %vm1716_vm9, %v4387_v30  ;;  %6697 = vrot.lane.b32.xlu1 %v6696_v41, %s9928_s29  ;;  %v4471_v35 = vmul.f32 %v4427_v57, %v7500_v39  ;;  %v4472_v10 = vmul.f32 %v4428_v58, %v7532_v0  ;;  %v4453_v39 = vmul.f32 %v4427_v57, %v7532_v0 }
 0xd9e   : > { %6702 = vrot.lane.b32.xlu0 %v6701_v40, %s9927_s3  ;;  %v9359_v17 = vld [vmem:[#allocation7 + $0x1f] sm:$0xff]  ;;  %v6711_v20 = vpack.i.bf16 %v4443_v32, %v9350_v55  ;;  %v9372_v29 = vld [vmem:[#allocation7 + $0x27] sm:$0xff]  ;;  %v4454_v62 = vmul.f32 %v4428_v58, %v7594_v34  ;;  %v4435_v21 = vmul.f32 %v4427_v57, %v7594_v34  ;;  %v4436_v12 = vmul.f32 %v4428_v58, %v7598_v36 }
 0xd9f   : > { %6608 = vmatprep.mubr.msk.f32.mxu1 %vm1716_vm9, %v4471_v35  ;;  %v4462_v18 = vmul.f32 %v9359_v17, %v7551_v9  ;;  %v6716_v46 = vpack.i.bf16 %v9380_v44, %v4453_v39  ;;  %v4463_v27 = vmul.f32 %v9372_v29, %v7613_v43  ;;  %v4444_v23 = vmul.f32 %v9359_v17, %v7613_v43 }
 0xda0   : > { %6609 = vmatmul.mubr.msk.f32.vlgmr.msra.gmra.mxu1 %vm1716_vm9, %v4472_v10  ;;  %v4429_v48 = vld [vmem:[#allocation7 + $0x29] sm:$0xff]  ;;  %v9370_v7 = vld [vmem:[#allocation7 + $0x31] sm:$0xff]  ;;  %v4445_v47 = vmul.f32 %v9372_v29, %v7624_v49 }
 0xda1   : > { %6707 = vrot.lane.b32.xlu1 %v6706_v33, %s9929_s4  ;;  %v4473_v1 = vmul.f32 %v4429_v48, %v7594_v34  ;;  %v4474_v4 = vmul.f32 %v9370_v7, %v7598_v36  ;;  %v6721_v2 = vpack.i.bf16 %v4434_v14, %v4462_v18  ;;  %v6726_v34 = vpack.i.bf16 %v9361_v59, %v4454_v62  ;;  %v9402_v13 = vld [vmem:[#allocation7 + $0x30] sm:$0xff]  ;;  %v9442_v33 = vld [vmem:[#allocation7 + $0x38] sm:$0xff] }
 0xda2   : > { %6712 = vrot.lane.b32.xlu0 %v6711_v20, %s9929_s4  ;;  %v4451_v25 = vld [vmem:[#allocation7 + $0x49] sm:$0xff]  ;;  %v6731_v52 = vpack.i.bf16 %v4435_v21, %v4463_v27  ;;  %v6736_v24 = vpack.i.bf16 %v4444_v23, %v9411_v31  ;;  %v6741_v26 = vpack.i.bf16 %v4445_v47, %v9402_v13  ;;  %v4455_v53 = vmul.f32 %v4429_v48, %v7598_v36  ;;  %v9418_v60 = vld [vmem:[#allocation7 + $0x37] sm:$0xff] }
 0xda3   : > { %6611 = vmatprep.mubr.msk.f32.mxu1 %vm1716_vm9, %v4473_v1  ;;  %v4477_v38 = vmul.f32 %v4451_v25, %v7707_v37  ;;  %v9404_v50 = vld [vmem:[#allocation7 + $0x2f] sm:$0xff]  ;;  %v4456_v41 = vmul.f32 %v9370_v7, %v7659_v6  ;;  %v4437_v30 = vmul.f32 %v4429_v48, %v7659_v6  ;;  %v4465_v57 = vmul.f32 %v9418_v60, %v7670_v16 }
 0xda4   : > { %6612 = vmatmul.mubr.msk.f32.gmra.mxu1 %vm1716_vm9, %v4474_v4  ;;  %v4431_v61 = vld [vmem:[#allocation7 + $0x39] sm:$0xff]  ;;  %v9389_v15 = vld [vmem:[#allocation7 + $0x41] sm:$0xff]  ;;  %v4464_v19 = vmul.f32 %v9404_v50, %v7624_v49  ;;  %v6746_v3 = vpack.i.bf16 %v9350_v55, %v4455_v53  ;;  %v4446_v36 = vmul.f32 %v9404_v50, %v7670_v16  ;;  %v4438_v4 = vmul.f32 %v9370_v7, %v7663_v5  ;;  %v4470_v7 = vld [vmem:[#allocation7 + $0x51] sm:$0xff] }
 0xda5   : > { %6722 = vrot.lane.b32.xlu1 %v6721_v2, %s9927_s3  ;;  %v4475_v0 = vmul.f32 %v4431_v61, %v7659_v6  ;;  %v4476_v8 = vmul.f32 %v9389_v15, %v7663_v5  ;;  %v6756_v35 = vpack.i.bf16 %v9411_v31, %v4456_v41  ;;  %v6761_v10 = vpack.i.bf16 %v4437_v30, %v4465_v57  ;;  %v9434_v58 = vld [vmem:[#allocation7 + $0x40] sm:$0xff]  ;;  %v4469_v47 = vld [vmem:[#allocation7 + $0x50] sm:$0xff] }
 0xda6   : > { %6717 = vrot.lane.b32.xlu0 %v6716_v46, %s9928_s29  ;;  %v6751_v40 = vpack.i.bf16 %v4436_v12, %v4464_v19  ;;  %v9436_v32 = vld [vmem:[#allocation7 + $0x3f] sm:$0xff]  ;;  %v4447_v6 = vmul.f32 %v9418_v60, %v7678_v11  ;;  %v6766_v20 = vpack.i.bf16 %v4446_v36, %v9442_v33  ;;  %v4457_v48 = vmul.f32 %v4431_v61, %v7663_v5  ;;  %v4441_v1 = vld [vmem:[#allocation7 + $0x47] sm:$0xff] }
 0xda7   : > { %6614 = vmatprep.mubr.msk.f32.mxu1 %vm1716_vm9, %v4475_v0  ;;  %v4466_v39 = vmul.f32 %v9436_v32, %v7678_v11  ;;  %v4439_v14 = vmul.f32 %v4431_v61, %v7707_v37  ;;  %v4467_v46 = vmul.f32 %v4441_v1, %v7714_v45  ;;  %v4458_v21 = vmul.f32 %v9389_v15, %v7707_v37  ;;  %v9467_v37 = vld [vmem:[#allocation7 + $0x48] sm:$0xff] }
 0xda8   : > { %6615 = vmatmul.mubr.msk.f32.gmra.mxu1 %vm1716_vm9, %v4476_v8  ;;  %v6771_v18 = vpack.i.bf16 %v4447_v6, %v9434_v58  ;;  %v6776_v2 = vpack.i.bf16 %v9402_v13, %v4457_v48  ;;  %v4459_v8 = vmul.f32 %v4451_v25, %v7717_v51  ;;  %v4448_v5 = vmul.f32 %v9436_v32, %v7714_v45  ;;  %v4401_v53 = vld [vmem:[#allocation7 + $0x7] sm:$0xff] }
 0xda9   : > { %6727 = vrot.lane.b32.xlu1 %v6726_v34, %s9928_s29  ;;  %6617 = vmatprep.mubr.msk.f32.mxu1 %vm1716_vm9, %v4477_v38  ;;  %v6781_v62 = vpack.i.bf16 %v4438_v4, %v4466_v39  ;;  %v6791_v27 = vpack.i.bf16 %v4439_v14, %v4467_v46  ;;  %v6786_v0 = vpack.i.bf16 %v9442_v33, %v4458_v21  ;;  %v4460_v34 = vld [vmem:[#allocation7 + $0x4f] sm:$0xff] }
 0xdaa   : > { %6732 = vrot.lane.b32.xlu0 %v6731_v52, %s9927_s3  ;;  %v4478_v61 = vmul.f32 %v4470_v7, %v7717_v51  ;;  %v6796_v52 = vpack.i.bf16 %v9434_v58, %v4459_v8  ;;  %v6801_v23 = vpack.i.bf16 %v4448_v5, %v9467_v37  ;;  %v4449_v38 = vmul.f32 %v4441_v1, %v7727_v56 }
 0xdab   : > { %v4440_v25 = vmul.f32 %v9389_v15, %v7717_v51  ;;  %v4409_v12 = vmul.f32 %v4401_v53, %v7519_v54  ;;  %v4410_v14 = vmul.f32 %v9343_v42, %v7551_v9  ;;  %v4411_v42 = vmul.f32 %v9336_v63, %v7613_v43 }
 0xdac   : > { %6618 = vmatmul.mubr.msk.f32.gmra.mxu1 %vm1716_vm9, %v4478_v61 }
 0xdad   : > { %6737 = vrot.lane.b32.xlu1 %v6736_v24, %s9929_s4  ;;  %v4468_v24 = vmul.f32 %v4460_v34, %v7727_v56 }
 0xdae   : > { %6742 = vrot.lane.b32.xlu0 %v6741_v26, %s9929_s4  ;;  %v6811_v26 = vpack.i.bf16 %v4449_v38, %v4469_v47 }
 0xdaf   : > { %v6806_v19 = vpack.i.bf16 %v4440_v25, %v4468_v24 }
 0xdb1   : > { %6752 = vrot.lane.b32.xlu1 %v6751_v40, %s9927_s3 }
 0xdb2   : > { %6747 = vrot.lane.b32.xlu0 %v6746_v3, %s9928_s29 }
 0xdb5   : > { %6757 = vrot.lane.b32.xlu1 %v6756_v35, %s9928_s29 }
 0xdb6   : > { %6762 = vrot.lane.b32.xlu0 %v6761_v10, %s9927_s3 }
 0xdb9   : > { %6767 = vrot.lane.b32.xlu1 %v6766_v20, %s9929_s4 }
 0xdba   : > { %6772 = vrot.lane.b32.xlu0 %v6771_v18, %s9929_s4 }
 0xdbd   : > { %6782 = vrot.lane.b32.xlu1 %v6781_v62, %s9927_s3 }
 0xdbe   : > { %6777 = vrot.lane.b32.xlu0 %v6776_v2, %s9928_s29 }
 0xdc1   : > { %6787 = vrot.lane.b32.xlu1 %v6786_v0, %s9928_s29 }
 0xdc2   : > { %6792 = vrot.lane.b32.xlu0 %v6791_v27, %s9927_s3 }
 0xdc5   : > { %6802 = vrot.lane.b32.xlu1 %v6801_v23, %s9929_s4 }
 0xdc6   : > { %6797 = vrot.lane.b32.xlu0 %v6796_v52, %s9928_s29 }
 0xdc9   : > { %6807 = vrot.lane.b32.xlu1 %v6806_v19, %s9927_s3  ;;  %s5450_s3 = sshll.u32 %s9933_s24, 1 }
 0xdca   : > { %6812 = vrot.lane.b32.xlu0 %v6811_v26, %s9929_s4  ;;  %s629_s1 = scalar_lea.vmem %s9900_s20, %s5450_s3 }
 0xe0f   : > { %v6698_v41 = vpop.permute.xlu1 %6697 }
 0xe10   : > { %v6703_v51 = vpop.permute.xlu0 %6702  ;;  %v6700_v15 = vunpack.i.h.bf16 %v6698_v41  ;;  %v6699_v40 = vunpack.i.l.bf16 %v6698_v41 }
 0xe11   : > { %v6705_v3 = vunpack.i.h.bf16 %v6703_v51  ;;  %v6704_v30 = vunpack.i.l.bf16 %v6703_v51 }
 0xe12   : > { %v4665_v57 = vsel %vm1716_vm9, %v4409_v12, %v6700_v15  ;;  %v4689_v35 = vsel %vm1716_vm9, %v9380_v44, %v6699_v40 }
 0xe13   : > { %v6708_v10 = vpop.permute.xlu1 %6707  ;;  %v4697_v18 = vsel %vm1881_vm0, %v4689_v35, %v6704_v30  ;;  %v4673_v39 = vsel %vm1881_vm0, %v4665_v57, %v6705_v3 }
 0xe14   : > { %v6713_v36 = vpop.permute.xlu0 %6712  ;;  %v6710_v6 = vunpack.i.h.bf16 %v6708_v10  ;;  %v6709_v20 = vunpack.i.l.bf16 %v6708_v10 }
 0xe15   : > { %v6715_v0 = vunpack.i.h.bf16 %v6713_v36  ;;  %v6714_v8 = vunpack.i.l.bf16 %v6713_v36 }
 0xe16   : > { %v4705_v54 = vsel %vm2948_vm7, %v4697_v18, %v6709_v20  ;;  %v4681_v48 = vsel %vm2948_vm7, %v4673_v39, %v6710_v6 }
 0xe17   : > { %v6723_v1 = vpop.permute.xlu1 %6722  ;;  %4844 = vmatprep.mubr.f32.mxu0 %v4705_v54 }
 0xe18   : > { %v6718_v4 = vpop.permute.xlu0 %6717  ;;  %v6725_v62 = vunpack.i.h.bf16 %v6723_v1  ;;  %v6724_v44 = vunpack.i.l.bf16 %v6723_v1  ;;  %4845 = vmatmul.mubr.f32.vlgmr.msra.gmra.mxu0 %v4681_v48 }
 0xe19   : > { %v6720_v2 = vunpack.i.h.bf16 %v6718_v4  ;;  %v6719_v46 = vunpack.i.l.bf16 %v6718_v4 }
 0xe1b   : > { %v4690_v21 = vsel %vm1716_vm9, %v9361_v59, %v6719_v46  ;;  %v4666_v27 = vsel %vm1716_vm9, %v4410_v14, %v6720_v2  ;;  %v6728_v5 = vpop.permute.xlu1 %6727 }
 0xe1c   : > { %v6733_v7 = vpop.permute.xlu0 %6732  ;;  %v4698_v61 = vsel %vm1881_vm0, %v4690_v21, %v6724_v44  ;;  %v4674_v34 = vsel %vm1881_vm0, %v4666_v27, %v6725_v62  ;;  %v6730_v52 = vunpack.i.h.bf16 %v6728_v5  ;;  %v6729_v9 = vunpack.i.l.bf16 %v6728_v5 }
 0xe1d   : > { %v6735_v23 = vunpack.i.h.bf16 %v6733_v7  ;;  %v6734_v38 = vunpack.i.l.bf16 %v6733_v7  ;;  %v4706_v25 = vsel %vm2948_vm7, %v4698_v61, %v6714_v8  ;;  %v4682_v59 = vsel %vm2948_vm7, %v4674_v34, %v6715_v0 }
 0xe1e   : > { %4849 = vmatprep.mubr.f32.mxu0 %v4706_v25  ;;  %v4691_v47 = vsel %vm1716_vm9, %v9350_v55, %v6729_v9  ;;  %v4667_v24 = vsel %vm1716_vm9, %v4411_v42, %v6730_v52  ;;  %v4412_v55 = vmul.f32 %v9359_v17, %v7624_v49  ;;  %v4413_v17 = vmul.f32 %v9372_v29, %v7670_v16 }
 0xe1f   : > { %4850 = vmatmul.mubr.f32.gmra.mxu0 %v4682_v59  ;;  %v6738_v26 = vpop.permute.xlu1 %6737  ;;  %v4699_v41 = vsel %vm1881_vm0, %v4691_v47, %v6734_v38  ;;  %v4675_v43 = vsel %vm1881_vm0, %v4667_v24, %v6735_v23 }
 0xe20   : > { %v6743_v19 = vpop.permute.xlu0 %6742  ;;  %v6740_v53 = vunpack.i.h.bf16 %v6738_v26  ;;  %v6739_v12 = vunpack.i.l.bf16 %v6738_v26 }
 0xe21   : > { %v6745_v6 = vunpack.i.h.bf16 %v6743_v19  ;;  %v6744_v20 = vunpack.i.l.bf16 %v6743_v19 }
 0xe22   : > { %v4707_v63 = vsel %vm2948_vm7, %v4699_v41, %v6739_v12  ;;  %v4683_v51 = vsel %vm2948_vm7, %v4675_v43, %v6740_v53 }
 0xe23   : > { %v6753_v15 = vpop.permute.xlu1 %6752  ;;  %4854 = vmatprep.mubr.f32.mxu0 %v4707_v63 }
 0xe24   : > { %v6748_v40 = vpop.permute.xlu0 %6747  ;;  %v6755_v3 = vunpack.i.h.bf16 %v6753_v15  ;;  %v6754_v30 = vunpack.i.l.bf16 %v6753_v15  ;;  %4855 = vmatmul.mubr.f32.gmra.mxu0 %v4683_v51 }
 0xe25   : > { %v6750_v57 = vunpack.i.h.bf16 %v6748_v40  ;;  %v6749_v35 = vunpack.i.l.bf16 %v6748_v40 }
 0xe27   : > { %v4692_v10 = vsel %vm1716_vm9, %v9411_v31, %v6749_v35  ;;  %v4668_v36 = vsel %vm1716_vm9, %v4412_v55, %v6750_v57  ;;  %v6758_v18 = vpop.permute.xlu1 %6757 }
 0xe28   : > { %v6763_v39 = vpop.permute.xlu0 %6762  ;;  %v4700_v54 = vsel %vm1881_vm0, %v4692_v10, %v6754_v30  ;;  %v4676_v48 = vsel %vm1881_vm0, %v4668_v36, %v6755_v3  ;;  %v6760_v1 = vunpack.i.h.bf16 %v6758_v18  ;;  %v6759_v49 = vunpack.i.l.bf16 %v6758_v18 }
 0xe29   : > { %v6765_v4 = vunpack.i.h.bf16 %v6763_v39  ;;  %v6764_v14 = vunpack.i.l.bf16 %v6763_v39  ;;  %v4708_v62 = vsel %vm2948_vm7, %v4700_v54, %v6744_v20  ;;  %v4684_v31 = vsel %vm2948_vm7, %v4676_v48, %v6745_v6 }
 0xe2a   : > { %4859 = vmatprep.mubr.f32.mxu0 %v4708_v62  ;;  %v4693_v44 = vsel %vm1716_vm9, %v9402_v13, %v6759_v49  ;;  %v4669_v2 = vsel %vm1716_vm9, %v4413_v17, %v6760_v1  ;;  %v4414_v13 = vmul.f32 %v9404_v50, %v7678_v11  ;;  %v4415_v50 = vmul.f32 %v9418_v60, %v7714_v45 }
 0xe2b   : > { %4860 = vmatmul.mubr.f32.gmra.mxu0 %v4684_v31  ;;  %v6768_v46 = vpop.permute.xlu1 %6767  ;;  %v4701_v8 = vsel %vm1881_vm0, %v4693_v44, %v6764_v14  ;;  %v4677_v16 = vsel %vm1881_vm0, %v4669_v2, %v6765_v4  ;;  %v9556_v31 = vld [vmem:[%s9898_s18] ss:$0 sm:$0xff] }
 0xe2c   : > { %v6773_v21 = vpop.permute.xlu0 %6772  ;;  %v6770_v27 = vunpack.i.h.bf16 %v6768_v46  ;;  %v6769_v0 = vunpack.i.l.bf16 %v6768_v46 }
 0xe2d   : > { %v6775_v25 = vunpack.i.h.bf16 %v6773_v21  ;;  %v6774_v59 = vunpack.i.l.bf16 %v6773_v21 }
 0xe2e   : > { %v4709_v29 = vsel %vm2948_vm7, %v4701_v8, %v6769_v0  ;;  %v4685_v5 = vsel %vm2948_vm7, %v4677_v16, %v6770_v27 }
 0xe2f   : > { %v6783_v7 = vpop.permute.xlu1 %6782  ;;  %4864 = vmatprep.mubr.f32.mxu0 %v4709_v29 }
 0xe30   : > { %v6778_v61 = vpop.permute.xlu0 %6777  ;;  %v6785_v34 = vunpack.i.h.bf16 %v6783_v7  ;;  %v6784_v52 = vunpack.i.l.bf16 %v6783_v7  ;;  %4865 = vmatmul.mubr.f32.gmra.mxu0 %v4685_v5 }
 0xe31   : > { %v6780_v9 = vunpack.i.h.bf16 %v6778_v61  ;;  %v6779_v42 = vunpack.i.l.bf16 %v6778_v61 }
 0xe33   : > { %v4694_v23 = vsel %vm1716_vm9, %v9442_v33, %v6779_v42  ;;  %v4670_v38 = vsel %vm1716_vm9, %v4414_v13, %v6780_v9  ;;  %v6788_v47 = vpop.permute.xlu1 %6787 }
 0xe34   : > { %v6793_v24 = vpop.permute.xlu0 %6792  ;;  %v4702_v26 = vsel %vm1881_vm0, %v4694_v23, %v6784_v52  ;;  %v4678_v19 = vsel %vm1881_vm0, %v4670_v38, %v6785_v34  ;;  %v6790_v53 = vunpack.i.h.bf16 %v6788_v47  ;;  %v6789_v11 = vunpack.i.l.bf16 %v6788_v47 }
 0xe35   : > { %v6795_v12 = vunpack.i.h.bf16 %v6793_v24  ;;  %v6794_v41 = vunpack.i.l.bf16 %v6793_v24  ;;  %v4710_v43 = vsel %vm2948_vm7, %v4702_v26, %v6774_v59  ;;  %v4686_v33 = vsel %vm2948_vm7, %v4678_v19, %v6775_v25 }
 0xe36   : > { %4869 = vmatprep.mubr.f32.mxu0 %v4710_v43  ;;  %v4695_v63 = vsel %vm1716_vm9, %v9434_v58, %v6789_v11  ;;  %v4671_v51 = vsel %vm1716_vm9, %v4415_v50, %v6790_v53  ;;  %v4416_v58 = vmul.f32 %v9436_v32, %v7727_v56  ;;  %v6876_v56 = vmov 3  }
 0xe37   : > { %4870 = vmatmul.mubr.f32.gmra.mxu0 %v4686_v33  ;;  %v6803_v15 = vpop.permute.xlu1 %6802  ;;  %v4703_v45 = vsel %vm1881_vm0, %v4695_v63, %v6794_v41  ;;  %v4679_v60 = vsel %vm1881_vm0, %v4671_v51, %v6795_v12  ;;  %6819 = vset.pattern.permute.xlu0 %v6876_v56  ;;  %v6877_v32 = vmov 0   ;;  %v6878_v34 = vmov 1  }
 0xe38   : > { %v6798_v40 = vpop.permute.xlu0 %6797  ;;  %v6805_v55 = vunpack.i.h.bf16 %v6803_v15  ;;  %v6804_v3 = vunpack.i.l.bf16 %v6803_v15  ;;  %6816 = vset.pattern.permute.xlu1 %v6877_v32  ;;  %v6879_v38 = vmov 2  }
 0xe39   : > { %v6800_v30 = vunpack.i.h.bf16 %v6798_v40  ;;  %v6799_v57 = vunpack.i.l.bf16 %v6798_v40 }
 0xe3a   : > { %v4711_v35 = vsel %vm2948_vm7, %v4703_v45, %v6804_v3  ;;  %v4687_v10 = vsel %vm2948_vm7, %v4679_v60, %v6805_v55 }
 0xe3b   : > { %v6808_v36 = vpop.permute.xlu1 %6807  ;;  %4874 = vmatprep.mubr.f32.mxu0 %v4711_v35  ;;  %v4696_v48 = vsel %vm1716_vm9, %v9467_v37, %v6799_v57  ;;  %v4672_v1 = vsel %vm1716_vm9, %v4416_v58, %v6800_v30  ;;  %vm5387_vm9 = vcmp.lt.s32.totalorder %v1285_v22, 256 }
 0xe3c   : > { %v6813_v6 = vpop.permute.xlu0 %6812  ;;  %v6810_v20 = vunpack.i.h.bf16 %v6808_v36  ;;  %v6809_v18 = vunpack.i.l.bf16 %v6808_v36  ;;  %4875 = vmatmul.mubr.f32.gmra.mxu0 %v4687_v10 }
 0xe3d   : > { %v6815_v39 = vunpack.i.h.bf16 %v6813_v6  ;;  %v6814_v54 = vunpack.i.l.bf16 %v6813_v6 }
 0xe3e   : > { %v4704_v49 = vsel %vm1881_vm0, %v4696_v48, %v6809_v18  ;;  %v4680_v17 = vsel %vm1881_vm0, %v4672_v1, %v6810_v20 }
 0xe3f   : > { %v4712_v4 = vsel %vm2948_vm7, %v4704_v49, %v6814_v54  ;;  %v4688_v14 = vsel %vm2948_vm7, %v4680_v17, %v6815_v39 }
 0xe40   : > { %4879 = vmatprep.mubr.f32.mxu0 %v4712_v4 }
 0xe41   : > { %4880 = vmatmul.mubr.f32.gmra.mxu0 %v4688_v14  ;;  %v5355_v14 = vld [vmem:[#allocation8] sm:$0x1] }
 0xe60   : > { %v6610_v37 = vpop.f32.mrf.mxu1 }
 0xe62   : > { %v4951_v21 = vpop.f32.mrf.mxu1 }
 0xe64   : > { %v6613_v42 = vpop.f32.mrf.mxu1 }
 0xe66   : > { %v4961_v47 = vpop.f32.mrf.mxu1 }
 0xe68   : > { %v6616_v11 = vpop.f32.mrf.mxu1 }
 0xe6a   : > { %v4971_v63 = vpop.f32.mrf.mxu1 }
 0xe6c   : > { %v6619_v10 = vpop.f32.mrf.mxu1 }
 0xe6e   : > { %v4981_v20 = vpop.f32.mrf.mxu1 }
 0xed8   : > { %v6319_v62 = vpop.f32.mrf.mxu0 }
 0xeda   : > { %v6320_v44 = vpop.f32.mrf.mxu0 }
 0xedb   : > { %v6321_v2 = vadd.f32 %v6320_v44, %v6319_v62 }
 0xedd   : > { %v4847_v46 = vadd.f32 %v6321_v2, %v9556_v31 }
 0xedf   : > { %v4952_v27 = vadd.f32 %v4951_v21, %v4847_v46  ;;  %v6322_v0 = vpop.f32.mrf.mxu0 }
 0xee1   : > { %v4990_v8 = vmax.f32 %v4952_v27, 0.0  ;;  %v6323_v16 = vpop.f32.mrf.mxu0 }
 0xee2   : > { %v6324_v29 = vadd.f32 %v6323_v16, %v6322_v0 }
 0xee3   : > { %5266 = vperm.xlu0 %6819, %v4990_v8   ;;  %5016 = vperm.xlu1 %6816, %v4990_v8  }
 0xee4   : > { %v4852_v5 = vadd.f32 %v6324_v29, %v9556_v31  ;;  %v6325_v7 = vpop.f32.mrf.mxu0 }
 0xee6   : > { %v4957_v61 = vadd.f32 %v6610_v37, %v4852_v5  ;;  %v6326_v13 = vpop.f32.mrf.mxu0 }
 0xee7   : > { %6817 = vset.pattern.permute.xlu1 %v6878_v34  ;;  %6820 = vset.pattern.permute.xlu0 %v6877_v32  ;;  %v6327_v9 = vadd.f32 %v6326_v13, %v6325_v7 }
 0xee8   : > { %v4991_v52 = vmax.f32 %v4957_v61, 0.0  ;;  %5104 = vperm.xlu1 %6817, %v4990_v8  }
 0xee9   : > { %v4857_v25 = vadd.f32 %v6327_v9, %v9556_v31  ;;  %v4999_v9 = vld [vmem:[%s9886_s6 + $0x8] sm:$0xff] }
 0xeea   : > { %5021 = vperm.xlu0 %6820, %v4991_v52  }
 0xeeb   : > { %v6328_v23 = vpop.f32.mrf.mxu0  ;;  %v4962_v53 = vadd.f32 %v4961_v47, %v4857_v25  ;;  %v5561_v25 = vld [vmem:[%s9886_s6 + $0x98] sm:$0xff]  ;;  %v5000_v47 = vld [vmem:[%s9886_s6 + $0x10] sm:$0xff] }
 0xeec   : > { %6818 = vset.pattern.permute.xlu1 %v6879_v38 }
 0xeed   : > { %v6329_v59 = vpop.f32.mrf.mxu0  ;;  %5185 = vperm.xlu1 %6818, %v4990_v8   ;;  %v4992_v43 = vmax.f32 %v4962_v53, 0.0  ;;  %v5576_v53 = vld [vmem:[%s9886_s6 + $0x110] sm:$0xff] }
 0xeee   : > { %v6330_v24 = vadd.f32 %v6329_v59, %v6328_v23  ;;  %6821 = vset.pattern.permute.xlu0 %v6878_v34  ;;  %v5559_v23 = vld [vmem:[%s9886_s6 + $0x88] sm:$0xff] }
 0xeef   : > { %5108 = vperm.xlu0 %6821, %v4991_v52  }
 0xef0   : > { %v4862_v26 = vadd.f32 %v6330_v24, %v9556_v31  ;;  %v6331_v19 = vpop.f32.mrf.mxu0  ;;  %v5001_v24 = vld [vmem:[%s9886_s6 + $0x18] sm:$0xff] }
 0xef1   : > { %6823 = vset.pattern.permute.xlu1 %v6876_v56 }
 0xef2   : > { %v4967_v50 = vadd.f32 %v6613_v42, %v4862_v26  ;;  %v6332_v12 = vpop.f32.mrf.mxu0  ;;  %5270 = vperm.xlu1 %6823, %v4991_v52   ;;  %v5558_v42 = vld [vmem:[%s9886_s6 + $0x80] sm:$0xff] }
 0xef3   : > { %v6333_v41 = vadd.f32 %v6332_v12, %v6331_v19  ;;  %6822 = vset.pattern.permute.xlu0 %v6879_v38  ;;  %v5574_v26 = vld [vmem:[%s9886_s6 + $0x100] sm:$0xff]  ;;  %v5575_v19 = vld [vmem:[%s9886_s6 + $0x108] sm:$0xff] }
 0xef4   : > { %5189 = vperm.xlu0 %6822, %v4991_v52   ;;  %v4993_v51 = vmax.f32 %v4967_v50, 0.0  ;;  %v4998_v52 = vld [vmem:[%s9886_s6] sm:$0xff] }
 0xef5   : > { %v4867_v33 = vadd.f32 %v6333_v41, %v9556_v31 }
 0xef6   : > { %6824 = vset.pattern.permute.xlu1 %v6877_v32 }
 0xef7   : > { %v4972_v15 = vadd.f32 %v4971_v63, %v4867_v33  ;;  %v6334_v40 = vpop.f32.mrf.mxu0  ;;  %5026 = vperm.xlu1 %6824, %v4992_v43  }
 0xef8   : > { %5197 = vperm.xlu0 %6822, %v4993_v51  }
 0xef9   : > { %v4994_v55 = vmax.f32 %v4972_v15, 0.0  ;;  %v6335_v3 = vpop.f32.mrf.mxu0 }
 0xefa   : > { %v6336_v30 = vadd.f32 %v6335_v3, %v6334_v40 }
 0xefb   : > { %6825 = vset.pattern.permute.xlu1 %v6878_v34 }
 0xefc   : > { %6831 = vset.pattern.permute.xlu0 %v6877_v32  ;;  %v6337_v57 = vpop.f32.mrf.mxu0  ;;  %5112 = vperm.xlu1 %6825, %v4992_v43   ;;  %v4872_v45 = vadd.f32 %v6336_v30, %v9556_v31 }
 0xefd   : > { %5036 = vperm.xlu0 %6831, %v4994_v55  }
 0xefe   : > { %v6338_v60 = vpop.f32.mrf.mxu0  ;;  %v4977_v36 = vadd.f32 %v6616_v11, %v4872_v45  ;;  %v5577_v11 = vld [vmem:[%s9886_s6 + $0x118] sm:$0xff]  ;;  %v5562_v45 = vld [vmem:[%s9886_s6 + $0xa0] sm:$0xff] }
 0xeff   : > { %v6339_v35 = vadd.f32 %v6338_v60, %v6337_v57  ;;  %v5563_v60 = vld [vmem:[%s9886_s6 + $0xa8] sm:$0xff] }
 0xf00   : > { %6826 = vset.pattern.permute.xlu1 %v6879_v38  ;;  %v4995_v18 = vmax.f32 %v4977_v36, 0.0 }
 0xf01   : > { %6833 = vset.pattern.permute.xlu0 %v6879_v38  ;;  %v6340_v6 = vpop.f32.mrf.mxu0  ;;  %5193 = vperm.xlu1 %6826, %v4992_v43   ;;  %v4877_v58 = vadd.f32 %v6339_v35, %v9556_v31  ;;  %v5590_v35 = vld [vmem:[%s9886_s6 + $0x180] sm:$0xff] }
 0xf02   : > { %5201 = vperm.xlu0 %6833, %v4994_v55  }
 0xf03   : > { %v6341_v39 = vpop.f32.mrf.mxu0  ;;  %v4982_v54 = vadd.f32 %v4981_v20, %v4877_v58 }
 0xf04   : > { %v6342_v48 = vadd.f32 %v6341_v39, %v6340_v6  ;;  %v5003_v39 = vld [vmem:[%s9886_s6 + $0x28] sm:$0xff] }
 0xf05   : > { %6827 = vset.pattern.permute.xlu1 %v6876_v56  ;;  %v4996_v1 = vmax.f32 %v4982_v54, 0.0  ;;  %v5578_v54 = vld [vmem:[%s9886_s6 + $0x120] sm:$0xff] }
 0xf06   : > { %6838 = vset.pattern.permute.xlu0 %v6876_v56  ;;  %5274 = vperm.xlu1 %6827, %v4992_v43   ;;  %v4882_v49 = vadd.f32 %v6342_v48, %v9556_v31  ;;  %v5579_v48 = vld [vmem:[%s9886_s6 + $0x128] sm:$0xff] }
 0xf07   : > { %5286 = vperm.xlu0 %6838, %v4995_v18  }
 0xf08   : > { %v4987_v17 = vadd.f32 %v6619_v10, %v4882_v49  ;;  %v5002_v10 = vld [vmem:[%s9886_s6 + $0x20] sm:$0xff]  ;;  %v5591_v49 = vld [vmem:[%s9886_s6 + $0x188] sm:$0xff] }
 0xf0a   : > { %6828 = vset.pattern.permute.xlu1 %v6877_v32  ;;  %v4997_v4 = vmax.f32 %v4987_v17, 0.0  ;;  %v5592_v17 = vld [vmem:[%s9886_s6 + $0x190] sm:$0xff] }
 0xf0b   : > { %6839 = vset.pattern.permute.xlu0 %v6877_v32  ;;  %5031 = vperm.xlu1 %6828, %v4993_v51  }
 0xf0c   : > { %5046 = vperm.xlu0 %6839, %v4996_v1  }
 0xf0f   : > { %6829 = vset.pattern.permute.xlu1 %v6878_v34 }
 0xf10   : > { %6840 = vset.pattern.permute.xlu0 %v6878_v34  ;;  %5116 = vperm.xlu1 %6829, %v4993_v51  }
 0xf11   : > { %5128 = vperm.xlu0 %6840, %v4996_v1  }
 0xf14   : > { %6830 = vset.pattern.permute.xlu1 %v6876_v56 }
 0xf15   : > { %6841 = vset.pattern.permute.xlu0 %v6877_v32  ;;  %5278 = vperm.xlu1 %6830, %v4993_v51  }
 0xf16   : > { %5051 = vperm.xlu0 %6841, %v4997_v4  }
 0xf19   : > { %6832 = vset.pattern.permute.xlu1 %v6878_v34 }
 0xf1a   : > { %6845 = vset.pattern.permute.xlu0 %v6876_v56  ;;  %5120 = vperm.xlu1 %6832, %v4994_v55  }
 0xf1b   : > { %5294 = vperm.xlu0 %6845, %v4997_v4  }
 0xf1e   : > { %6834 = vset.pattern.permute.xlu1 %v6876_v56 }
 0xf1f   : > { %5282 = vperm.xlu1 %6834, %v4994_v55   ;;  %6847 = vset.pattern.permute.xlu0 %v6877_v32 }
 0xf23   : > { %6835 = vset.pattern.permute.xlu1 %v6877_v32 }
 0xf24   : > { %5041 = vperm.xlu1 %6835, %v4995_v18  }
 0xf28   : > { %6836 = vset.pattern.permute.xlu1 %v6878_v34 }
 0xf29   : > { %5124 = vperm.xlu1 %6836, %v4995_v18  }
 0xf2d   : > { %6837 = vset.pattern.permute.xlu1 %v6879_v38 }
 0xf2e   : > { %5205 = vperm.xlu1 %6837, %v4995_v18  }
 0xf32   : > { %5209 = vperm.xlu1 %6837, %v4996_v1  }
 0xf36   : > { %6842 = vset.pattern.permute.xlu1 %v6878_v34 }
 0xf37   : > { %5132 = vperm.xlu1 %6842, %v4997_v4  }
 0xf3b   : > { %6843 = vset.pattern.permute.xlu1 %v6879_v38  ;;  %v5560_v38 = vld [vmem:[%s9886_s6 + $0x90] sm:$0xff] }
 0xf3c   : > { %5213 = vperm.xlu1 %6843, %v4997_v4   ;;  %v5593_v4 = vld [vmem:[%s9886_s6 + $0x198] sm:$0xff] }
 0xf40   : > { %6844 = vset.pattern.permute.xlu1 %v6876_v56 }
 0xf41   : > { %5290 = vperm.xlu1 %6844, %v4996_v1  }
 0xf45   : > { %6846 = vset.pattern.permute.xlu1 %v6877_v32 }
 0xf46   : > { %5358 = vperm.xlu1 %6846, %v5355_v14  }
 0xf5e   : > { %v5017_v62 = vpop.permute.xlu1 %5016  ;;  %v9600_v21 = vpop.permute.xlu0 %5266 }
 0xf5f   : > { %v5054_v63 = vmul.f32 %v5017_v62, %v4998_v52  ;;  %v5055_v51 = vmul.f32 %v5017_v62, %v4999_v9  ;;  %v5595_v52 = vld [vmem:[%s9886_s6 + $0x1a8] sm:$0xff] }
 0xf63   : > { %v5105_v37 = vpop.permute.xlu1 %5104 }
 0xf64   : > { %v5135_v12 = vmul.f32 %v5558_v42, %v5105_v37  ;;  %v5136_v41 = vmul.f32 %v5559_v23, %v5105_v37 }
 0xf65   : > { %v5022_v0 = vpop.permute.xlu0 %5021 }
 0xf66   : > { %v5056_v15 = vmul.f32 %v5022_v0, %v5000_v47  ;;  %v5057_v40 = vmul.f32 %v5022_v0, %v5001_v24  ;;  %v5151_v6 = vadd.f32 %v5135_v12, %v5054_v63  ;;  %v5152_v58 = vadd.f32 %v5136_v41, %v5055_v51 }
 0xf67   : > { %v5297_v47 = vmul.f32 %v5590_v35, %v9600_v21  ;;  %v5298_v24 = vmul.f32 %v5591_v49, %v9600_v21  ;;  %v5005_v21 = vld [vmem:[%s9886_s6 + $0x38] sm:$0xff] }
 0xf68   : > { %v5186_v31 = vpop.permute.xlu1 %5185  ;;  %v5601_v49 = vld [vmem:[%s9886_s6 + $0x1d8] sm:$0xff] }
 0xf69   : > { %v5216_v55 = vmul.f32 %v5574_v26, %v5186_v31  ;;  %v5217_v3 = vmul.f32 %v5575_v19, %v5186_v31 }
 0xf6a   : > { %v5109_v56 = vpop.permute.xlu0 %5108 }
 0xf6b   : > { %v5137_v43 = vmul.f32 %v5560_v38, %v5109_v56  ;;  %v5138_v33 = vmul.f32 %v5561_v25, %v5109_v56  ;;  %v5232_v37 = vadd.f32 %v5216_v55, %v5151_v6  ;;  %v5233_v31 = vadd.f32 %v5217_v3, %v5152_v58  ;;  %v5564_v38 = vld [vmem:[%s9886_s6 + $0xb0] sm:$0xff]  ;;  %v5565_v25 = vld [vmem:[%s9886_s6 + $0xb8] sm:$0xff] }
 0xf6d   : > { %v9596_v44 = vpop.permute.xlu1 %5270  ;;  %v5153_v20 = vadd.f32 %v5137_v43, %v5056_v15  ;;  %v5154_v18 = vadd.f32 %v5138_v33, %v5057_v40  ;;  %v5567_v43 = vld [vmem:[%s9886_s6 + $0xc8] sm:$0xff]  ;;  %v5313_v63 = vadd.f32 %v5297_v47, %v5232_v37  ;;  %v5314_v51 = vadd.f32 %v5298_v24, %v5233_v31  ;;  %v5581_v15 = vld [vmem:[%s9886_s6 + $0x138] sm:$0xff]  ;;  %v5584_v24 = vld [vmem:[%s9886_s6 + $0x150] sm:$0xff] }
 0xf6e   : > { %v5299_v26 = vmul.f32 %v5592_v17, %v9596_v44  ;;  %v5569_v31 = vld [vmem:[%s9886_s6 + $0xd8] sm:$0xff] }
 0xf6f   : > { %v5190_v32 = vpop.permute.xlu0 %5189  ;;  %v5009_v47 = vld [vmem:[%s9886_s6 + $0x58] sm:$0xff] }
 0xf70   : > { %v5218_v30 = vmul.f32 %v5576_v53, %v5190_v32  ;;  %v5219_v57 = vmul.f32 %v5577_v11, %v5190_v32  ;;  %v5594_v32 = vld [vmem:[%s9886_s6 + $0x1a0] sm:$0xff] }
 0xf72   : > { %v9598_v2 = vpop.permute.xlu1 %5026  ;;  %v5234_v0 = vadd.f32 %v5218_v30, %v5153_v20  ;;  %v5235_v56 = vadd.f32 %v5219_v57, %v5154_v18  ;;  %v5006_v57 = vld [vmem:[%s9886_s6 + $0x40] sm:$0xff] }
 0xf73   : > { %v9612_v7 = vpop.permute.xlu0 %5197  ;;  %v5058_v9 = vmul.f32 %v9598_v2, %v5002_v10  ;;  %v5059_v42 = vmul.f32 %v9598_v2, %v5003_v39  ;;  %v5300_v2 = vmul.f32 %v5593_v4, %v9596_v44  ;;  %v5566_v44 = vld [vmem:[%s9886_s6 + $0xc0] sm:$0xff] }
 0xf74   : > { %v5315_v3 = vadd.f32 %v5299_v26, %v5234_v0  ;;  %v5582_v10 = vld [vmem:[%s9886_s6 + $0x140] sm:$0xff]  ;;  %v5585_v26 = vld [vmem:[%s9886_s6 + $0x158] sm:$0xff] }
 0xf75   : > { %v5316_v30 = vadd.f32 %v5300_v2, %v5235_v56 }
 0xf77   : > { %v5113_v46 = vpop.permute.xlu1 %5112 }
 0xf78   : > { %v9616_v13 = vpop.permute.xlu0 %5036  ;;  %v5139_v14 = vmul.f32 %v5562_v45, %v5113_v46  ;;  %v5140_v62 = vmul.f32 %v5563_v60, %v5113_v46  ;;  %v5007_v45 = vld [vmem:[%s9886_s6 + $0x48] sm:$0xff] }
 0xf7a   : > { %v5155_v19 = vadd.f32 %v5139_v14, %v5058_v9  ;;  %v5156_v53 = vadd.f32 %v5140_v62, %v5059_v42  ;;  %v5597_v42 = vld [vmem:[%s9886_s6 + $0x1b8] sm:$0xff] }
 0xf7c   : > { %v9602_v27 = vpop.permute.xlu1 %5193 }
 0xf7d   : > { %v9638_v59 = vpop.permute.xlu0 %5201  ;;  %v5220_v23 = vmul.f32 %v5578_v54, %v9602_v27  ;;  %v5221_v46 = vmul.f32 %v5579_v48, %v9602_v27  ;;  %v5004_v27 = vld [vmem:[%s9886_s6 + $0x30] sm:$0xff]  ;;  %v5223_v54 = vmul.f32 %v5581_v15, %v9612_v7  ;;  %v5570_v15 = vld [vmem:[%s9886_s6 + $0xe0] sm:$0xff] }
 0xf7e   : > { %v5600_v48 = vld [vmem:[%s9886_s6 + $0x1d0] sm:$0xff]  ;;  %v5224_v0 = vmul.f32 %v5582_v10, %v9638_v59  ;;  %v5573_v10 = vld [vmem:[%s9886_s6 + $0xf8] sm:$0xff] }
 0xf7f   : > { %v5236_v60 = vadd.f32 %v5220_v23, %v5155_v19  ;;  %v5237_v35 = vadd.f32 %v5221_v46, %v5156_v53  ;;  %v5008_v23 = vld [vmem:[%s9886_s6 + $0x50] sm:$0xff]  ;;  %v5599_v19 = vld [vmem:[%s9886_s6 + $0x1c8] sm:$0xff] }
 0xf81   : > { %v9604_v8 = vpop.permute.xlu1 %5274 }
 0xf82   : > { %v9672_v36 = vpop.permute.xlu0 %5286  ;;  %v5301_v11 = vmul.f32 %v5594_v32, %v9604_v8  ;;  %v5302_v12 = vmul.f32 %v5595_v52, %v9604_v8  ;;  %v5580_v8 = vld [vmem:[%s9886_s6 + $0x130] sm:$0xff]  ;;  %v5329_v32 = vadd.f32 %v5315_v3, %v5313_v63  ;;  %v5342_v52 = vadd.f32 %v5316_v30, %v5314_v51 }
 0xf83   : > { %v5222_v39 = vmul.f32 %v5580_v8, %v9612_v7  ;;  %v5568_v7 = vld [vmem:[%s9886_s6 + $0xd0] sm:$0xff]  ;;  %v9786_v46 = vmul.f32 %v5600_v48, %v9672_v36 }
 0xf84   : > { %v5317_v17 = vadd.f32 %v5301_v11, %v5236_v60  ;;  %v5318_v4 = vadd.f32 %v5302_v12, %v5237_v35  ;;  %v5010_v12 = vld [vmem:[%s9886_s6 + $0x60] sm:$0xff]  ;;  %v5572_v35 = vld [vmem:[%s9886_s6 + $0xf0] sm:$0xff] }
 0xf86   : > { %v9606_v16 = vpop.permute.xlu1 %5031  ;;  %v5330_v2 = vadd.f32 %v5329_v32, %v5317_v17  ;;  %v5588_v17 = vld [vmem:[%s9886_s6 + $0x170] sm:$0xff] }
 0xf87   : > { %v9719_v41 = vpop.permute.xlu0 %5046  ;;  %v5060_v6 = vmul.f32 %v9606_v16, %v5004_v27  ;;  %v5061_v58 = vmul.f32 %v9606_v16, %v5005_v21  ;;  %v5062_v16 = vmul.f32 %v9616_v13, %v5006_v57  ;;  %v5343_v27 = vadd.f32 %v5342_v52, %v5318_v4  ;;  %v5011_v21 = vld [vmem:[%s9886_s6 + $0x68] sm:$0xff]  ;;  %v5589_v4 = vld [vmem:[%s9886_s6 + $0x178] sm:$0xff] }
 0xf8b   : > { %v9608_v29 = vpop.permute.xlu1 %5116 }
 0xf8c   : > { %v5141_v40 = vmul.f32 %v5564_v38, %v9608_v29  ;;  %v5142_v55 = vmul.f32 %v5565_v25, %v9608_v29  ;;  %v5583_v29 = vld [vmem:[%s9886_s6 + $0x148] sm:$0xff]  ;;  %v5129_v9 = vpop.permute.xlu0 %5128 }
 0xf8d   : > { %v5225_v56 = vmul.f32 %v5583_v29, %v9638_v59  ;;  %v9789_v59 = vmul.f32 %v5601_v49, %v9672_v36  ;;  %v5598_v36 = vld [vmem:[%s9886_s6 + $0x1c0] sm:$0xff]  ;;  %v5067_v29 = vmul.f32 %v9719_v41, %v5011_v21 }
 0xf8e   : > { %v5157_v62 = vadd.f32 %v5141_v40, %v5060_v6  ;;  %v5158_v37 = vadd.f32 %v5142_v55, %v5061_v58 }
 0xf90   : > { %v9610_v5 = vpop.permute.xlu1 %5278 }
 0xf91   : > { %v5304_v51 = vmul.f32 %v5597_v42, %v9610_v5  ;;  %v5052_v6 = vpop.permute.xlu0 %5051 }
 0xf95   : > { %v9614_v61 = vpop.permute.xlu1 %5120 }
 0xf96   : > { %v5143_v20 = vmul.f32 %v5566_v44, %v9614_v61  ;;  %v5144_v18 = vmul.f32 %v5567_v43, %v9614_v61  ;;  %v5063_v61 = vmul.f32 %v9616_v13, %v5007_v45  ;;  %v5596_v13 = vld [vmem:[%s9886_s6 + $0x1b0] sm:$0xff]  ;;  %v5238_v44 = vadd.f32 %v5222_v39, %v5157_v62 }
 0xf97   : > { %v5239_v43 = vadd.f32 %v5223_v54, %v5158_v37  ;;  %v5303_v63 = vmul.f32 %v5596_v13, %v9610_v5  ;;  %v5147_v39 = vmul.f32 %v5570_v15, %v5129_v9 }
 0xf98   : > { %v5159_v38 = vadd.f32 %v5143_v20, %v5062_v16  ;;  %v5160_v25 = vadd.f32 %v5144_v18, %v5063_v61  ;;  %v5587_v18 = vld [vmem:[%s9886_s6 + $0x168] sm:$0xff] }
 0xf99   : > { %v5319_v48 = vadd.f32 %v5303_v63, %v5238_v44  ;;  %v5320_v49 = vadd.f32 %v5304_v51, %v5239_v43 }
 0xf9a   : > { %v9618_v34 = vpop.permute.xlu1 %5282  ;;  %v5240_v57 = vadd.f32 %v5224_v0, %v5159_v38  ;;  %v5241_v45 = vadd.f32 %v5225_v56, %v5160_v25 }
 0xf9b   : > { %v5305_v5 = vmul.f32 %v5598_v36, %v9618_v34  ;;  %v5306_v60 = vmul.f32 %v5599_v19, %v9618_v34  ;;  %v5586_v34 = vld [vmem:[%s9886_s6 + $0x160] sm:$0xff]  ;;  %v5331_v25 = vadd.f32 %v5330_v2, %v5319_v48  ;;  %v5605_v36 = vld [vmem:[%s9886_s6 + $0x1f8] sm:$0xff]  ;;  %v5295_v19 = vpop.permute.xlu0 %5294 }
 0xf9d   : > { %v5322_v0 = vadd.f32 %v5306_v60, %v5241_v45 }
 0xf9f   : > { %v9658_v50 = vpop.permute.xlu1 %5041 }
 0xfa0   : > { %v5064_v40 = vmul.f32 %v9658_v50, %v5008_v23  ;;  %v5065_v55 = vmul.f32 %v9658_v50, %v5009_v47  ;;  %v5066_v50 = vmul.f32 %v9719_v41, %v5010_v12  ;;  %v5013_v41 = vld [vmem:[%s9886_s6 + $0x78] sm:$0xff]  ;;  %v5344_v47 = vadd.f32 %v5343_v27, %v5320_v49 }
 0xfa2   : > { %v5163_v23 = vadd.f32 %v5147_v39, %v5066_v50  ;;  %v5345_v21 = vadd.f32 %v5344_v47, %v5322_v0 }
 0xfa4   : > { %v9683_v1 = vpop.permute.xlu1 %5124 }
 0xfa5   : > { %v5145_v53 = vmul.f32 %v5568_v7, %v9683_v1  ;;  %v5146_v11 = vmul.f32 %v5569_v31, %v9683_v1  ;;  %v5571_v1 = vld [vmem:[%s9886_s6 + $0xe8] sm:$0xff]  ;;  %v5321_v31 = vadd.f32 %v5305_v5, %v5240_v57 }
 0xfa6   : > { %v5148_v54 = vmul.f32 %v5571_v1, %v5129_v9  ;;  %v5069_v9 = vmul.f32 %v5052_v6, %v5013_v41 }
 0xfa7   : > { %v5161_v58 = vadd.f32 %v5145_v53, %v5064_v40  ;;  %v5162_v20 = vadd.f32 %v5146_v11, %v5065_v55  ;;  %v5332_v12 = vadd.f32 %v5331_v25, %v5321_v31  ;;  %v5312_v55 = vmul.f32 %v5605_v36, %v5295_v19 }
 0xfa8   : > { %v5164_v38 = vadd.f32 %v5148_v54, %v5067_v29 }
 0xfa9   : > { %v9730_v33 = vpop.permute.xlu1 %5205 }
 0xfaa   : > { %v5226_v3 = vmul.f32 %v5584_v24, %v9730_v33  ;;  %v5227_v30 = vmul.f32 %v5585_v26, %v9730_v33  ;;  %v5012_v33 = vld [vmem:[%s9886_s6 + $0x70] sm:$0xff]  ;;  %v5602_v24 = vld [vmem:[%s9886_s6 + $0x1e0] sm:$0xff]  ;;  %v5603_v26 = vld [vmem:[%s9886_s6 + $0x1e8] sm:$0xff] }
 0xfab   : > { %v5068_v52 = vmul.f32 %v5052_v6, %v5012_v33 }
 0xfac   : > { %v5242_v16 = vadd.f32 %v5226_v3, %v5161_v58  ;;  %v5243_v61 = vadd.f32 %v5227_v30, %v5162_v20 }
 0xfad   : > { %v9764_v14 = vpop.permute.xlu1 %5209 }
 0xfae   : > { %v5228_v56 = vmul.f32 %v5586_v34, %v9764_v14  ;;  %v5229_v32 = vmul.f32 %v5587_v18, %v9764_v14  ;;  %v5604_v14 = vld [vmem:[%s9886_s6 + $0x1f0] sm:$0xff]  ;;  %v5323_v2 = vadd.f32 %v9786_v46, %v5242_v16  ;;  %v5324_v27 = vadd.f32 %v9789_v59, %v5243_v61 }
 0xfaf   : > { %v5311_v40 = vmul.f32 %v5604_v14, %v5295_v19  ;;  %v5363_v34 = vsub.s32 0, %v7487_v28  ;;  %v6880_v18 = vmov 1966171168  }
 0xfb0   : > { %v5244_v44 = vadd.f32 %v5228_v56, %v5163_v23  ;;  %v5245_v43 = vadd.f32 %v5229_v32, %v5164_v38  ;;  %v5333_v3 = vadd.f32 %v5332_v12, %v5323_v2  ;;  %v5346_v30 = vadd.f32 %v5345_v21, %v5324_v27 }
 0xfb1   : > { %v5371_v39 = vunpack.c.l.s4 %v6880_v18 }
 0xfb2   : > { %v5133_v8 = vpop.permute.xlu1 %5132 }
 0xfb3   : > { %v5149_v62 = vmul.f32 %v5572_v35, %v5133_v8  ;;  %v5150_v37 = vmul.f32 %v5573_v10, %v5133_v8 }
 0xfb5   : > { %v5165_v53 = vadd.f32 %v5149_v62, %v5068_v52  ;;  %v5166_v11 = vadd.f32 %v5150_v37, %v5069_v9 }
 0xfb7   : > { %v5214_v7 = vpop.permute.xlu1 %5213 }
 0xfb8   : > { %v5230_v13 = vmul.f32 %v5588_v17, %v5214_v7  ;;  %v5231_v42 = vmul.f32 %v5589_v4, %v5214_v7  ;;  %v5372_v4 = vunpack.c.0.s8 %v5371_v39 }
 0xfba   : > { %v5246_v51 = vadd.f32 %v5230_v13, %v5165_v53  ;;  %v5247_v8 = vadd.f32 %v5231_v42, %v5166_v11  ;;  %v5375_v37 = vsub.s32 %v5372_v4, %v7487_v28 }
 0xfbc   : > { %v5291_v63 = vpop.permute.xlu1 %5290  ;;  %v5327_v46 = vadd.f32 %v5311_v40, %v5246_v51  ;;  %v5328_v5 = vadd.f32 %v5312_v55, %v5247_v8 }
 0xfbd   : > { %v5309_v15 = vmul.f32 %v5602_v24, %v5291_v63  ;;  %v5310_v1 = vmul.f32 %v5603_v26, %v5291_v63 }
 0xfbf   : > { %v5325_v57 = vadd.f32 %v5309_v15, %v5244_v44  ;;  %v5326_v45 = vadd.f32 %v5310_v1, %v5245_v43 }
 0xfc1   : > { %v5334_v59 = vadd.f32 %v5333_v3, %v5325_v57  ;;  %v5347_v60 = vadd.f32 %v5346_v30, %v5326_v45  ;;  %v5359_v54 = vpop.permute.xlu1 %5358 }
 0xfc2   : > { %v5364_v16 = vrot.slane %v5359_v54, %v5363_v34 }
 0xfc3   : > { %v5335_v35 = vadd.f32 %v5334_v59, %v5327_v46  ;;  %v5348_v10 = vadd.f32 %v5347_v60, %v5328_v5 }
 0xfc5   : > { %v5336_v50 = vrot.slane %v5335_v35, 4  ;;  %v5349_v29 = vrot.slane %v5348_v10, 4 }
 0xfc7   : > { %v5337_v33 = vadd.f32 %v5336_v50, %v5335_v35  ;;  %v5350_v6 = vadd.f32 %v5349_v29, %v5348_v10 }
 0xfc9   : > { %v5338_v58 = vrot.slane %v5337_v33, 2  ;;  %v5351_v20 = vrot.slane %v5350_v6, 2 }
 0xfcb   : > { %v5339_v41 = vadd.f32 %v5338_v58, %v5337_v33  ;;  %v5352_v48 = vadd.f32 %v5351_v20, %v5350_v6 }
 0xfcd   : > { %v5340_v49 = vrot.slane %v5339_v41, 1  ;;  %v5353_v17 = vrot.slane %v5352_v48, 1 }
 0xfcf   : > { %v5341_v61 = vadd.f32 %v5340_v49, %v5339_v41  ;;  %v5354_v62 = vadd.f32 %v5353_v17, %v5352_v48 }
 0xfd1   : > { %v5365_v7 = vadd.f32 %v5364_v16, %v5341_v61  ;;  %v5366_v31 = vadd.f32 %v5364_v16, %v5354_v62 }
 0xfd3   : > { %v5369_v0 = vcombine.low %v5365_v7, %v5366_v31 }
 0xfd5   : > { %v5376_v56 = vrot.slane %v5369_v0, %v5375_v37 }
 0xfd7   : > { %v5383_v32 = vrot.slane %v5376_v56, %v5375_v37 }
 0xfd9   : > { %5389 = vst.msk [vmem:[%s629_s1] sm:$0x3] %vm5387_vm9, %v5383_v32 }
 0xfda PF: > { %s32_s23 = sadd.s32 1, %s6856_s23  }
 0xfdb   : > { %p29_p4 = scmp.ge.s32.totalorder %s32_s23, 4  }
 0xfdd   :  { %31 = sbr.rel (!%p29_p4) target bundleno = 8 (0x8), region = 142 }

</bundles_post_ra>
